<compile_context>
chip_gen: v6e
topology: v6e:2x2x1
jax: 0.10.0
libtpu: 0.0.40
codegen_flags: <defaults>
</compile_context>

<pallas_src>
import functools

import jax
import jax.numpy as jnp
from jax import lax
from jax.experimental import pallas as pl
from jax.experimental.pallas import tpu as pltpu

EMB_DIM = 30
HIDDEN_DIM = 64
LATENT_DIM = 4
PAD_IDX = 0        # c2i['<pad>']
LANE = 128


def _round_up(n, m):
    return ((n + m - 1) // m) * m


def _sigmoid(x):
    # exp goes to the EUP; exact (matches jax.nn.sigmoid to f32 rounding).
    return 1.0 / (1.0 + jnp.exp(-x))


def _decoder_kernel(*refs, is_latent_state, hidden_dim):
    if is_latent_state:
        (ids_ref, len_ref, z_ref, w_lat_ref, b_lat_ref,
         w_ei_ref, w_hh_ref, b_g_ref, w_fc_ref, b_fc_ref,
         logits_ref, hn_ref, cn_ref, gin_scr, out_scr) = refs
        # c0 = latent(z), h0 = 0    (PyTorch: state = (h0, c0))
        c = (jnp.dot(z_ref[...], w_lat_ref[...],
                     preferred_element_type=jnp.float32) + b_lat_ref[...])
        h = jnp.zeros_like(c)
    else:
        (ids_ref, len_ref, h0_ref, c0_ref,
         w_ei_ref, w_hh_ref, b_g_ref, w_fc_ref, b_fc_ref,
         logits_ref, hn_ref, cn_ref, gin_scr, out_scr) = refs
        h = h0_ref[...]
        c = c0_ref[...]

    H = hidden_dim
    Tp, TB, _ = ids_ref.shape          # ids are time-major (Tp, TB, 1) int32
    Vpad = w_ei_ref.shape[0]

    # ---- Hoisted input projection for ALL timesteps (one big MXU matmul) ----
    # onehot compare broadcasts ids (Tp, TB, 1) along the vocab lane axis,
    # so no cross-lane relayout is needed.  TB % 8 == 0 and Vpad % 128 == 0
    # make all reshapes tile-exact (free).
    onehot = (lax.broadcasted_iota(jnp.int32, (Tp, TB, Vpad), 2)
              == ids_ref[...]).astype(jnp.float32)              # (Tp, TB, Vpad)
    gin = (jnp.dot(onehot.reshape(Tp * TB, Vpad), w_ei_ref[...],
                   preferred_element_type=jnp.float32)
           + b_g_ref[...])                                      # (Tp*TB, 4H)
    gin_scr[...] = gin.reshape(Tp, TB, 4 * H)

    lengths = len_ref[...]                                      # (TB, 1) int32

    # ---- Recurrence: fully unrolled static loop, h/c carried in registers ----
    for t in range(Tp):
        gates = gin_scr[t] + jnp.dot(h, w_hh_ref[...],
                                     preferred_element_type=jnp.float32)
        i_g = _sigmoid(gates[:, 0 * H:1 * H])
        f_g = _sigmoid(gates[:, 1 * H:2 * H])
        g_g = jnp.tanh(gates[:, 2 * H:3 * H])
        o_g = _sigmoid(gates[:, 3 * H:4 * H])
        c_new = f_g * c + i_g * g_g
        h_new = o_g * jnp.tanh(c_new)

        # pack/pad semantics: freeze state, zero the padded output for
        # t >= length[b].  vselect instead of arithmetic mask.
        valid = lengths > t                                     # (TB, 1) bool
        h = jnp.where(valid, h_new, h)
        c = jnp.where(valid, c_new, c)
        out_scr[pl.ds(t, 1), :, :] = jnp.where(valid, h_new, 0.0)[None]

    hn_ref[...] = h
    cn_ref[...] = c

    # ---- Hoisted FC over the whole sequence; batch-major lane-dense store ----
    outs_bt = pltpu.einshape("tbh->bth", out_scr[...])          # (TB, Tp, H)
    logits = (jnp.dot(outs_bt.reshape(TB * Tp, H), w_fc_ref[...],
                      preferred_element_type=jnp.float32)
              + b_fc_ref[...])                                  # (TB*Tp, Vpad)
    logits_ref[...] = logits.reshape(TB, Tp, Vpad)


def decoder_forward(x_ids, lengths, state, params, *, is_latent_state=False,
                    batch_tile=128):
    """x_ids: (B, T) int32, lengths: (B,) int32,
    state: (B, latent_dim) if is_latent_state else (h0, c0) each (1,B,H)/(B,H).
    Returns (logits (B, T, V), lengths, (h_n, c_n)) with h_n/c_n of shape (1,B,H)."""
    emb, w_lat, b_lat, w_ih, w_hh, b_ih, b_hh, w_fc, b_fc = params
    B, T = x_ids.shape
    V, _E = emb.shape
    H = w_hh.shape[0]
    L = w_lat.shape[0]
    Vpad = _round_up(V, LANE)
    Tp = _round_up(T, 8)          # multiple of 8 -> tile-exact in-kernel reshapes

    # Fold embedding into the LSTM input projection (exact: no nonlinearity
    # between them), fuse biases, pad vocab to a lane multiple.
    w_emb_ih = jnp.pad(emb @ w_ih, ((0, Vpad - V), (0, 0)))         # (Vpad, 4H)
    b_gates = (b_ih + b_hh).reshape(1, 4 * H)
    w_fc_p = jnp.pad(w_fc, ((0, 0), (0, Vpad - V)))                 # (H, Vpad)
    b_fc_p = jnp.pad(b_fc.reshape(1, V), ((0, 0), (0, Vpad - V)))   # (1, Vpad)

    TB = min(_round_up(batch_tile, 8), _round_up(B, 8))
    B_pad = _round_up(B, TB)
    pb = B_pad - B
    # Padded timesteps use PAD_IDX and are masked out (lengths <= T).
    x_p = jnp.pad(x_ids.astype(jnp.int32), ((0, pb), (0, Tp - T)),
                  constant_values=PAD_IDX)
    # Time-major ids with a trailing singleton lane dim: in-kernel the batch
    # axis lands on sublanes and the vocab compare is a pure lane-broadcast.
    ids_tm = jnp.transpose(x_p, (1, 0))[:, :, None]                 # (Tp, B_pad, 1)
    len_p = jnp.pad(lengths.astype(jnp.int32), (0, pb)).reshape(B_pad, 1)

    if is_latent_state:
        z = jnp.asarray(state, jnp.float32).reshape(B, L)
        state_inputs = (jnp.pad(z, ((0, pb), (0, 0))), w_lat, b_lat.reshape(1, H))
        state_specs = [
            pl.BlockSpec((TB, L), lambda i: (i, 0)),
            pl.BlockSpec((L, H), lambda i: (0, 0)),
            pl.BlockSpec((1, H), lambda i: (0, 0)),
        ]
    else:
        h0, c0 = state
        h0 = jnp.asarray(h0, jnp.float32).reshape(B, H)
        c0 = jnp.asarray(c0, jnp.float32).reshape(B, H)
        state_inputs = (jnp.pad(h0, ((0, pb), (0, 0))),
                        jnp.pad(c0, ((0, pb), (0, 0))))
        state_specs = [
            pl.BlockSpec((TB, H), lambda i: (i, 0)),
            pl.BlockSpec((TB, H), lambda i: (i, 0)),
        ]

    weight_inputs = (w_emb_ih, w_hh, b_gates, w_fc_p, b_fc_p)
    weight_specs = [
        pl.BlockSpec((Vpad, 4 * H), lambda i: (0, 0)),
        pl.BlockSpec((H, 4 * H), lambda i: (0, 0)),
        pl.BlockSpec((1, 4 * H), lambda i: (0, 0)),
        pl.BlockSpec((H, Vpad), lambda i: (0, 0)),
        pl.BlockSpec((1, Vpad), lambda i: (0, 0)),
    ]

    kernel = functools.partial(_decoder_kernel,
                               is_latent_state=is_latent_state, hidden_dim=H)

    logits_pad, h_n, c_n = pl.pallas_call(
        kernel,
        grid=(B_pad // TB,),
        in_specs=[
            pl.BlockSpec((Tp, TB, 1), lambda i: (0, i, 0)),   # time-major token ids
            pl.BlockSpec((TB, 1), lambda i: (i, 0)),          # lengths
            *state_specs,
            *weight_specs,
        ],
        out_specs=[
            pl.BlockSpec((TB, Tp, Vpad), lambda i: (i, 0, 0)),   # (B, T, V) layout
            pl.BlockSpec((TB, H), lambda i: (i, 0)),             # h_n
            pl.BlockSpec((TB, H), lambda i: (i, 0)),             # c_n
        ],
        out_shape=[
            jax.ShapeDtypeStruct((B_pad, Tp, Vpad), jnp.float32),
            jax.ShapeDtypeStruct((B_pad, H), jnp.float32),
            jax.ShapeDtypeStruct((B_pad, H), jnp.float32),
        ],
        scratch_shapes=[
            pltpu.VMEM((Tp, TB, 4 * H), jnp.float32),   # hoisted input projections
            pltpu.VMEM((Tp, TB, H), jnp.float32),       # per-step masked outputs
        ],
        compiler_params=pltpu.CompilerParams(
            dimension_semantics=("parallel",)),
    )(ids_tm, len_p, *state_inputs, *weight_inputs)

    logits = logits_pad[:B, :T, :V]
    return logits, lengths, (h_n[:B][None], c_n[:B][None])


def init_params(key, vocab_size, emb_dim=EMB_DIM, latent_dim=LATENT_DIM,
                hidden_dim=HIDDEN_DIM, pad_idx=PAD_IDX):
    """Params in math layout (in_features, out_features); LSTM gate order i|f|g|o."""
    ks = jax.random.split(key, 9)
    u = lambda k, s, b: jax.random.uniform(k, s, jnp.float32, -b, b)
    emb = jax.random.normal(ks[0], (vocab_size, emb_dim), jnp.float32)
    emb = emb.at[pad_idx].set(0.0)                       # nn.Embedding padding_idx
    bl = 1.0 / float(latent_dim) ** 0.5
    bh = 1.0 / float(hidden_dim) ** 0.5
    w_lat = u(ks[1], (latent_dim, hidden_dim), bl)
    b_lat = u(ks[2], (hidden_dim,), bl)
    w_ih = u(ks[3], (emb_dim, 4 * hidden_dim), bh)
    w_hh = u(ks[4], (hidden_dim, 4 * hidden_dim), bh)
    b_ih = u(ks[5], (4 * hidden_dim,), bh)
    b_hh = u(ks[6], (4 * hidden_dim,), bh)
    w_fc = u(ks[7], (hidden_dim, vocab_size), bh)
    b_fc = u(ks[8], (vocab_size,), bh)
    return (emb, w_lat, b_lat, w_ih, w_hh, b_ih, b_hh, w_fc, b_fc)


def reference_forward(x_ids, lengths, state, params, *, is_latent_state=False):
    """Pure-JAX reference with PyTorch packed-LSTM semantics."""
    emb, w_lat, b_lat, w_ih, w_hh, b_ih, b_hh, w_fc, b_fc = params
    B, T = x_ids.shape
    H = w_hh.shape[0]
    if is_latent_state:
        c0 = state.reshape(B, -1) @ w_lat + b_lat
        h0 = jnp.zeros_like(c0)
    else:
        h0, c0 = state
        h0 = h0.reshape(B, H)
        c0 = c0.reshape(B, H)
    x_emb = emb[x_ids]                                   # (B, T, E)

    def step(carry, t):
        h, c = carry
        g = x_emb[:, t, :] @ w_ih + h @ w_hh + b_ih + b_hh
        i = jax.nn.sigmoid(g[:, :H])
        f = jax.nn.sigmoid(g[:, H:2 * H])
        gg = jnp.tanh(g[:, 2 * H:3 * H])
        o = jax.nn.sigmoid(g[:, 3 * H:])
        c_new = f * c + i * gg
        h_new = o * jnp.tanh(c_new)
        valid = (t < lengths)[:, None]
        h = jnp.where(valid, h_new, h)
        c = jnp.where(valid, c_new, c)
        return (h, c), jnp.where(valid, h_new, 0.0)

    (hN, cN), outs = lax.scan(step, (h0, c0), jnp.arange(T))
    logits = jnp.transpose(outs, (1, 0, 2)) @ w_fc + b_fc
    return logits, lengths, (hN[None], cN[None])


def _check(name, got, want, atol=2e-3):
    assert got.shape == want.shape, (name, got.shape, want.shape)
    err = float(jnp.max(jnp.abs(got - want)))
    assert err < atol, f"{name}: max abs err {err}"


if __name__ == "__main__":
    key = jax.random.PRNGKey(0)
    k_tok, k_len, k_z, k_par = jax.random.split(key, 4)

    VOCAB = 26                 # len(vocab)
    B, T = 16, 12

    params = init_params(k_par, VOCAB)

    lengths = jax.random.randint(k_len, (B,), 1, T + 1).astype(jnp.int32)
    lengths = lengths.at[0].set(T)            # pad_packed pads to max(lengths)
    tokens = jax.random.randint(k_tok, (B, T), 1, VOCAB).astype(jnp.int32)
    tokens = jnp.where(jnp.arange(T)[None, :] < lengths[:, None], tokens, PAD_IDX)

    z = jax.random.normal(k_z, (B, LATENT_DIM), jnp.float32)

    # Path 1: is_latent_state=True  (c0 = latent(z), h0 = 0)
    logits, out_len, (h_n, c_n) = decoder_forward(
        tokens, lengths, z, params, is_latent_state=True)
    jax.block_until_ready(logits)
    r_logits, _, (r_h, r_c) = reference_forward(
        tokens, lengths, z, params, is_latent_state=True)
    _check("logits(latent)", logits, r_logits)
    _check("h_n(latent)", h_n, r_h)
    _check("c_n(latent)", c_n, r_c)

    # Path 2: explicit (h0, c0) initial state
    logits2, _, (h_n2, c_n2) = decoder_forward(
        tokens, lengths, (h_n, c_n), params, is_latent_state=False)
    jax.block_until_ready(logits2)
    r_logits2, _, (r_h2, r_c2) = reference_forward(
        tokens, lengths, (r_h, r_c), params, is_latent_state=False)
    _check("logits(state)", logits2, r_logits2)
    _check("h_n(state)", h_n2, r_h2)
    _check("c_n(state)", c_n2, r_c2)

    print("KERNEL_OK")
</pallas_src>

<mosaic_0001>
module attributes {stable_mosaic.version = 11 : i64} {
  func.func @_decoder_kernel(%arg0: i32, %arg1: memref<16x16x1xi32, #tpu.memory_space<vmem>>, %arg2: memref<16x1xi32, #tpu.memory_space<vmem>>, %arg3: memref<16x4xf32, #tpu.memory_space<vmem>>, %arg4: memref<4x64xf32, #tpu.memory_space<vmem>>, %arg5: memref<1x64xf32, #tpu.memory_space<vmem>>, %arg6: memref<128x256xf32, #tpu.memory_space<vmem>>, %arg7: memref<64x256xf32, #tpu.memory_space<vmem>>, %arg8: memref<1x256xf32, #tpu.memory_space<vmem>>, %arg9: memref<64x128xf32, #tpu.memory_space<vmem>>, %arg10: memref<1x128xf32, #tpu.memory_space<vmem>>, %arg11: memref<16x16x128xf32, #tpu.memory_space<vmem>>, %arg12: memref<16x64xf32, #tpu.memory_space<vmem>>, %arg13: memref<16x64xf32, #tpu.memory_space<vmem>>, %arg14: memref<16x16x256xf32, #tpu.memory_space<vmem>>, %arg15: memref<16x16x64xf32, #tpu.memory_space<vmem>>) attributes {dimension_semantics = [#tpu.dimension_semantics<parallel>], iteration_bounds = array<i64: 1>, scalar_prefetch = 0 : i64, scratch_operands = 2 : i64, tpu.core_type = #tpu.core_type<tc>, window_params = [{transform_indices = @transform_0, window_bounds = array<i64: 16, 16, 1>}, {transform_indices = @transform_1, window_bounds = array<i64: 16, 1>}, {transform_indices = @transform_2, window_bounds = array<i64: 16, 4>}, {pipeline_mode = #tpu.pipeline_mode<synchronous>, transform_indices = @transform_3, window_bounds = array<i64: 4, 64>}, {pipeline_mode = #tpu.pipeline_mode<synchronous>, transform_indices = @transform_4, window_bounds = array<i64: 1, 64>}, {pipeline_mode = #tpu.pipeline_mode<synchronous>, transform_indices = @transform_5, window_bounds = array<i64: 128, 256>}, {pipeline_mode = #tpu.pipeline_mode<synchronous>, transform_indices = @transform_6, window_bounds = array<i64: 64, 256>}, {pipeline_mode = #tpu.pipeline_mode<synchronous>, transform_indices = @transform_7, window_bounds = array<i64: 1, 256>}, {pipeline_mode = #tpu.pipeline_mode<synchronous>, transform_indices = @transform_8, window_bounds = array<i64: 64, 128>}, {pipeline_mode = #tpu.pipeline_mode<synchronous>, transform_indices = @transform_9, window_bounds = array<i64: 1, 128>}, {transform_indices = @transform_10, window_bounds = array<i64: 16, 16, 128>}, {transform_indices = @transform_11, window_bounds = array<i64: 16, 64>}, {transform_indices = @transform_12, window_bounds = array<i64: 16, 64>}]} {
    %c0 = arith.constant 0 : index
    %c0_0 = arith.constant 0 : index
    %0 = vector.load %arg3[%c0, %c0_0] : memref<16x4xf32, #tpu.memory_space<vmem>>, vector<16x4xf32>
    %c0_1 = arith.constant 0 : index
    %c0_2 = arith.constant 0 : index
    %1 = vector.load %arg4[%c0_1, %c0_2] : memref<4x64xf32, #tpu.memory_space<vmem>>, vector<4x64xf32>
    %cst = arith.constant dense<0.000000e+00> : vector<16x64xf32>
    %2 = tpu.matmul %0, %1, %cst {dimension_numbers = #tpu.dot_dimension_numbers<[1], [0], [0], [1], [0, 0, 1, 1], [], []>} : vector<16x4xf32>, vector<4x64xf32>, vector<16x64xf32> -> vector<16x64xf32>
    %c0_3 = arith.constant 0 : index
    %c0_4 = arith.constant 0 : index
    %3 = vector.load %arg5[%c0_3, %c0_4] : memref<1x64xf32, #tpu.memory_space<vmem>>, vector<1x64xf32>
    %4 = vector.broadcast %3 : vector<1x64xf32> to vector<16x64xf32>
    %5 = arith.addf %2, %4 : vector<16x64xf32>
    %cst_5 = arith.constant 0.000000e+00 : f32
    %6 = vector.broadcast %cst_5 : f32 to vector<16x64xf32>
    %7 = tpu.iota {dimensions = array<i32: 2>} : vector<16x16x128xi32>
    %c0_6 = arith.constant 0 : index
    %c0_7 = arith.constant 0 : index
    %c0_8 = arith.constant 0 : index
    %8 = vector.load %arg1[%c0_6, %c0_7, %c0_8] : memref<16x16x1xi32, #tpu.memory_space<vmem>>, vector<16x16x1xi32>
    %9 = vector.broadcast %8 : vector<16x16x1xi32> to vector<16x16x128xi32>
    %10 = arith.cmpi eq, %7, %9 : vector<16x16x128xi32>
    %11 = arith.extui %10 : vector<16x16x128xi1> to vector<16x16x128xi32>
    %12 = arith.sitofp %11 : vector<16x16x128xi32> to vector<16x16x128xf32>
    %13 = vector.shape_cast %12 : vector<16x16x128xf32> to vector<256x128xf32>
    %c0_9 = arith.constant 0 : index
    %c0_10 = arith.constant 0 : index
    %14 = vector.load %arg6[%c0_9, %c0_10] : memref<128x256xf32, #tpu.memory_space<vmem>>, vector<128x256xf32>
    %cst_11 = arith.constant dense<0.000000e+00> : vector<256x256xf32>
    %15 = tpu.matmul %13, %14, %cst_11 {dimension_numbers = #tpu.dot_dimension_numbers<[1], [0], [0], [1], [0, 0, 1, 1], [], []>} : vector<256x128xf32>, vector<128x256xf32>, vector<256x256xf32> -> vector<256x256xf32>
    %c0_12 = arith.constant 0 : index
    %c0_13 = arith.constant 0 : index
    %16 = vector.load %arg8[%c0_12, %c0_13] : memref<1x256xf32, #tpu.memory_space<vmem>>, vector<1x256xf32>
    %17 = vector.broadcast %16 : vector<1x256xf32> to vector<256x256xf32>
    %18 = arith.addf %15, %17 : vector<256x256xf32>
    %19 = vector.shape_cast %18 : vector<256x256xf32> to vector<16x16x256xf32>
    %c0_14 = arith.constant 0 : index
    %c0_15 = arith.constant 0 : index
    %c0_16 = arith.constant 0 : index
    %20 = vector.load %arg14[%c0_14, %c0_15, %c0_16] : memref<16x16x256xf32, #tpu.memory_space<vmem>>, vector<16x16x256xf32>
    tpu.vector_store %arg14[%c0_14, %c0_15, %c0_16], %19 {strides = array<i32>} : memref<16x16x256xf32, #tpu.memory_space<vmem>>, vector<16x16x256xf32>,
    %c0_17 = arith.constant 0 : index
    %c0_18 = arith.constant 0 : index
    %21 = vector.load %arg2[%c0_17, %c0_18] : memref<16x1xi32, #tpu.memory_space<vmem>>, vector<16x1xi32>
    %c0_19 = arith.constant 0 : index
    %c0_20 = arith.constant 0 : index
    %c0_21 = arith.constant 0 : index
    %22 = vector.load %arg14[%c0_19, %c0_20, %c0_21] : memref<16x16x256xf32, #tpu.memory_space<vmem>>, vector<1x16x256xf32>
    %23 = vector.shape_cast %22 : vector<1x16x256xf32> to vector<16x256xf32>
    %c0_22 = arith.constant 0 : index
    %c0_23 = arith.constant 0 : index
    %24 = vector.load %arg7[%c0_22, %c0_23] : memref<64x256xf32, #tpu.memory_space<vmem>>, vector<64x256xf32>
    %cst_24 = arith.constant dense<0.000000e+00> : vector<16x256xf32>
    %25 = tpu.matmul %6, %24, %cst_24 {dimension_numbers = #tpu.dot_dimension_numbers<[1], [0], [0], [1], [0, 0, 1, 1], [], []>} : vector<16x64xf32>, vector<64x256xf32>, vector<16x256xf32> -> vector<16x256xf32>
    %26 = arith.addf %23, %25 : vector<16x256xf32>
    %27 = vector.extract_strided_slice %26 {offsets = [0, 0], sizes = [16, 64], strides = [1, 1]} : vector<16x256xf32> to vector<16x64xf32>
    %cst_25 = arith.constant 0.000000e+00 : f32
    %28 = vector.broadcast %cst_25 : f32 to vector<16x64xf32>
    %29 = arith.subf %28, %27 : vector<16x64xf32>
    %30 = math.exp %29 : vector<16x64xf32>
    %cst_26 = arith.constant 1.000000e+00 : f32
    %31 = vector.broadcast %cst_26 : f32 to vector<16x64xf32>
    %32 = arith.addf %31, %30 : vector<16x64xf32>
    %cst_27 = arith.constant 1.000000e+00 : f32
    %33 = vector.broadcast %cst_27 : f32 to vector<16x64xf32>
    %34 = arith.divf %33, %32 : vector<16x64xf32>
    %35 = vector.extract_strided_slice %26 {offsets = [0, 64], sizes = [16, 64], strides = [1, 1]} : vector<16x256xf32> to vector<16x64xf32>
    %cst_28 = arith.constant 0.000000e+00 : f32
    %36 = vector.broadcast %cst_28 : f32 to vector<16x64xf32>
    %37 = arith.subf %36, %35 : vector<16x64xf32>
    %38 = math.exp %37 : vector<16x64xf32>
    %cst_29 = arith.constant 1.000000e+00 : f32
    %39 = vector.broadcast %cst_29 : f32 to vector<16x64xf32>
    %40 = arith.addf %39, %38 : vector<16x64xf32>
    %cst_30 = arith.constant 1.000000e+00 : f32
    %41 = vector.broadcast %cst_30 : f32 to vector<16x64xf32>
    %42 = arith.divf %41, %40 : vector<16x64xf32>
    %43 = vector.extract_strided_slice %26 {offsets = [0, 128], sizes = [16, 64], strides = [1, 1]} : vector<16x256xf32> to vector<16x64xf32>
    %44 = math.tanh %43 : vector<16x64xf32>
    %45 = vector.extract_strided_slice %26 {offsets = [0, 192], sizes = [16, 64], strides = [1, 1]} : vector<16x256xf32> to vector<16x64xf32>
    %cst_31 = arith.constant 0.000000e+00 : f32
    %46 = vector.broadcast %cst_31 : f32 to vector<16x64xf32>
    %47 = arith.subf %46, %45 : vector<16x64xf32>
    %48 = math.exp %47 : vector<16x64xf32>
    %cst_32 = arith.constant 1.000000e+00 : f32
    %49 = vector.broadcast %cst_32 : f32 to vector<16x64xf32>
    %50 = arith.addf %49, %48 : vector<16x64xf32>
    %cst_33 = arith.constant 1.000000e+00 : f32
    %51 = vector.broadcast %cst_33 : f32 to vector<16x64xf32>
    %52 = arith.divf %51, %50 : vector<16x64xf32>
    %53 = arith.mulf %42, %5 : vector<16x64xf32>
    %54 = arith.mulf %34, %44 : vector<16x64xf32>
    %55 = arith.addf %53, %54 : vector<16x64xf32>
    %56 = math.tanh %55 : vector<16x64xf32>
    %57 = arith.mulf %52, %56 : vector<16x64xf32>
    %c0_i32 = arith.constant 0 : i32
    %58 = vector.broadcast %c0_i32 : i32 to vector<16x1xi32>
    %59 = arith.cmpi sgt, %21, %58 : vector<16x1xi32>
    %60 = vector.shape_cast %59 : vector<16x1xi1> to vector<16x1xi1>
    %61 = vector.broadcast %60 : vector<16x1xi1> to vector<16x64xi1>
    %62 = arith.select %61, %57, %6 : vector<16x64xi1>, vector<16x64xf32>
    %63 = vector.shape_cast %59 : vector<16x1xi1> to vector<16x1xi1>
    %64 = vector.broadcast %63 : vector<16x1xi1> to vector<16x64xi1>
    %65 = arith.select %64, %55, %5 : vector<16x64xi1>, vector<16x64xf32>
    %cst_34 = arith.constant 0.000000e+00 : f32
    %66 = vector.shape_cast %59 : vector<16x1xi1> to vector<16x1xi1>
    %67 = vector.broadcast %66 : vector<16x1xi1> to vector<16x64xi1>
    %68 = vector.broadcast %cst_34 : f32 to vector<16x64xf32>
    %69 = arith.select %67, %57, %68 : vector<16x64xi1>, vector<16x64xf32>
    %70 = vector.shape_cast %69 : vector<16x64xf32> to vector<1x16x64xf32>
    %c0_35 = arith.constant 0 : index
    %c0_36 = arith.constant 0 : index
    %c0_37 = arith.constant 0 : index
    %71 = vector.load %arg15[%c0_35, %c0_36, %c0_37] : memref<16x16x64xf32, #tpu.memory_space<vmem>>, vector<1x16x64xf32>
    tpu.vector_store %arg15[%c0_35, %c0_36, %c0_37], %70 {strides = array<i32>} : memref<16x16x64xf32, #tpu.memory_space<vmem>>, vector<1x16x64xf32>,
    %c1 = arith.constant 1 : index
    %c0_38 = arith.constant 0 : index
    %c0_39 = arith.constant 0 : index
    %72 = vector.load %arg14[%c1, %c0_38, %c0_39] : memref<16x16x256xf32, #tpu.memory_space<vmem>>, vector<1x16x256xf32>
    %73 = vector.shape_cast %72 : vector<1x16x256xf32> to vector<16x256xf32>
    %c0_40 = arith.constant 0 : index
    %c0_41 = arith.constant 0 : index
    %74 = vector.load %arg7[%c0_40, %c0_41] : memref<64x256xf32, #tpu.memory_space<vmem>>, vector<64x256xf32>
    %cst_42 = arith.constant dense<0.000000e+00> : vector<16x256xf32>
    %75 = tpu.matmul %62, %74, %cst_42 {dimension_numbers = #tpu.dot_dimension_numbers<[1], [0], [0], [1], [0, 0, 1, 1], [], []>} : vector<16x64xf32>, vector<64x256xf32>, vector<16x256xf32> -> vector<16x256xf32>
    %76 = arith.addf %73, %75 : vector<16x256xf32>
    %77 = vector.extract_strided_slice %76 {offsets = [0, 0], sizes = [16, 64], strides = [1, 1]} : vector<16x256xf32> to vector<16x64xf32>
    %cst_43 = arith.constant 0.000000e+00 : f32
    %78 = vector.broadcast %cst_43 : f32 to vector<16x64xf32>
    %79 = arith.subf %78, %77 : vector<16x64xf32>
    %80 = math.exp %79 : vector<16x64xf32>
    %cst_44 = arith.constant 1.000000e+00 : f32
    %81 = vector.broadcast %cst_44 : f32 to vector<16x64xf32>
    %82 = arith.addf %81, %80 : vector<16x64xf32>
    %cst_45 = arith.constant 1.000000e+00 : f32
    %83 = vector.broadcast %cst_45 : f32 to vector<16x64xf32>
    %84 = arith.divf %83, %82 : vector<16x64xf32>
    %85 = vector.extract_strided_slice %76 {offsets = [0, 64], sizes = [16, 64], strides = [1, 1]} : vector<16x256xf32> to vector<16x64xf32>
    %cst_46 = arith.constant 0.000000e+00 : f32
    %86 = vector.broadcast %cst_46 : f32 to vector<16x64xf32>
    %87 = arith.subf %86, %85 : vector<16x64xf32>
    %88 = math.exp %87 : vector<16x64xf32>
    %cst_47 = arith.constant 1.000000e+00 : f32
    %89 = vector.broadcast %cst_47 : f32 to vector<16x64xf32>
    %90 = arith.addf %89, %88 : vector<16x64xf32>
    %cst_48 = arith.constant 1.000000e+00 : f32
    %91 = vector.broadcast %cst_48 : f32 to vector<16x64xf32>
    %92 = arith.divf %91, %90 : vector<16x64xf32>
    %93 = vector.extract_strided_slice %76 {offsets = [0, 128], sizes = [16, 64], strides = [1, 1]} : vector<16x256xf32> to vector<16x64xf32>
    %94 = math.tanh %93 : vector<16x64xf32>
    %95 = vector.extract_strided_slice %76 {offsets = [0, 192], sizes = [16, 64], strides = [1, 1]} : vector<16x256xf32> to vector<16x64xf32>
    %cst_49 = arith.constant 0.000000e+00 : f32
    %96 = vector.broadcast %cst_49 : f32 to vector<16x64xf32>
    %97 = arith.subf %96, %95 : vector<16x64xf32>
    %98 = math.exp %97 : vector<16x64xf32>
    %cst_50 = arith.constant 1.000000e+00 : f32
    %99 = vector.broadcast %cst_50 : f32 to vector<16x64xf32>
    %100 = arith.addf %99, %98 : vector<16x64xf32>
    %cst_51 = arith.constant 1.000000e+00 : f32
    %101 = vector.broadcast %cst_51 : f32 to vector<16x64xf32>
    %102 = arith.divf %101, %100 : vector<16x64xf32>
    %103 = arith.mulf %92, %65 : vector<16x64xf32>
    %104 = arith.mulf %84, %94 : vector<16x64xf32>
    %105 = arith.addf %103, %104 : vector<16x64xf32>
    %106 = math.tanh %105 : vector<16x64xf32>
    %107 = arith.mulf %102, %106 : vector<16x64xf32>
    %c1_i32 = arith.constant 1 : i32
    %108 = vector.broadcast %c1_i32 : i32 to vector<16x1xi32>
    %109 = arith.cmpi sgt, %21, %108 : vector<16x1xi32>
    %110 = vector.shape_cast %109 : vector<16x1xi1> to vector<16x1xi1>
    %111 = vector.broadcast %110 : vector<16x1xi1> to vector<16x64xi1>
    %112 = arith.select %111, %107, %62 : vector<16x64xi1>, vector<16x64xf32>
    %113 = vector.shape_cast %109 : vector<16x1xi1> to vector<16x1xi1>
    %114 = vector.broadcast %113 : vector<16x1xi1> to vector<16x64xi1>
    %115 = arith.select %114, %105, %65 : vector<16x64xi1>, vector<16x64xf32>
    %cst_52 = arith.constant 0.000000e+00 : f32
    %116 = vector.shape_cast %109 : vector<16x1xi1> to vector<16x1xi1>
    %117 = vector.broadcast %116 : vector<16x1xi1> to vector<16x64xi1>
    %118 = vector.broadcast %cst_52 : f32 to vector<16x64xf32>
    %119 = arith.select %117, %107, %118 : vector<16x64xi1>, vector<16x64xf32>
    %120 = vector.shape_cast %119 : vector<16x64xf32> to vector<1x16x64xf32>
    %c1_53 = arith.constant 1 : index
    %c0_54 = arith.constant 0 : index
    %c0_55 = arith.constant 0 : index
    %121 = vector.load %arg15[%c1_53, %c0_54, %c0_55] : memref<16x16x64xf32, #tpu.memory_space<vmem>>, vector<1x16x64xf32>
    tpu.vector_store %arg15[%c1_53, %c0_54, %c0_55], %120 {strides = array<i32>} : memref<16x16x64xf32, #tpu.memory_space<vmem>>, vector<1x16x64xf32>,
    %c2 = arith.constant 2 : index
    %c0_56 = arith.constant 0 : index
    %c0_57 = arith.constant 0 : index
    %122 = vector.load %arg14[%c2, %c0_56, %c0_57] : memref<16x16x256xf32, #tpu.memory_space<vmem>>, vector<1x16x256xf32>
    %123 = vector.shape_cast %122 : vector<1x16x256xf32> to vector<16x256xf32>
    %c0_58 = arith.constant 0 : index
    %c0_59 = arith.constant 0 : index
    %124 = vector.load %arg7[%c0_58, %c0_59] : memref<64x256xf32, #tpu.memory_space<vmem>>, vector<64x256xf32>
    %cst_60 = arith.constant dense<0.000000e+00> : vector<16x256xf32>
    %125 = tpu.matmul %112, %124, %cst_60 {dimension_numbers = #tpu.dot_dimension_numbers<[1], [0], [0], [1], [0, 0, 1, 1], [], []>} : vector<16x64xf32>, vector<64x256xf32>, vector<16x256xf32> -> vector<16x256xf32>
    %126 = arith.addf %123, %125 : vector<16x256xf32>
    %127 = vector.extract_strided_slice %126 {offsets = [0, 0], sizes = [16, 64], strides = [1, 1]} : vector<16x256xf32> to vector<16x64xf32>
    %cst_61 = arith.constant 0.000000e+00 : f32
    %128 = vector.broadcast %cst_61 : f32 to vector<16x64xf32>
    %129 = arith.subf %128, %127 : vector<16x64xf32>
    %130 = math.exp %129 : vector<16x64xf32>
    %cst_62 = arith.constant 1.000000e+00 : f32
    %131 = vector.broadcast %cst_62 : f32 to vector<16x64xf32>
    %132 = arith.addf %131, %130 : vector<16x64xf32>
    %cst_63 = arith.constant 1.000000e+00 : f32
    %133 = vector.broadcast %cst_63 : f32 to vector<16x64xf32>
    %134 = arith.divf %133, %132 : vector<16x64xf32>
    %135 = vector.extract_strided_slice %126 {offsets = [0, 64], sizes = [16, 64], strides = [1, 1]} : vector<16x256xf32> to vector<16x64xf32>
    %cst_64 = arith.constant 0.000000e+00 : f32
    %136 = vector.broadcast %cst_64 : f32 to vector<16x64xf32>
    %137 = arith.subf %136, %135 : vector<16x64xf32>
    %138 = math.exp %137 : vector<16x64xf32>
    %cst_65 = arith.constant 1.000000e+00 : f32
    %139 = vector.broadcast %cst_65 : f32 to vector<16x64xf32>
    %140 = arith.addf %139, %138 : vector<16x64xf32>
    %cst_66 = arith.constant 1.000000e+00 : f32
    %141 = vector.broadcast %cst_66 : f32 to vector<16x64xf32>
    %142 = arith.divf %141, %140 : vector<16x64xf32>
    %143 = vector.extract_strided_slice %126 {offsets = [0, 128], sizes = [16, 64], strides = [1, 1]} : vector<16x256xf32> to vector<16x64xf32>
    %144 = math.tanh %143 : vector<16x64xf32>
    %145 = vector.extract_strided_slice %126 {offsets = [0, 192], sizes = [16, 64], strides = [1, 1]} : vector<16x256xf32> to vector<16x64xf32>
    %cst_67 = arith.constant 0.000000e+00 : f32
    %146 = vector.broadcast %cst_67 : f32 to vector<16x64xf32>
    %147 = arith.subf %146, %145 : vector<16x64xf32>
    %148 = math.exp %147 : vector<16x64xf32>
    %cst_68 = arith.constant 1.000000e+00 : f32
    %149 = vector.broadcast %cst_68 : f32 to vector<16x64xf32>
    %150 = arith.addf %149, %148 : vector<16x64xf32>
    %cst_69 = arith.constant 1.000000e+00 : f32
    %151 = vector.broadcast %cst_69 : f32 to vector<16x64xf32>
    %152 = arith.divf %151, %150 : vector<16x64xf32>
    %153 = arith.mulf %142, %115 : vector<16x64xf32>
    %154 = arith.mulf %134, %144 : vector<16x64xf32>
    %155 = arith.addf %153, %154 : vector<16x64xf32>
    %156 = math.tanh %155 : vector<16x64xf32>
    %157 = arith.mulf %152, %156 : vector<16x64xf32>
    %c2_i32 = arith.constant 2 : i32
    %158 = vector.broadcast %c2_i32 : i32 to vector<16x1xi32>
    %159 = arith.cmpi sgt, %21, %158 : vector<16x1xi32>
    %160 = vector.shape_cast %159 : vector<16x1xi1> to vector<16x1xi1>
    %161 = vector.broadcast %160 : vector<16x1xi1> to vector<16x64xi1>
    %162 = arith.select %161, %157, %112 : vector<16x64xi1>, vector<16x64xf32>
    %163 = vector.shape_cast %159 : vector<16x1xi1> to vector<16x1xi1>
    %164 = vector.broadcast %163 : vector<16x1xi1> to vector<16x64xi1>
    %165 = arith.select %164, %155, %115 : vector<16x64xi1>, vector<16x64xf32>
    %cst_70 = arith.constant 0.000000e+00 : f32
    %166 = vector.shape_cast %159 : vector<16x1xi1> to vector<16x1xi1>
    %167 = vector.broadcast %166 : vector<16x1xi1> to vector<16x64xi1>
    %168 = vector.broadcast %cst_70 : f32 to vector<16x64xf32>
    %169 = arith.select %167, %157, %168 : vector<16x64xi1>, vector<16x64xf32>
    %170 = vector.shape_cast %169 : vector<16x64xf32> to vector<1x16x64xf32>
    %c2_71 = arith.constant 2 : index
    %c0_72 = arith.constant 0 : index
    %c0_73 = arith.constant 0 : index
    %171 = vector.load %arg15[%c2_71, %c0_72, %c0_73] : memref<16x16x64xf32, #tpu.memory_space<vmem>>, vector<1x16x64xf32>
    tpu.vector_store %arg15[%c2_71, %c0_72, %c0_73], %170 {strides = array<i32>} : memref<16x16x64xf32, #tpu.memory_space<vmem>>, vector<1x16x64xf32>,
    %c3 = arith.constant 3 : index
    %c0_74 = arith.constant 0 : index
    %c0_75 = arith.constant 0 : index
    %172 = vector.load %arg14[%c3, %c0_74, %c0_75] : memref<16x16x256xf32, #tpu.memory_space<vmem>>, vector<1x16x256xf32>
    %173 = vector.shape_cast %172 : vector<1x16x256xf32> to vector<16x256xf32>
    %c0_76 = arith.constant 0 : index
    %c0_77 = arith.constant 0 : index
    %174 = vector.load %arg7[%c0_76, %c0_77] : memref<64x256xf32, #tpu.memory_space<vmem>>, vector<64x256xf32>
    %cst_78 = arith.constant dense<0.000000e+00> : vector<16x256xf32>
    %175 = tpu.matmul %162, %174, %cst_78 {dimension_numbers = #tpu.dot_dimension_numbers<[1], [0], [0], [1], [0, 0, 1, 1], [], []>} : vector<16x64xf32>, vector<64x256xf32>, vector<16x256xf32> -> vector<16x256xf32>
    %176 = arith.addf %173, %175 : vector<16x256xf32>
    %177 = vector.extract_strided_slice %176 {offsets = [0, 0], sizes = [16, 64], strides = [1, 1]} : vector<16x256xf32> to vector<16x64xf32>
    %cst_79 = arith.constant 0.000000e+00 : f32
    %178 = vector.broadcast %cst_79 : f32 to vector<16x64xf32>
    %179 = arith.subf %178, %177 : vector<16x64xf32>
    %180 = math.exp %179 : vector<16x64xf32>
    %cst_80 = arith.constant 1.000000e+00 : f32
    %181 = vector.broadcast %cst_80 : f32 to vector<16x64xf32>
    %182 = arith.addf %181, %180 : vector<16x64xf32>
    %cst_81 = arith.constant 1.000000e+00 : f32
    %183 = vector.broadcast %cst_81 : f32 to vector<16x64xf32>
    %184 = arith.divf %183, %182 : vector<16x64xf32>
    %185 = vector.extract_strided_slice %176 {offsets = [0, 64], sizes = [16, 64], strides = [1, 1]} : vector<16x256xf32> to vector<16x64xf32>
    %cst_82 = arith.constant 0.000000e+00 : f32
    %186 = vector.broadcast %cst_82 : f32 to vector<16x64xf32>
    %187 = arith.subf %186, %185 : vector<16x64xf32>
    %188 = math.exp %187 : vector<16x64xf32>
    %cst_83 = arith.constant 1.000000e+00 : f32
    %189 = vector.broadcast %cst_83 : f32 to vector<16x64xf32>
    %190 = arith.addf %189, %188 : vector<16x64xf32>
    %cst_84 = arith.constant 1.000000e+00 : f32
    %191 = vector.broadcast %cst_84 : f32 to vector<16x64xf32>
    %192 = arith.divf %191, %190 : vector<16x64xf32>
    %193 = vector.extract_strided_slice %176 {offsets = [0, 128], sizes = [16, 64], strides = [1, 1]} : vector<16x256xf32> to vector<16x64xf32>
    %194 = math.tanh %193 : vector<16x64xf32>
    %195 = vector.extract_strided_slice %176 {offsets = [0, 192], sizes = [16, 64], strides = [1, 1]} : vector<16x256xf32> to vector<16x64xf32>
    %cst_85 = arith.constant 0.000000e+00 : f32
    %196 = vector.broadcast %cst_85 : f32 to vector<16x64xf32>
    %197 = arith.subf %196, %195 : vector<16x64xf32>
    %198 = math.exp %197 : vector<16x64xf32>
    %cst_86 = arith.constant 1.000000e+00 : f32
    %199 = vector.broadcast %cst_86 : f32 to vector<16x64xf32>
    %200 = arith.addf %199, %198 : vector<16x64xf32>
    %cst_87 = arith.constant 1.000000e+00 : f32
    %201 = vector.broadcast %cst_87 : f32 to vector<16x64xf32>
    %202 = arith.divf %201, %200 : vector<16x64xf32>
    %203 = arith.mulf %192, %165 : vector<16x64xf32>
    %204 = arith.mulf %184, %194 : vector<16x64xf32>
    %205 = arith.addf %203, %204 : vector<16x64xf32>
    %206 = math.tanh %205 : vector<16x64xf32>
    %207 = arith.mulf %202, %206 : vector<16x64xf32>
    %c3_i32 = arith.constant 3 : i32
    %208 = vector.broadcast %c3_i32 : i32 to vector<16x1xi32>
    %209 = arith.cmpi sgt, %21, %208 : vector<16x1xi32>
    %210 = vector.shape_cast %209 : vector<16x1xi1> to vector<16x1xi1>
    %211 = vector.broadcast %210 : vector<16x1xi1> to vector<16x64xi1>
    %212 = arith.select %211, %207, %162 : vector<16x64xi1>, vector<16x64xf32>
    %213 = vector.shape_cast %209 : vector<16x1xi1> to vector<16x1xi1>
    %214 = vector.broadcast %213 : vector<16x1xi1> to vector<16x64xi1>
    %215 = arith.select %214, %205, %165 : vector<16x64xi1>, vector<16x64xf32>
    %cst_88 = arith.constant 0.000000e+00 : f32
    %216 = vector.shape_cast %209 : vector<16x1xi1> to vector<16x1xi1>
    %217 = vector.broadcast %216 : vector<16x1xi1> to vector<16x64xi1>
    %218 = vector.broadcast %cst_88 : f32 to vector<16x64xf32>
    %219 = arith.select %217, %207, %218 : vector<16x64xi1>, vector<16x64xf32>
    %220 = vector.shape_cast %219 : vector<16x64xf32> to vector<1x16x64xf32>
    %c3_89 = arith.constant 3 : index
    %c0_90 = arith.constant 0 : index
    %c0_91 = arith.constant 0 : index
    %221 = vector.load %arg15[%c3_89, %c0_90, %c0_91] : memref<16x16x64xf32, #tpu.memory_space<vmem>>, vector<1x16x64xf32>
    tpu.vector_store %arg15[%c3_89, %c0_90, %c0_91], %220 {strides = array<i32>} : memref<16x16x64xf32, #tpu.memory_space<vmem>>, vector<1x16x64xf32>,
    %c4 = arith.constant 4 : index
    %c0_92 = arith.constant 0 : index
    %c0_93 = arith.constant 0 : index
    %222 = vector.load %arg14[%c4, %c0_92, %c0_93] : memref<16x16x256xf32, #tpu.memory_space<vmem>>, vector<1x16x256xf32>
    %223 = vector.shape_cast %222 : vector<1x16x256xf32> to vector<16x256xf32>
    %c0_94 = arith.constant 0 : index
    %c0_95 = arith.constant 0 : index
    %224 = vector.load %arg7[%c0_94, %c0_95] : memref<64x256xf32, #tpu.memory_space<vmem>>, vector<64x256xf32>
    %cst_96 = arith.constant dense<0.000000e+00> : vector<16x256xf32>
    %225 = tpu.matmul %212, %224, %cst_96 {dimension_numbers = #tpu.dot_dimension_numbers<[1], [0], [0], [1], [0, 0, 1, 1], [], []>} : vector<16x64xf32>, vector<64x256xf32>, vector<16x256xf32> -> vector<16x256xf32>
    %226 = arith.addf %223, %225 : vector<16x256xf32>
    %227 = vector.extract_strided_slice %226 {offsets = [0, 0], sizes = [16, 64], strides = [1, 1]} : vector<16x256xf32> to vector<16x64xf32>
    %cst_97 = arith.constant 0.000000e+00 : f32
    %228 = vector.broadcast %cst_97 : f32 to vector<16x64xf32>
    %229 = arith.subf %228, %227 : vector<16x64xf32>
    %230 = math.exp %229 : vector<16x64xf32>
    %cst_98 = arith.constant 1.000000e+00 : f32
    %231 = vector.broadcast %cst_98 : f32 to vector<16x64xf32>
    %232 = arith.addf %231, %230 : vector<16x64xf32>
    %cst_99 = arith.constant 1.000000e+00 : f32
    %233 = vector.broadcast %cst_99 : f32 to vector<16x64xf32>
    %234 = arith.divf %233, %232 : vector<16x64xf32>
    %235 = vector.extract_strided_slice %226 {offsets = [0, 64], sizes = [16, 64], strides = [1, 1]} : vector<16x256xf32> to vector<16x64xf32>
    %cst_100 = arith.constant 0.000000e+00 : f32
    %236 = vector.broadcast %cst_100 : f32 to vector<16x64xf32>
    %237 = arith.subf %236, %235 : vector<16x64xf32>
    %238 = math.exp %237 : vector<16x64xf32>
    %cst_101 = arith.constant 1.000000e+00 : f32
    %239 = vector.broadcast %cst_101 : f32 to vector<16x64xf32>
    %240 = arith.addf %239, %238 : vector<16x64xf32>
    %cst_102 = arith.constant 1.000000e+00 : f32
    %241 = vector.broadcast %cst_102 : f32 to vector<16x64xf32>
    %242 = arith.divf %241, %240 : vector<16x64xf32>
    %243 = vector.extract_strided_slice %226 {offsets = [0, 128], sizes = [16, 64], strides = [1, 1]} : vector<16x256xf32> to vector<16x64xf32>
    %244 = math.tanh %243 : vector<16x64xf32>
    %245 = vector.extract_strided_slice %226 {offsets = [0, 192], sizes = [16, 64], strides = [1, 1]} : vector<16x256xf32> to vector<16x64xf32>
    %cst_103 = arith.constant 0.000000e+00 : f32
    %246 = vector.broadcast %cst_103 : f32 to vector<16x64xf32>
    %247 = arith.subf %246, %245 : vector<16x64xf32>
    %248 = math.exp %247 : vector<16x64xf32>
    %cst_104 = arith.constant 1.000000e+00 : f32
    %249 = vector.broadcast %cst_104 : f32 to vector<16x64xf32>
    %250 = arith.addf %249, %248 : vector<16x64xf32>
    %cst_105 = arith.constant 1.000000e+00 : f32
    %251 = vector.broadcast %cst_105 : f32 to vector<16x64xf32>
    %252 = arith.divf %251, %250 : vector<16x64xf32>
    %253 = arith.mulf %242, %215 : vector<16x64xf32>
    %254 = arith.mulf %234, %244 : vector<16x64xf32>
    %255 = arith.addf %253, %254 : vector<16x64xf32>
    %256 = math.tanh %255 : vector<16x64xf32>
    %257 = arith.mulf %252, %256 : vector<16x64xf32>
    %c4_i32 = arith.constant 4 : i32
    %258 = vector.broadcast %c4_i32 : i32 to vector<16x1xi32>
    %259 = arith.cmpi sgt, %21, %258 : vector<16x1xi32>
    %260 = vector.shape_cast %259 : vector<16x1xi1> to vector<16x1xi1>
    %261 = vector.broadcast %260 : vector<16x1xi1> to vector<16x64xi1>
    %262 = arith.select %261, %257, %212 : vector<16x64xi1>, vector<16x64xf32>
    %263 = vector.shape_cast %259 : vector<16x1xi1> to vector<16x1xi1>
    %264 = vector.broadcast %263 : vector<16x1xi1> to vector<16x64xi1>
    %265 = arith.select %264, %255, %215 : vector<16x64xi1>, vector<16x64xf32>
    %cst_106 = arith.constant 0.000000e+00 : f32
    %266 = vector.shape_cast %259 : vector<16x1xi1> to vector<16x1xi1>
    %267 = vector.broadcast %266 : vector<16x1xi1> to vector<16x64xi1>
    %268 = vector.broadcast %cst_106 : f32 to vector<16x64xf32>
    %269 = arith.select %267, %257, %268 : vector<16x64xi1>, vector<16x64xf32>
    %270 = vector.shape_cast %269 : vector<16x64xf32> to vector<1x16x64xf32>
    %c4_107 = arith.constant 4 : index
    %c0_108 = arith.constant 0 : index
    %c0_109 = arith.constant 0 : index
    %271 = vector.load %arg15[%c4_107, %c0_108, %c0_109] : memref<16x16x64xf32, #tpu.memory_space<vmem>>, vector<1x16x64xf32>
    tpu.vector_store %arg15[%c4_107, %c0_108, %c0_109], %270 {strides = array<i32>} : memref<16x16x64xf32, #tpu.memory_space<vmem>>, vector<1x16x64xf32>,
    %c5 = arith.constant 5 : index
    %c0_110 = arith.constant 0 : index
    %c0_111 = arith.constant 0 : index
    %272 = vector.load %arg14[%c5, %c0_110, %c0_111] : memref<16x16x256xf32, #tpu.memory_space<vmem>>, vector<1x16x256xf32>
    %273 = vector.shape_cast %272 : vector<1x16x256xf32> to vector<16x256xf32>
    %c0_112 = arith.constant 0 : index
    %c0_113 = arith.constant 0 : index
    %274 = vector.load %arg7[%c0_112, %c0_113] : memref<64x256xf32, #tpu.memory_space<vmem>>, vector<64x256xf32>
    %cst_114 = arith.constant dense<0.000000e+00> : vector<16x256xf32>
    %275 = tpu.matmul %262, %274, %cst_114 {dimension_numbers = #tpu.dot_dimension_numbers<[1], [0], [0], [1], [0, 0, 1, 1], [], []>} : vector<16x64xf32>, vector<64x256xf32>, vector<16x256xf32> -> vector<16x256xf32>
    %276 = arith.addf %273, %275 : vector<16x256xf32>
    %277 = vector.extract_strided_slice %276 {offsets = [0, 0], sizes = [16, 64], strides = [1, 1]} : vector<16x256xf32> to vector<16x64xf32>
    %cst_115 = arith.constant 0.000000e+00 : f32
    %278 = vector.broadcast %cst_115 : f32 to vector<16x64xf32>
    %279 = arith.subf %278, %277 : vector<16x64xf32>
    %280 = math.exp %279 : vector<16x64xf32>
    %cst_116 = arith.constant 1.000000e+00 : f32
    %281 = vector.broadcast %cst_116 : f32 to vector<16x64xf32>
    %282 = arith.addf %281, %280 : vector<16x64xf32>
    %cst_117 = arith.constant 1.000000e+00 : f32
    %283 = vector.broadcast %cst_117 : f32 to vector<16x64xf32>
    %284 = arith.divf %283, %282 : vector<16x64xf32>
    %285 = vector.extract_strided_slice %276 {offsets = [0, 64], sizes = [16, 64], strides = [1, 1]} : vector<16x256xf32> to vector<16x64xf32>
    %cst_118 = arith.constant 0.000000e+00 : f32
    %286 = vector.broadcast %cst_118 : f32 to vector<16x64xf32>
    %287 = arith.subf %286, %285 : vector<16x64xf32>
    %288 = math.exp %287 : vector<16x64xf32>
    %cst_119 = arith.constant 1.000000e+00 : f32
    %289 = vector.broadcast %cst_119 : f32 to vector<16x64xf32>
    %290 = arith.addf %289, %288 : vector<16x64xf32>
    %cst_120 = arith.constant 1.000000e+00 : f32
    %291 = vector.broadcast %cst_120 : f32 to vector<16x64xf32>
    %292 = arith.divf %291, %290 : vector<16x64xf32>
    %293 = vector.extract_strided_slice %276 {offsets = [0, 128], sizes = [16, 64], strides = [1, 1]} : vector<16x256xf32> to vector<16x64xf32>
    %294 = math.tanh %293 : vector<16x64xf32>
    %295 = vector.extract_strided_slice %276 {offsets = [0, 192], sizes = [16, 64], strides = [1, 1]} : vector<16x256xf32> to vector<16x64xf32>
    %cst_121 = arith.constant 0.000000e+00 : f32
    %296 = vector.broadcast %cst_121 : f32 to vector<16x64xf32>
    %297 = arith.subf %296, %295 : vector<16x64xf32>
    %298 = math.exp %297 : vector<16x64xf32>
    %cst_122 = arith.constant 1.000000e+00 : f32
    %299 = vector.broadcast %cst_122 : f32 to vector<16x64xf32>
    %300 = arith.addf %299, %298 : vector<16x64xf32>
    %cst_123 = arith.constant 1.000000e+00 : f32
    %301 = vector.broadcast %cst_123 : f32 to vector<16x64xf32>
    %302 = arith.divf %301, %300 : vector<16x64xf32>
    %303 = arith.mulf %292, %265 : vector<16x64xf32>
    %304 = arith.mulf %284, %294 : vector<16x64xf32>
    %305 = arith.addf %303, %304 : vector<16x64xf32>
    %306 = math.tanh %305 : vector<16x64xf32>
    %307 = arith.mulf %302, %306 : vector<16x64xf32>
    %c5_i32 = arith.constant 5 : i32
    %308 = vector.broadcast %c5_i32 : i32 to vector<16x1xi32>
    %309 = arith.cmpi sgt, %21, %308 : vector<16x1xi32>
    %310 = vector.shape_cast %309 : vector<16x1xi1> to vector<16x1xi1>
    %311 = vector.broadcast %310 : vector<16x1xi1> to vector<16x64xi1>
    %312 = arith.select %311, %307, %262 : vector<16x64xi1>, vector<16x64xf32>
    %313 = vector.shape_cast %309 : vector<16x1xi1> to vector<16x1xi1>
    %314 = vector.broadcast %313 : vector<16x1xi1> to vector<16x64xi1>
    %315 = arith.select %314, %305, %265 : vector<16x64xi1>, vector<16x64xf32>
    %cst_124 = arith.constant 0.000000e+00 : f32
    %316 = vector.shape_cast %309 : vector<16x1xi1> to vector<16x1xi1>
    %317 = vector.broadcast %316 : vector<16x1xi1> to vector<16x64xi1>
    %318 = vector.broadcast %cst_124 : f32 to vector<16x64xf32>
    %319 = arith.select %317, %307, %318 : vector<16x64xi1>, vector<16x64xf32>
    %320 = vector.shape_cast %319 : vector<16x64xf32> to vector<1x16x64xf32>
    %c5_125 = arith.constant 5 : index
    %c0_126 = arith.constant 0 : index
    %c0_127 = arith.constant 0 : index
    %321 = vector.load %arg15[%c5_125, %c0_126, %c0_127] : memref<16x16x64xf32, #tpu.memory_space<vmem>>, vector<1x16x64xf32>
    tpu.vector_store %arg15[%c5_125, %c0_126, %c0_127], %320 {strides = array<i32>} : memref<16x16x64xf32, #tpu.memory_space<vmem>>, vector<1x16x64xf32>,
    %c6 = arith.constant 6 : index
    %c0_128 = arith.constant 0 : index
    %c0_129 = arith.constant 0 : index
    %322 = vector.load %arg14[%c6, %c0_128, %c0_129] : memref<16x16x256xf32, #tpu.memory_space<vmem>>, vector<1x16x256xf32>
    %323 = vector.shape_cast %322 : vector<1x16x256xf32> to vector<16x256xf32>
    %c0_130 = arith.constant 0 : index
    %c0_131 = arith.constant 0 : index
    %324 = vector.load %arg7[%c0_130, %c0_131] : memref<64x256xf32, #tpu.memory_space<vmem>>, vector<64x256xf32>
    %cst_132 = arith.constant dense<0.000000e+00> : vector<16x256xf32>
    %325 = tpu.matmul %312, %324, %cst_132 {dimension_numbers = #tpu.dot_dimension_numbers<[1], [0], [0], [1], [0, 0, 1, 1], [], []>} : vector<16x64xf32>, vector<64x256xf32>, vector<16x256xf32> -> vector<16x256xf32>
    %326 = arith.addf %323, %325 : vector<16x256xf32>
    %327 = vector.extract_strided_slice %326 {offsets = [0, 0], sizes = [16, 64], strides = [1, 1]} : vector<16x256xf32> to vector<16x64xf32>
    %cst_133 = arith.constant 0.000000e+00 : f32
    %328 = vector.broadcast %cst_133 : f32 to vector<16x64xf32>
    %329 = arith.subf %328, %327 : vector<16x64xf32>
    %330 = math.exp %329 : vector<16x64xf32>
    %cst_134 = arith.constant 1.000000e+00 : f32
    %331 = vector.broadcast %cst_134 : f32 to vector<16x64xf32>
    %332 = arith.addf %331, %330 : vector<16x64xf32>
    %cst_135 = arith.constant 1.000000e+00 : f32
    %333 = vector.broadcast %cst_135 : f32 to vector<16x64xf32>
    %334 = arith.divf %333, %332 : vector<16x64xf32>
    %335 = vector.extract_strided_slice %326 {offsets = [0, 64], sizes = [16, 64], strides = [1, 1]} : vector<16x256xf32> to vector<16x64xf32>
    %cst_136 = arith.constant 0.000000e+00 : f32
    %336 = vector.broadcast %cst_136 : f32 to vector<16x64xf32>
    %337 = arith.subf %336, %335 : vector<16x64xf32>
    %338 = math.exp %337 : vector<16x64xf32>
    %cst_137 = arith.constant 1.000000e+00 : f32
    %339 = vector.broadcast %cst_137 : f32 to vector<16x64xf32>
    %340 = arith.addf %339, %338 : vector<16x64xf32>
    %cst_138 = arith.constant 1.000000e+00 : f32
    %341 = vector.broadcast %cst_138 : f32 to vector<16x64xf32>
    %342 = arith.divf %341, %340 : vector<16x64xf32>
    %343 = vector.extract_strided_slice %326 {offsets = [0, 128], sizes = [16, 64], strides = [1, 1]} : vector<16x256xf32> to vector<16x64xf32>
    %344 = math.tanh %343 : vector<16x64xf32>
    %345 = vector.extract_strided_slice %326 {offsets = [0, 192], sizes = [16, 64], strides = [1, 1]} : vector<16x256xf32> to vector<16x64xf32>
    %cst_139 = arith.constant 0.000000e+00 : f32
    %346 = vector.broadcast %cst_139 : f32 to vector<16x64xf32>
    %347 = arith.subf %346, %345 : vector<16x64xf32>
    %348 = math.exp %347 : vector<16x64xf32>
    %cst_140 = arith.constant 1.000000e+00 : f32
    %349 = vector.broadcast %cst_140 : f32 to vector<16x64xf32>
    %350 = arith.addf %349, %348 : vector<16x64xf32>
    %cst_141 = arith.constant 1.000000e+00 : f32
    %351 = vector.broadcast %cst_141 : f32 to vector<16x64xf32>
    %352 = arith.divf %351, %350 : vector<16x64xf32>
    %353 = arith.mulf %342, %315 : vector<16x64xf32>
    %354 = arith.mulf %334, %344 : vector<16x64xf32>
    %355 = arith.addf %353, %354 : vector<16x64xf32>
    %356 = math.tanh %355 : vector<16x64xf32>
    %357 = arith.mulf %352, %356 : vector<16x64xf32>
    %c6_i32 = arith.constant 6 : i32
    %358 = vector.broadcast %c6_i32 : i32 to vector<16x1xi32>
    %359 = arith.cmpi sgt, %21, %358 : vector<16x1xi32>
    %360 = vector.shape_cast %359 : vector<16x1xi1> to vector<16x1xi1>
    %361 = vector.broadcast %360 : vector<16x1xi1> to vector<16x64xi1>
    %362 = arith.select %361, %357, %312 : vector<16x64xi1>, vector<16x64xf32>
    %363 = vector.shape_cast %359 : vector<16x1xi1> to vector<16x1xi1>
    %364 = vector.broadcast %363 : vector<16x1xi1> to vector<16x64xi1>
    %365 = arith.select %364, %355, %315 : vector<16x64xi1>, vector<16x64xf32>
    %cst_142 = arith.constant 0.000000e+00 : f32
    %366 = vector.shape_cast %359 : vector<16x1xi1> to vector<16x1xi1>
    %367 = vector.broadcast %366 : vector<16x1xi1> to vector<16x64xi1>
    %368 = vector.broadcast %cst_142 : f32 to vector<16x64xf32>
    %369 = arith.select %367, %357, %368 : vector<16x64xi1>, vector<16x64xf32>
    %370 = vector.shape_cast %369 : vector<16x64xf32> to vector<1x16x64xf32>
    %c6_143 = arith.constant 6 : index
    %c0_144 = arith.constant 0 : index
    %c0_145 = arith.constant 0 : index
    %371 = vector.load %arg15[%c6_143, %c0_144, %c0_145] : memref<16x16x64xf32, #tpu.memory_space<vmem>>, vector<1x16x64xf32>
    tpu.vector_store %arg15[%c6_143, %c0_144, %c0_145], %370 {strides = array<i32>} : memref<16x16x64xf32, #tpu.memory_space<vmem>>, vector<1x16x64xf32>,
    %c7 = arith.constant 7 : index
    %c0_146 = arith.constant 0 : index
    %c0_147 = arith.constant 0 : index
    %372 = vector.load %arg14[%c7, %c0_146, %c0_147] : memref<16x16x256xf32, #tpu.memory_space<vmem>>, vector<1x16x256xf32>
    %373 = vector.shape_cast %372 : vector<1x16x256xf32> to vector<16x256xf32>
    %c0_148 = arith.constant 0 : index
    %c0_149 = arith.constant 0 : index
    %374 = vector.load %arg7[%c0_148, %c0_149] : memref<64x256xf32, #tpu.memory_space<vmem>>, vector<64x256xf32>
    %cst_150 = arith.constant dense<0.000000e+00> : vector<16x256xf32>
    %375 = tpu.matmul %362, %374, %cst_150 {dimension_numbers = #tpu.dot_dimension_numbers<[1], [0], [0], [1], [0, 0, 1, 1], [], []>} : vector<16x64xf32>, vector<64x256xf32>, vector<16x256xf32> -> vector<16x256xf32>
    %376 = arith.addf %373, %375 : vector<16x256xf32>
    %377 = vector.extract_strided_slice %376 {offsets = [0, 0], sizes = [16, 64], strides = [1, 1]} : vector<16x256xf32> to vector<16x64xf32>
    %cst_151 = arith.constant 0.000000e+00 : f32
    %378 = vector.broadcast %cst_151 : f32 to vector<16x64xf32>
    %379 = arith.subf %378, %377 : vector<16x64xf32>
    %380 = math.exp %379 : vector<16x64xf32>
    %cst_152 = arith.constant 1.000000e+00 : f32
    %381 = vector.broadcast %cst_152 : f32 to vector<16x64xf32>
    %382 = arith.addf %381, %380 : vector<16x64xf32>
    %cst_153 = arith.constant 1.000000e+00 : f32
    %383 = vector.broadcast %cst_153 : f32 to vector<16x64xf32>
    %384 = arith.divf %383, %382 : vector<16x64xf32>
    %385 = vector.extract_strided_slice %376 {offsets = [0, 64], sizes = [16, 64], strides = [1, 1]} : vector<16x256xf32> to vector<16x64xf32>
    %cst_154 = arith.constant 0.000000e+00 : f32
    %386 = vector.broadcast %cst_154 : f32 to vector<16x64xf32>
    %387 = arith.subf %386, %385 : vector<16x64xf32>
    %388 = math.exp %387 : vector<16x64xf32>
    %cst_155 = arith.constant 1.000000e+00 : f32
    %389 = vector.broadcast %cst_155 : f32 to vector<16x64xf32>
    %390 = arith.addf %389, %388 : vector<16x64xf32>
    %cst_156 = arith.constant 1.000000e+00 : f32
    %391 = vector.broadcast %cst_156 : f32 to vector<16x64xf32>
    %392 = arith.divf %391, %390 : vector<16x64xf32>
    %393 = vector.extract_strided_slice %376 {offsets = [0, 128], sizes = [16, 64], strides = [1, 1]} : vector<16x256xf32> to vector<16x64xf32>
    %394 = math.tanh %393 : vector<16x64xf32>
    %395 = vector.extract_strided_slice %376 {offsets = [0, 192], sizes = [16, 64], strides = [1, 1]} : vector<16x256xf32> to vector<16x64xf32>
    %cst_157 = arith.constant 0.000000e+00 : f32
    %396 = vector.broadcast %cst_157 : f32 to vector<16x64xf32>
    %397 = arith.subf %396, %395 : vector<16x64xf32>
    %398 = math.exp %397 : vector<16x64xf32>
    %cst_158 = arith.constant 1.000000e+00 : f32
    %399 = vector.broadcast %cst_158 : f32 to vector<16x64xf32>
    %400 = arith.addf %399, %398 : vector<16x64xf32>
    %cst_159 = arith.constant 1.000000e+00 : f32
    %401 = vector.broadcast %cst_159 : f32 to vector<16x64xf32>
    %402 = arith.divf %401, %400 : vector<16x64xf32>
    %403 = arith.mulf %392, %365 : vector<16x64xf32>
    %404 = arith.mulf %384, %394 : vector<16x64xf32>
    %405 = arith.addf %403, %404 : vector<16x64xf32>
    %406 = math.tanh %405 : vector<16x64xf32>
    %407 = arith.mulf %402, %406 : vector<16x64xf32>
    %c7_i32 = arith.constant 7 : i32
    %408 = vector.broadcast %c7_i32 : i32 to vector<16x1xi32>
    %409 = arith.cmpi sgt, %21, %408 : vector<16x1xi32>
    %410 = vector.shape_cast %409 : vector<16x1xi1> to vector<16x1xi1>
    %411 = vector.broadcast %410 : vector<16x1xi1> to vector<16x64xi1>
    %412 = arith.select %411, %407, %362 : vector<16x64xi1>, vector<16x64xf32>
    %413 = vector.shape_cast %409 : vector<16x1xi1> to vector<16x1xi1>
    %414 = vector.broadcast %413 : vector<16x1xi1> to vector<16x64xi1>
    %415 = arith.select %414, %405, %365 : vector<16x64xi1>, vector<16x64xf32>
    %cst_160 = arith.constant 0.000000e+00 : f32
    %416 = vector.shape_cast %409 : vector<16x1xi1> to vector<16x1xi1>
    %417 = vector.broadcast %416 : vector<16x1xi1> to vector<16x64xi1>
    %418 = vector.broadcast %cst_160 : f32 to vector<16x64xf32>
    %419 = arith.select %417, %407, %418 : vector<16x64xi1>, vector<16x64xf32>
    %420 = vector.shape_cast %419 : vector<16x64xf32> to vector<1x16x64xf32>
    %c7_161 = arith.constant 7 : index
    %c0_162 = arith.constant 0 : index
    %c0_163 = arith.constant 0 : index
    %421 = vector.load %arg15[%c7_161, %c0_162, %c0_163] : memref<16x16x64xf32, #tpu.memory_space<vmem>>, vector<1x16x64xf32>
    tpu.vector_store %arg15[%c7_161, %c0_162, %c0_163], %420 {strides = array<i32>} : memref<16x16x64xf32, #tpu.memory_space<vmem>>, vector<1x16x64xf32>,
    %c8 = arith.constant 8 : index
    %c0_164 = arith.constant 0 : index
    %c0_165 = arith.constant 0 : index
    %422 = vector.load %arg14[%c8, %c0_164, %c0_165] : memref<16x16x256xf32, #tpu.memory_space<vmem>>, vector<1x16x256xf32>
    %423 = vector.shape_cast %422 : vector<1x16x256xf32> to vector<16x256xf32>
    %c0_166 = arith.constant 0 : index
    %c0_167 = arith.constant 0 : index
    %424 = vector.load %arg7[%c0_166, %c0_167] : memref<64x256xf32, #tpu.memory_space<vmem>>, vector<64x256xf32>
    %cst_168 = arith.constant dense<0.000000e+00> : vector<16x256xf32>
    %425 = tpu.matmul %412, %424, %cst_168 {dimension_numbers = #tpu.dot_dimension_numbers<[1], [0], [0], [1], [0, 0, 1, 1], [], []>} : vector<16x64xf32>, vector<64x256xf32>, vector<16x256xf32> -> vector<16x256xf32>
    %426 = arith.addf %423, %425 : vector<16x256xf32>
    %427 = vector.extract_strided_slice %426 {offsets = [0, 0], sizes = [16, 64], strides = [1, 1]} : vector<16x256xf32> to vector<16x64xf32>
    %cst_169 = arith.constant 0.000000e+00 : f32
    %428 = vector.broadcast %cst_169 : f32 to vector<16x64xf32>
    %429 = arith.subf %428, %427 : vector<16x64xf32>
    %430 = math.exp %429 : vector<16x64xf32>
    %cst_170 = arith.constant 1.000000e+00 : f32
    %431 = vector.broadcast %cst_170 : f32 to vector<16x64xf32>
    %432 = arith.addf %431, %430 : vector<16x64xf32>
    %cst_171 = arith.constant 1.000000e+00 : f32
    %433 = vector.broadcast %cst_171 : f32 to vector<16x64xf32>
    %434 = arith.divf %433, %432 : vector<16x64xf32>
    %435 = vector.extract_strided_slice %426 {offsets = [0, 64], sizes = [16, 64], strides = [1, 1]} : vector<16x256xf32> to vector<16x64xf32>
    %cst_172 = arith.constant 0.000000e+00 : f32
    %436 = vector.broadcast %cst_172 : f32 to vector<16x64xf32>
    %437 = arith.subf %436, %435 : vector<16x64xf32>
    %438 = math.exp %437 : vector<16x64xf32>
    %cst_173 = arith.constant 1.000000e+00 : f32
    %439 = vector.broadcast %cst_173 : f32 to vector<16x64xf32>
    %440 = arith.addf %439, %438 : vector<16x64xf32>
    %cst_174 = arith.constant 1.000000e+00 : f32
    %441 = vector.broadcast %cst_174 : f32 to vector<16x64xf32>
    %442 = arith.divf %441, %440 : vector<16x64xf32>
    %443 = vector.extract_strided_slice %426 {offsets = [0, 128], sizes = [16, 64], strides = [1, 1]} : vector<16x256xf32> to vector<16x64xf32>
    %444 = math.tanh %443 : vector<16x64xf32>
    %445 = vector.extract_strided_slice %426 {offsets = [0, 192], sizes = [16, 64], strides = [1, 1]} : vector<16x256xf32> to vector<16x64xf32>
    %cst_175 = arith.constant 0.000000e+00 : f32
    %446 = vector.broadcast %cst_175 : f32 to vector<16x64xf32>
    %447 = arith.subf %446, %445 : vector<16x64xf32>
    %448 = math.exp %447 : vector<16x64xf32>
    %cst_176 = arith.constant 1.000000e+00 : f32
    %449 = vector.broadcast %cst_176 : f32 to vector<16x64xf32>
    %450 = arith.addf %449, %448 : vector<16x64xf32>
    %cst_177 = arith.constant 1.000000e+00 : f32
    %451 = vector.broadcast %cst_177 : f32 to vector<16x64xf32>
    %452 = arith.divf %451, %450 : vector<16x64xf32>
    %453 = arith.mulf %442, %415 : vector<16x64xf32>
    %454 = arith.mulf %434, %444 : vector<16x64xf32>
    %455 = arith.addf %453, %454 : vector<16x64xf32>
    %456 = math.tanh %455 : vector<16x64xf32>
    %457 = arith.mulf %452, %456 : vector<16x64xf32>
    %c8_i32 = arith.constant 8 : i32
    %458 = vector.broadcast %c8_i32 : i32 to vector<16x1xi32>
    %459 = arith.cmpi sgt, %21, %458 : vector<16x1xi32>
    %460 = vector.shape_cast %459 : vector<16x1xi1> to vector<16x1xi1>
    %461 = vector.broadcast %460 : vector<16x1xi1> to vector<16x64xi1>
    %462 = arith.select %461, %457, %412 : vector<16x64xi1>, vector<16x64xf32>
    %463 = vector.shape_cast %459 : vector<16x1xi1> to vector<16x1xi1>
    %464 = vector.broadcast %463 : vector<16x1xi1> to vector<16x64xi1>
    %465 = arith.select %464, %455, %415 : vector<16x64xi1>, vector<16x64xf32>
    %cst_178 = arith.constant 0.000000e+00 : f32
    %466 = vector.shape_cast %459 : vector<16x1xi1> to vector<16x1xi1>
    %467 = vector.broadcast %466 : vector<16x1xi1> to vector<16x64xi1>
    %468 = vector.broadcast %cst_178 : f32 to vector<16x64xf32>
    %469 = arith.select %467, %457, %468 : vector<16x64xi1>, vector<16x64xf32>
    %470 = vector.shape_cast %469 : vector<16x64xf32> to vector<1x16x64xf32>
    %c8_179 = arith.constant 8 : index
    %c0_180 = arith.constant 0 : index
    %c0_181 = arith.constant 0 : index
    %471 = vector.load %arg15[%c8_179, %c0_180, %c0_181] : memref<16x16x64xf32, #tpu.memory_space<vmem>>, vector<1x16x64xf32>
    tpu.vector_store %arg15[%c8_179, %c0_180, %c0_181], %470 {strides = array<i32>} : memref<16x16x64xf32, #tpu.memory_space<vmem>>, vector<1x16x64xf32>,
    %c9 = arith.constant 9 : index
    %c0_182 = arith.constant 0 : index
    %c0_183 = arith.constant 0 : index
    %472 = vector.load %arg14[%c9, %c0_182, %c0_183] : memref<16x16x256xf32, #tpu.memory_space<vmem>>, vector<1x16x256xf32>
    %473 = vector.shape_cast %472 : vector<1x16x256xf32> to vector<16x256xf32>
    %c0_184 = arith.constant 0 : index
    %c0_185 = arith.constant 0 : index
    %474 = vector.load %arg7[%c0_184, %c0_185] : memref<64x256xf32, #tpu.memory_space<vmem>>, vector<64x256xf32>
    %cst_186 = arith.constant dense<0.000000e+00> : vector<16x256xf32>
    %475 = tpu.matmul %462, %474, %cst_186 {dimension_numbers = #tpu.dot_dimension_numbers<[1], [0], [0], [1], [0, 0, 1, 1], [], []>} : vector<16x64xf32>, vector<64x256xf32>, vector<16x256xf32> -> vector<16x256xf32>
    %476 = arith.addf %473, %475 : vector<16x256xf32>
    %477 = vector.extract_strided_slice %476 {offsets = [0, 0], sizes = [16, 64], strides = [1, 1]} : vector<16x256xf32> to vector<16x64xf32>
    %cst_187 = arith.constant 0.000000e+00 : f32
    %478 = vector.broadcast %cst_187 : f32 to vector<16x64xf32>
    %479 = arith.subf %478, %477 : vector<16x64xf32>
    %480 = math.exp %479 : vector<16x64xf32>
    %cst_188 = arith.constant 1.000000e+00 : f32
    %481 = vector.broadcast %cst_188 : f32 to vector<16x64xf32>
    %482 = arith.addf %481, %480 : vector<16x64xf32>
    %cst_189 = arith.constant 1.000000e+00 : f32
    %483 = vector.broadcast %cst_189 : f32 to vector<16x64xf32>
    %484 = arith.divf %483, %482 : vector<16x64xf32>
    %485 = vector.extract_strided_slice %476 {offsets = [0, 64], sizes = [16, 64], strides = [1, 1]} : vector<16x256xf32> to vector<16x64xf32>
    %cst_190 = arith.constant 0.000000e+00 : f32
    %486 = vector.broadcast %cst_190 : f32 to vector<16x64xf32>
    %487 = arith.subf %486, %485 : vector<16x64xf32>
    %488 = math.exp %487 : vector<16x64xf32>
    %cst_191 = arith.constant 1.000000e+00 : f32
    %489 = vector.broadcast %cst_191 : f32 to vector<16x64xf32>
    %490 = arith.addf %489, %488 : vector<16x64xf32>
    %cst_192 = arith.constant 1.000000e+00 : f32
    %491 = vector.broadcast %cst_192 : f32 to vector<16x64xf32>
    %492 = arith.divf %491, %490 : vector<16x64xf32>
    %493 = vector.extract_strided_slice %476 {offsets = [0, 128], sizes = [16, 64], strides = [1, 1]} : vector<16x256xf32> to vector<16x64xf32>
    %494 = math.tanh %493 : vector<16x64xf32>
    %495 = vector.extract_strided_slice %476 {offsets = [0, 192], sizes = [16, 64], strides = [1, 1]} : vector<16x256xf32> to vector<16x64xf32>
    %cst_193 = arith.constant 0.000000e+00 : f32
    %496 = vector.broadcast %cst_193 : f32 to vector<16x64xf32>
    %497 = arith.subf %496, %495 : vector<16x64xf32>
    %498 = math.exp %497 : vector<16x64xf32>
    %cst_194 = arith.constant 1.000000e+00 : f32
    %499 = vector.broadcast %cst_194 : f32 to vector<16x64xf32>
    %500 = arith.addf %499, %498 : vector<16x64xf32>
    %cst_195 = arith.constant 1.000000e+00 : f32
    %501 = vector.broadcast %cst_195 : f32 to vector<16x64xf32>
    %502 = arith.divf %501, %500 : vector<16x64xf32>
    %503 = arith.mulf %492, %465 : vector<16x64xf32>
    %504 = arith.mulf %484, %494 : vector<16x64xf32>
    %505 = arith.addf %503, %504 : vector<16x64xf32>
    %506 = math.tanh %505 : vector<16x64xf32>
    %507 = arith.mulf %502, %506 : vector<16x64xf32>
    %c9_i32 = arith.constant 9 : i32
    %508 = vector.broadcast %c9_i32 : i32 to vector<16x1xi32>
    %509 = arith.cmpi sgt, %21, %508 : vector<16x1xi32>
    %510 = vector.shape_cast %509 : vector<16x1xi1> to vector<16x1xi1>
    %511 = vector.broadcast %510 : vector<16x1xi1> to vector<16x64xi1>
    %512 = arith.select %511, %507, %462 : vector<16x64xi1>, vector<16x64xf32>
    %513 = vector.shape_cast %509 : vector<16x1xi1> to vector<16x1xi1>
    %514 = vector.broadcast %513 : vector<16x1xi1> to vector<16x64xi1>
    %515 = arith.select %514, %505, %465 : vector<16x64xi1>, vector<16x64xf32>
    %cst_196 = arith.constant 0.000000e+00 : f32
    %516 = vector.shape_cast %509 : vector<16x1xi1> to vector<16x1xi1>
    %517 = vector.broadcast %516 : vector<16x1xi1> to vector<16x64xi1>
    %518 = vector.broadcast %cst_196 : f32 to vector<16x64xf32>
    %519 = arith.select %517, %507, %518 : vector<16x64xi1>, vector<16x64xf32>
    %520 = vector.shape_cast %519 : vector<16x64xf32> to vector<1x16x64xf32>
    %c9_197 = arith.constant 9 : index
    %c0_198 = arith.constant 0 : index
    %c0_199 = arith.constant 0 : index
    %521 = vector.load %arg15[%c9_197, %c0_198, %c0_199] : memref<16x16x64xf32, #tpu.memory_space<vmem>>, vector<1x16x64xf32>
    tpu.vector_store %arg15[%c9_197, %c0_198, %c0_199], %520 {strides = array<i32>} : memref<16x16x64xf32, #tpu.memory_space<vmem>>, vector<1x16x64xf32>,
    %c10 = arith.constant 10 : index
    %c0_200 = arith.constant 0 : index
    %c0_201 = arith.constant 0 : index
    %522 = vector.load %arg14[%c10, %c0_200, %c0_201] : memref<16x16x256xf32, #tpu.memory_space<vmem>>, vector<1x16x256xf32>
    %523 = vector.shape_cast %522 : vector<1x16x256xf32> to vector<16x256xf32>
    %c0_202 = arith.constant 0 : index
    %c0_203 = arith.constant 0 : index
    %524 = vector.load %arg7[%c0_202, %c0_203] : memref<64x256xf32, #tpu.memory_space<vmem>>, vector<64x256xf32>
    %cst_204 = arith.constant dense<0.000000e+00> : vector<16x256xf32>
    %525 = tpu.matmul %512, %524, %cst_204 {dimension_numbers = #tpu.dot_dimension_numbers<[1], [0], [0], [1], [0, 0, 1, 1], [], []>} : vector<16x64xf32>, vector<64x256xf32>, vector<16x256xf32> -> vector<16x256xf32>
    %526 = arith.addf %523, %525 : vector<16x256xf32>
    %527 = vector.extract_strided_slice %526 {offsets = [0, 0], sizes = [16, 64], strides = [1, 1]} : vector<16x256xf32> to vector<16x64xf32>
    %cst_205 = arith.constant 0.000000e+00 : f32
    %528 = vector.broadcast %cst_205 : f32 to vector<16x64xf32>
    %529 = arith.subf %528, %527 : vector<16x64xf32>
    %530 = math.exp %529 : vector<16x64xf32>
    %cst_206 = arith.constant 1.000000e+00 : f32
    %531 = vector.broadcast %cst_206 : f32 to vector<16x64xf32>
    %532 = arith.addf %531, %530 : vector<16x64xf32>
    %cst_207 = arith.constant 1.000000e+00 : f32
    %533 = vector.broadcast %cst_207 : f32 to vector<16x64xf32>
    %534 = arith.divf %533, %532 : vector<16x64xf32>
    %535 = vector.extract_strided_slice %526 {offsets = [0, 64], sizes = [16, 64], strides = [1, 1]} : vector<16x256xf32> to vector<16x64xf32>
    %cst_208 = arith.constant 0.000000e+00 : f32
    %536 = vector.broadcast %cst_208 : f32 to vector<16x64xf32>
    %537 = arith.subf %536, %535 : vector<16x64xf32>
    %538 = math.exp %537 : vector<16x64xf32>
    %cst_209 = arith.constant 1.000000e+00 : f32
    %539 = vector.broadcast %cst_209 : f32 to vector<16x64xf32>
    %540 = arith.addf %539, %538 : vector<16x64xf32>
    %cst_210 = arith.constant 1.000000e+00 : f32
    %541 = vector.broadcast %cst_210 : f32 to vector<16x64xf32>
    %542 = arith.divf %541, %540 : vector<16x64xf32>
    %543 = vector.extract_strided_slice %526 {offsets = [0, 128], sizes = [16, 64], strides = [1, 1]} : vector<16x256xf32> to vector<16x64xf32>
    %544 = math.tanh %543 : vector<16x64xf32>
    %545 = vector.extract_strided_slice %526 {offsets = [0, 192], sizes = [16, 64], strides = [1, 1]} : vector<16x256xf32> to vector<16x64xf32>
    %cst_211 = arith.constant 0.000000e+00 : f32
    %546 = vector.broadcast %cst_211 : f32 to vector<16x64xf32>
    %547 = arith.subf %546, %545 : vector<16x64xf32>
    %548 = math.exp %547 : vector<16x64xf32>
    %cst_212 = arith.constant 1.000000e+00 : f32
    %549 = vector.broadcast %cst_212 : f32 to vector<16x64xf32>
    %550 = arith.addf %549, %548 : vector<16x64xf32>
    %cst_213 = arith.constant 1.000000e+00 : f32
    %551 = vector.broadcast %cst_213 : f32 to vector<16x64xf32>
    %552 = arith.divf %551, %550 : vector<16x64xf32>
    %553 = arith.mulf %542, %515 : vector<16x64xf32>
    %554 = arith.mulf %534, %544 : vector<16x64xf32>
    %555 = arith.addf %553, %554 : vector<16x64xf32>
    %556 = math.tanh %555 : vector<16x64xf32>
    %557 = arith.mulf %552, %556 : vector<16x64xf32>
    %c10_i32 = arith.constant 10 : i32
    %558 = vector.broadcast %c10_i32 : i32 to vector<16x1xi32>
    %559 = arith.cmpi sgt, %21, %558 : vector<16x1xi32>
    %560 = vector.shape_cast %559 : vector<16x1xi1> to vector<16x1xi1>
    %561 = vector.broadcast %560 : vector<16x1xi1> to vector<16x64xi1>
    %562 = arith.select %561, %557, %512 : vector<16x64xi1>, vector<16x64xf32>
    %563 = vector.shape_cast %559 : vector<16x1xi1> to vector<16x1xi1>
    %564 = vector.broadcast %563 : vector<16x1xi1> to vector<16x64xi1>
    %565 = arith.select %564, %555, %515 : vector<16x64xi1>, vector<16x64xf32>
    %cst_214 = arith.constant 0.000000e+00 : f32
    %566 = vector.shape_cast %559 : vector<16x1xi1> to vector<16x1xi1>
    %567 = vector.broadcast %566 : vector<16x1xi1> to vector<16x64xi1>
    %568 = vector.broadcast %cst_214 : f32 to vector<16x64xf32>
    %569 = arith.select %567, %557, %568 : vector<16x64xi1>, vector<16x64xf32>
    %570 = vector.shape_cast %569 : vector<16x64xf32> to vector<1x16x64xf32>
    %c10_215 = arith.constant 10 : index
    %c0_216 = arith.constant 0 : index
    %c0_217 = arith.constant 0 : index
    %571 = vector.load %arg15[%c10_215, %c0_216, %c0_217] : memref<16x16x64xf32, #tpu.memory_space<vmem>>, vector<1x16x64xf32>
    tpu.vector_store %arg15[%c10_215, %c0_216, %c0_217], %570 {strides = array<i32>} : memref<16x16x64xf32, #tpu.memory_space<vmem>>, vector<1x16x64xf32>,
    %c11 = arith.constant 11 : index
    %c0_218 = arith.constant 0 : index
    %c0_219 = arith.constant 0 : index
    %572 = vector.load %arg14[%c11, %c0_218, %c0_219] : memref<16x16x256xf32, #tpu.memory_space<vmem>>, vector<1x16x256xf32>
    %573 = vector.shape_cast %572 : vector<1x16x256xf32> to vector<16x256xf32>
    %c0_220 = arith.constant 0 : index
    %c0_221 = arith.constant 0 : index
    %574 = vector.load %arg7[%c0_220, %c0_221] : memref<64x256xf32, #tpu.memory_space<vmem>>, vector<64x256xf32>
    %cst_222 = arith.constant dense<0.000000e+00> : vector<16x256xf32>
    %575 = tpu.matmul %562, %574, %cst_222 {dimension_numbers = #tpu.dot_dimension_numbers<[1], [0], [0], [1], [0, 0, 1, 1], [], []>} : vector<16x64xf32>, vector<64x256xf32>, vector<16x256xf32> -> vector<16x256xf32>
    %576 = arith.addf %573, %575 : vector<16x256xf32>
    %577 = vector.extract_strided_slice %576 {offsets = [0, 0], sizes = [16, 64], strides = [1, 1]} : vector<16x256xf32> to vector<16x64xf32>
    %cst_223 = arith.constant 0.000000e+00 : f32
    %578 = vector.broadcast %cst_223 : f32 to vector<16x64xf32>
    %579 = arith.subf %578, %577 : vector<16x64xf32>
    %580 = math.exp %579 : vector<16x64xf32>
    %cst_224 = arith.constant 1.000000e+00 : f32
    %581 = vector.broadcast %cst_224 : f32 to vector<16x64xf32>
    %582 = arith.addf %581, %580 : vector<16x64xf32>
    %cst_225 = arith.constant 1.000000e+00 : f32
    %583 = vector.broadcast %cst_225 : f32 to vector<16x64xf32>
    %584 = arith.divf %583, %582 : vector<16x64xf32>
    %585 = vector.extract_strided_slice %576 {offsets = [0, 64], sizes = [16, 64], strides = [1, 1]} : vector<16x256xf32> to vector<16x64xf32>
    %cst_226 = arith.constant 0.000000e+00 : f32
    %586 = vector.broadcast %cst_226 : f32 to vector<16x64xf32>
    %587 = arith.subf %586, %585 : vector<16x64xf32>
    %588 = math.exp %587 : vector<16x64xf32>
    %cst_227 = arith.constant 1.000000e+00 : f32
    %589 = vector.broadcast %cst_227 : f32 to vector<16x64xf32>
    %590 = arith.addf %589, %588 : vector<16x64xf32>
    %cst_228 = arith.constant 1.000000e+00 : f32
    %591 = vector.broadcast %cst_228 : f32 to vector<16x64xf32>
    %592 = arith.divf %591, %590 : vector<16x64xf32>
    %593 = vector.extract_strided_slice %576 {offsets = [0, 128], sizes = [16, 64], strides = [1, 1]} : vector<16x256xf32> to vector<16x64xf32>
    %594 = math.tanh %593 : vector<16x64xf32>
    %595 = vector.extract_strided_slice %576 {offsets = [0, 192], sizes = [16, 64], strides = [1, 1]} : vector<16x256xf32> to vector<16x64xf32>
    %cst_229 = arith.constant 0.000000e+00 : f32
    %596 = vector.broadcast %cst_229 : f32 to vector<16x64xf32>
    %597 = arith.subf %596, %595 : vector<16x64xf32>
    %598 = math.exp %597 : vector<16x64xf32>
    %cst_230 = arith.constant 1.000000e+00 : f32
    %599 = vector.broadcast %cst_230 : f32 to vector<16x64xf32>
    %600 = arith.addf %599, %598 : vector<16x64xf32>
    %cst_231 = arith.constant 1.000000e+00 : f32
    %601 = vector.broadcast %cst_231 : f32 to vector<16x64xf32>
    %602 = arith.divf %601, %600 : vector<16x64xf32>
    %603 = arith.mulf %592, %565 : vector<16x64xf32>
    %604 = arith.mulf %584, %594 : vector<16x64xf32>
    %605 = arith.addf %603, %604 : vector<16x64xf32>
    %606 = math.tanh %605 : vector<16x64xf32>
    %607 = arith.mulf %602, %606 : vector<16x64xf32>
    %c11_i32 = arith.constant 11 : i32
    %608 = vector.broadcast %c11_i32 : i32 to vector<16x1xi32>
    %609 = arith.cmpi sgt, %21, %608 : vector<16x1xi32>
    %610 = vector.shape_cast %609 : vector<16x1xi1> to vector<16x1xi1>
    %611 = vector.broadcast %610 : vector<16x1xi1> to vector<16x64xi1>
    %612 = arith.select %611, %607, %562 : vector<16x64xi1>, vector<16x64xf32>
    %613 = vector.shape_cast %609 : vector<16x1xi1> to vector<16x1xi1>
    %614 = vector.broadcast %613 : vector<16x1xi1> to vector<16x64xi1>
    %615 = arith.select %614, %605, %565 : vector<16x64xi1>, vector<16x64xf32>
    %cst_232 = arith.constant 0.000000e+00 : f32
    %616 = vector.shape_cast %609 : vector<16x1xi1> to vector<16x1xi1>
    %617 = vector.broadcast %616 : vector<16x1xi1> to vector<16x64xi1>
    %618 = vector.broadcast %cst_232 : f32 to vector<16x64xf32>
    %619 = arith.select %617, %607, %618 : vector<16x64xi1>, vector<16x64xf32>
    %620 = vector.shape_cast %619 : vector<16x64xf32> to vector<1x16x64xf32>
    %c11_233 = arith.constant 11 : index
    %c0_234 = arith.constant 0 : index
    %c0_235 = arith.constant 0 : index
    %621 = vector.load %arg15[%c11_233, %c0_234, %c0_235] : memref<16x16x64xf32, #tpu.memory_space<vmem>>, vector<1x16x64xf32>
    tpu.vector_store %arg15[%c11_233, %c0_234, %c0_235], %620 {strides = array<i32>} : memref<16x16x64xf32, #tpu.memory_space<vmem>>, vector<1x16x64xf32>,
    %c12 = arith.constant 12 : index
    %c0_236 = arith.constant 0 : index
    %c0_237 = arith.constant 0 : index
    %622 = vector.load %arg14[%c12, %c0_236, %c0_237] : memref<16x16x256xf32, #tpu.memory_space<vmem>>, vector<1x16x256xf32>
    %623 = vector.shape_cast %622 : vector<1x16x256xf32> to vector<16x256xf32>
    %c0_238 = arith.constant 0 : index
    %c0_239 = arith.constant 0 : index
    %624 = vector.load %arg7[%c0_238, %c0_239] : memref<64x256xf32, #tpu.memory_space<vmem>>, vector<64x256xf32>
    %cst_240 = arith.constant dense<0.000000e+00> : vector<16x256xf32>
    %625 = tpu.matmul %612, %624, %cst_240 {dimension_numbers = #tpu.dot_dimension_numbers<[1], [0], [0], [1], [0, 0, 1, 1], [], []>} : vector<16x64xf32>, vector<64x256xf32>, vector<16x256xf32> -> vector<16x256xf32>
    %626 = arith.addf %623, %625 : vector<16x256xf32>
    %627 = vector.extract_strided_slice %626 {offsets = [0, 0], sizes = [16, 64], strides = [1, 1]} : vector<16x256xf32> to vector<16x64xf32>
    %cst_241 = arith.constant 0.000000e+00 : f32
    %628 = vector.broadcast %cst_241 : f32 to vector<16x64xf32>
    %629 = arith.subf %628, %627 : vector<16x64xf32>
    %630 = math.exp %629 : vector<16x64xf32>
    %cst_242 = arith.constant 1.000000e+00 : f32
    %631 = vector.broadcast %cst_242 : f32 to vector<16x64xf32>
    %632 = arith.addf %631, %630 : vector<16x64xf32>
    %cst_243 = arith.constant 1.000000e+00 : f32
    %633 = vector.broadcast %cst_243 : f32 to vector<16x64xf32>
    %634 = arith.divf %633, %632 : vector<16x64xf32>
    %635 = vector.extract_strided_slice %626 {offsets = [0, 64], sizes = [16, 64], strides = [1, 1]} : vector<16x256xf32> to vector<16x64xf32>
    %cst_244 = arith.constant 0.000000e+00 : f32
    %636 = vector.broadcast %cst_244 : f32 to vector<16x64xf32>
    %637 = arith.subf %636, %635 : vector<16x64xf32>
    %638 = math.exp %637 : vector<16x64xf32>
    %cst_245 = arith.constant 1.000000e+00 : f32
    %639 = vector.broadcast %cst_245 : f32 to vector<16x64xf32>
    %640 = arith.addf %639, %638 : vector<16x64xf32>
    %cst_246 = arith.constant 1.000000e+00 : f32
    %641 = vector.broadcast %cst_246 : f32 to vector<16x64xf32>
    %642 = arith.divf %641, %640 : vector<16x64xf32>
    %643 = vector.extract_strided_slice %626 {offsets = [0, 128], sizes = [16, 64], strides = [1, 1]} : vector<16x256xf32> to vector<16x64xf32>
    %644 = math.tanh %643 : vector<16x64xf32>
    %645 = vector.extract_strided_slice %626 {offsets = [0, 192], sizes = [16, 64], strides = [1, 1]} : vector<16x256xf32> to vector<16x64xf32>
    %cst_247 = arith.constant 0.000000e+00 : f32
    %646 = vector.broadcast %cst_247 : f32 to vector<16x64xf32>
    %647 = arith.subf %646, %645 : vector<16x64xf32>
    %648 = math.exp %647 : vector<16x64xf32>
    %cst_248 = arith.constant 1.000000e+00 : f32
    %649 = vector.broadcast %cst_248 : f32 to vector<16x64xf32>
    %650 = arith.addf %649, %648 : vector<16x64xf32>
    %cst_249 = arith.constant 1.000000e+00 : f32
    %651 = vector.broadcast %cst_249 : f32 to vector<16x64xf32>
    %652 = arith.divf %651, %650 : vector<16x64xf32>
    %653 = arith.mulf %642, %615 : vector<16x64xf32>
    %654 = arith.mulf %634, %644 : vector<16x64xf32>
    %655 = arith.addf %653, %654 : vector<16x64xf32>
    %656 = math.tanh %655 : vector<16x64xf32>
    %657 = arith.mulf %652, %656 : vector<16x64xf32>
    %c12_i32 = arith.constant 12 : i32
    %658 = vector.broadcast %c12_i32 : i32 to vector<16x1xi32>
    %659 = arith.cmpi sgt, %21, %658 : vector<16x1xi32>
    %660 = vector.shape_cast %659 : vector<16x1xi1> to vector<16x1xi1>
    %661 = vector.broadcast %660 : vector<16x1xi1> to vector<16x64xi1>
    %662 = arith.select %661, %657, %612 : vector<16x64xi1>, vector<16x64xf32>
    %663 = vector.shape_cast %659 : vector<16x1xi1> to vector<16x1xi1>
    %664 = vector.broadcast %663 : vector<16x1xi1> to vector<16x64xi1>
    %665 = arith.select %664, %655, %615 : vector<16x64xi1>, vector<16x64xf32>
    %cst_250 = arith.constant 0.000000e+00 : f32
    %666 = vector.shape_cast %659 : vector<16x1xi1> to vector<16x1xi1>
    %667 = vector.broadcast %666 : vector<16x1xi1> to vector<16x64xi1>
    %668 = vector.broadcast %cst_250 : f32 to vector<16x64xf32>
    %669 = arith.select %667, %657, %668 : vector<16x64xi1>, vector<16x64xf32>
    %670 = vector.shape_cast %669 : vector<16x64xf32> to vector<1x16x64xf32>
    %c12_251 = arith.constant 12 : index
    %c0_252 = arith.constant 0 : index
    %c0_253 = arith.constant 0 : index
    %671 = vector.load %arg15[%c12_251, %c0_252, %c0_253] : memref<16x16x64xf32, #tpu.memory_space<vmem>>, vector<1x16x64xf32>
    tpu.vector_store %arg15[%c12_251, %c0_252, %c0_253], %670 {strides = array<i32>} : memref<16x16x64xf32, #tpu.memory_space<vmem>>, vector<1x16x64xf32>,
    %c13 = arith.constant 13 : index
    %c0_254 = arith.constant 0 : index
    %c0_255 = arith.constant 0 : index
    %672 = vector.load %arg14[%c13, %c0_254, %c0_255] : memref<16x16x256xf32, #tpu.memory_space<vmem>>, vector<1x16x256xf32>
    %673 = vector.shape_cast %672 : vector<1x16x256xf32> to vector<16x256xf32>
    %c0_256 = arith.constant 0 : index
    %c0_257 = arith.constant 0 : index
    %674 = vector.load %arg7[%c0_256, %c0_257] : memref<64x256xf32, #tpu.memory_space<vmem>>, vector<64x256xf32>
    %cst_258 = arith.constant dense<0.000000e+00> : vector<16x256xf32>
    %675 = tpu.matmul %662, %674, %cst_258 {dimension_numbers = #tpu.dot_dimension_numbers<[1], [0], [0], [1], [0, 0, 1, 1], [], []>} : vector<16x64xf32>, vector<64x256xf32>, vector<16x256xf32> -> vector<16x256xf32>
    %676 = arith.addf %673, %675 : vector<16x256xf32>
    %677 = vector.extract_strided_slice %676 {offsets = [0, 0], sizes = [16, 64], strides = [1, 1]} : vector<16x256xf32> to vector<16x64xf32>
    %cst_259 = arith.constant 0.000000e+00 : f32
    %678 = vector.broadcast %cst_259 : f32 to vector<16x64xf32>
    %679 = arith.subf %678, %677 : vector<16x64xf32>
    %680 = math.exp %679 : vector<16x64xf32>
    %cst_260 = arith.constant 1.000000e+00 : f32
    %681 = vector.broadcast %cst_260 : f32 to vector<16x64xf32>
    %682 = arith.addf %681, %680 : vector<16x64xf32>
    %cst_261 = arith.constant 1.000000e+00 : f32
    %683 = vector.broadcast %cst_261 : f32 to vector<16x64xf32>
    %684 = arith.divf %683, %682 : vector<16x64xf32>
    %685 = vector.extract_strided_slice %676 {offsets = [0, 64], sizes = [16, 64], strides = [1, 1]} : vector<16x256xf32> to vector<16x64xf32>
    %cst_262 = arith.constant 0.000000e+00 : f32
    %686 = vector.broadcast %cst_262 : f32 to vector<16x64xf32>
    %687 = arith.subf %686, %685 : vector<16x64xf32>
    %688 = math.exp %687 : vector<16x64xf32>
    %cst_263 = arith.constant 1.000000e+00 : f32
    %689 = vector.broadcast %cst_263 : f32 to vector<16x64xf32>
    %690 = arith.addf %689, %688 : vector<16x64xf32>
    %cst_264 = arith.constant 1.000000e+00 : f32
    %691 = vector.broadcast %cst_264 : f32 to vector<16x64xf32>
    %692 = arith.divf %691, %690 : vector<16x64xf32>
    %693 = vector.extract_strided_slice %676 {offsets = [0, 128], sizes = [16, 64], strides = [1, 1]} : vector<16x256xf32> to vector<16x64xf32>
    %694 = math.tanh %693 : vector<16x64xf32>
    %695 = vector.extract_strided_slice %676 {offsets = [0, 192], sizes = [16, 64], strides = [1, 1]} : vector<16x256xf32> to vector<16x64xf32>
    %cst_265 = arith.constant 0.000000e+00 : f32
    %696 = vector.broadcast %cst_265 : f32 to vector<16x64xf32>
    %697 = arith.subf %696, %695 : vector<16x64xf32>
    %698 = math.exp %697 : vector<16x64xf32>
    %cst_266 = arith.constant 1.000000e+00 : f32
    %699 = vector.broadcast %cst_266 : f32 to vector<16x64xf32>
    %700 = arith.addf %699, %698 : vector<16x64xf32>
    %cst_267 = arith.constant 1.000000e+00 : f32
    %701 = vector.broadcast %cst_267 : f32 to vector<16x64xf32>
    %702 = arith.divf %701, %700 : vector<16x64xf32>
    %703 = arith.mulf %692, %665 : vector<16x64xf32>
    %704 = arith.mulf %684, %694 : vector<16x64xf32>
    %705 = arith.addf %703, %704 : vector<16x64xf32>
    %706 = math.tanh %705 : vector<16x64xf32>
    %707 = arith.mulf %702, %706 : vector<16x64xf32>
    %c13_i32 = arith.constant 13 : i32
    %708 = vector.broadcast %c13_i32 : i32 to vector<16x1xi32>
    %709 = arith.cmpi sgt, %21, %708 : vector<16x1xi32>
    %710 = vector.shape_cast %709 : vector<16x1xi1> to vector<16x1xi1>
    %711 = vector.broadcast %710 : vector<16x1xi1> to vector<16x64xi1>
    %712 = arith.select %711, %707, %662 : vector<16x64xi1>, vector<16x64xf32>
    %713 = vector.shape_cast %709 : vector<16x1xi1> to vector<16x1xi1>
    %714 = vector.broadcast %713 : vector<16x1xi1> to vector<16x64xi1>
    %715 = arith.select %714, %705, %665 : vector<16x64xi1>, vector<16x64xf32>
    %cst_268 = arith.constant 0.000000e+00 : f32
    %716 = vector.shape_cast %709 : vector<16x1xi1> to vector<16x1xi1>
    %717 = vector.broadcast %716 : vector<16x1xi1> to vector<16x64xi1>
    %718 = vector.broadcast %cst_268 : f32 to vector<16x64xf32>
    %719 = arith.select %717, %707, %718 : vector<16x64xi1>, vector<16x64xf32>
    %720 = vector.shape_cast %719 : vector<16x64xf32> to vector<1x16x64xf32>
    %c13_269 = arith.constant 13 : index
    %c0_270 = arith.constant 0 : index
    %c0_271 = arith.constant 0 : index
    %721 = vector.load %arg15[%c13_269, %c0_270, %c0_271] : memref<16x16x64xf32, #tpu.memory_space<vmem>>, vector<1x16x64xf32>
    tpu.vector_store %arg15[%c13_269, %c0_270, %c0_271], %720 {strides = array<i32>} : memref<16x16x64xf32, #tpu.memory_space<vmem>>, vector<1x16x64xf32>,
    %c14 = arith.constant 14 : index
    %c0_272 = arith.constant 0 : index
    %c0_273 = arith.constant 0 : index
    %722 = vector.load %arg14[%c14, %c0_272, %c0_273] : memref<16x16x256xf32, #tpu.memory_space<vmem>>, vector<1x16x256xf32>
    %723 = vector.shape_cast %722 : vector<1x16x256xf32> to vector<16x256xf32>
    %c0_274 = arith.constant 0 : index
    %c0_275 = arith.constant 0 : index
    %724 = vector.load %arg7[%c0_274, %c0_275] : memref<64x256xf32, #tpu.memory_space<vmem>>, vector<64x256xf32>
    %cst_276 = arith.constant dense<0.000000e+00> : vector<16x256xf32>
    %725 = tpu.matmul %712, %724, %cst_276 {dimension_numbers = #tpu.dot_dimension_numbers<[1], [0], [0], [1], [0, 0, 1, 1], [], []>} : vector<16x64xf32>, vector<64x256xf32>, vector<16x256xf32> -> vector<16x256xf32>
    %726 = arith.addf %723, %725 : vector<16x256xf32>
    %727 = vector.extract_strided_slice %726 {offsets = [0, 0], sizes = [16, 64], strides = [1, 1]} : vector<16x256xf32> to vector<16x64xf32>
    %cst_277 = arith.constant 0.000000e+00 : f32
    %728 = vector.broadcast %cst_277 : f32 to vector<16x64xf32>
    %729 = arith.subf %728, %727 : vector<16x64xf32>
    %730 = math.exp %729 : vector<16x64xf32>
    %cst_278 = arith.constant 1.000000e+00 : f32
    %731 = vector.broadcast %cst_278 : f32 to vector<16x64xf32>
    %732 = arith.addf %731, %730 : vector<16x64xf32>
    %cst_279 = arith.constant 1.000000e+00 : f32
    %733 = vector.broadcast %cst_279 : f32 to vector<16x64xf32>
    %734 = arith.divf %733, %732 : vector<16x64xf32>
    %735 = vector.extract_strided_slice %726 {offsets = [0, 64], sizes = [16, 64], strides = [1, 1]} : vector<16x256xf32> to vector<16x64xf32>
    %cst_280 = arith.constant 0.000000e+00 : f32
    %736 = vector.broadcast %cst_280 : f32 to vector<16x64xf32>
    %737 = arith.subf %736, %735 : vector<16x64xf32>
    %738 = math.exp %737 : vector<16x64xf32>
    %cst_281 = arith.constant 1.000000e+00 : f32
    %739 = vector.broadcast %cst_281 : f32 to vector<16x64xf32>
    %740 = arith.addf %739, %738 : vector<16x64xf32>
    %cst_282 = arith.constant 1.000000e+00 : f32
    %741 = vector.broadcast %cst_282 : f32 to vector<16x64xf32>
    %742 = arith.divf %741, %740 : vector<16x64xf32>
    %743 = vector.extract_strided_slice %726 {offsets = [0, 128], sizes = [16, 64], strides = [1, 1]} : vector<16x256xf32> to vector<16x64xf32>
    %744 = math.tanh %743 : vector<16x64xf32>
    %745 = vector.extract_strided_slice %726 {offsets = [0, 192], sizes = [16, 64], strides = [1, 1]} : vector<16x256xf32> to vector<16x64xf32>
    %cst_283 = arith.constant 0.000000e+00 : f32
    %746 = vector.broadcast %cst_283 : f32 to vector<16x64xf32>
    %747 = arith.subf %746, %745 : vector<16x64xf32>
    %748 = math.exp %747 : vector<16x64xf32>
    %cst_284 = arith.constant 1.000000e+00 : f32
    %749 = vector.broadcast %cst_284 : f32 to vector<16x64xf32>
    %750 = arith.addf %749, %748 : vector<16x64xf32>
    %cst_285 = arith.constant 1.000000e+00 : f32
    %751 = vector.broadcast %cst_285 : f32 to vector<16x64xf32>
    %752 = arith.divf %751, %750 : vector<16x64xf32>
    %753 = arith.mulf %742, %715 : vector<16x64xf32>
    %754 = arith.mulf %734, %744 : vector<16x64xf32>
    %755 = arith.addf %753, %754 : vector<16x64xf32>
    %756 = math.tanh %755 : vector<16x64xf32>
    %757 = arith.mulf %752, %756 : vector<16x64xf32>
    %c14_i32 = arith.constant 14 : i32
    %758 = vector.broadcast %c14_i32 : i32 to vector<16x1xi32>
    %759 = arith.cmpi sgt, %21, %758 : vector<16x1xi32>
    %760 = vector.shape_cast %759 : vector<16x1xi1> to vector<16x1xi1>
    %761 = vector.broadcast %760 : vector<16x1xi1> to vector<16x64xi1>
    %762 = arith.select %761, %757, %712 : vector<16x64xi1>, vector<16x64xf32>
    %763 = vector.shape_cast %759 : vector<16x1xi1> to vector<16x1xi1>
    %764 = vector.broadcast %763 : vector<16x1xi1> to vector<16x64xi1>
    %765 = arith.select %764, %755, %715 : vector<16x64xi1>, vector<16x64xf32>
    %cst_286 = arith.constant 0.000000e+00 : f32
    %766 = vector.shape_cast %759 : vector<16x1xi1> to vector<16x1xi1>
    %767 = vector.broadcast %766 : vector<16x1xi1> to vector<16x64xi1>
    %768 = vector.broadcast %cst_286 : f32 to vector<16x64xf32>
    %769 = arith.select %767, %757, %768 : vector<16x64xi1>, vector<16x64xf32>
    %770 = vector.shape_cast %769 : vector<16x64xf32> to vector<1x16x64xf32>
    %c14_287 = arith.constant 14 : index
    %c0_288 = arith.constant 0 : index
    %c0_289 = arith.constant 0 : index
    %771 = vector.load %arg15[%c14_287, %c0_288, %c0_289] : memref<16x16x64xf32, #tpu.memory_space<vmem>>, vector<1x16x64xf32>
    tpu.vector_store %arg15[%c14_287, %c0_288, %c0_289], %770 {strides = array<i32>} : memref<16x16x64xf32, #tpu.memory_space<vmem>>, vector<1x16x64xf32>,
    %c15 = arith.constant 15 : index
    %c0_290 = arith.constant 0 : index
    %c0_291 = arith.constant 0 : index
    %772 = vector.load %arg14[%c15, %c0_290, %c0_291] : memref<16x16x256xf32, #tpu.memory_space<vmem>>, vector<1x16x256xf32>
    %773 = vector.shape_cast %772 : vector<1x16x256xf32> to vector<16x256xf32>
    %c0_292 = arith.constant 0 : index
    %c0_293 = arith.constant 0 : index
    %774 = vector.load %arg7[%c0_292, %c0_293] : memref<64x256xf32, #tpu.memory_space<vmem>>, vector<64x256xf32>
    %cst_294 = arith.constant dense<0.000000e+00> : vector<16x256xf32>
    %775 = tpu.matmul %762, %774, %cst_294 {dimension_numbers = #tpu.dot_dimension_numbers<[1], [0], [0], [1], [0, 0, 1, 1], [], []>} : vector<16x64xf32>, vector<64x256xf32>, vector<16x256xf32> -> vector<16x256xf32>
    %776 = arith.addf %773, %775 : vector<16x256xf32>
    %777 = vector.extract_strided_slice %776 {offsets = [0, 0], sizes = [16, 64], strides = [1, 1]} : vector<16x256xf32> to vector<16x64xf32>
    %cst_295 = arith.constant 0.000000e+00 : f32
    %778 = vector.broadcast %cst_295 : f32 to vector<16x64xf32>
    %779 = arith.subf %778, %777 : vector<16x64xf32>
    %780 = math.exp %779 : vector<16x64xf32>
    %cst_296 = arith.constant 1.000000e+00 : f32
    %781 = vector.broadcast %cst_296 : f32 to vector<16x64xf32>
    %782 = arith.addf %781, %780 : vector<16x64xf32>
    %cst_297 = arith.constant 1.000000e+00 : f32
    %783 = vector.broadcast %cst_297 : f32 to vector<16x64xf32>
    %784 = arith.divf %783, %782 : vector<16x64xf32>
    %785 = vector.extract_strided_slice %776 {offsets = [0, 64], sizes = [16, 64], strides = [1, 1]} : vector<16x256xf32> to vector<16x64xf32>
    %cst_298 = arith.constant 0.000000e+00 : f32
    %786 = vector.broadcast %cst_298 : f32 to vector<16x64xf32>
    %787 = arith.subf %786, %785 : vector<16x64xf32>
    %788 = math.exp %787 : vector<16x64xf32>
    %cst_299 = arith.constant 1.000000e+00 : f32
    %789 = vector.broadcast %cst_299 : f32 to vector<16x64xf32>
    %790 = arith.addf %789, %788 : vector<16x64xf32>
    %cst_300 = arith.constant 1.000000e+00 : f32
    %791 = vector.broadcast %cst_300 : f32 to vector<16x64xf32>
    %792 = arith.divf %791, %790 : vector<16x64xf32>
    %793 = vector.extract_strided_slice %776 {offsets = [0, 128], sizes = [16, 64], strides = [1, 1]} : vector<16x256xf32> to vector<16x64xf32>
    %794 = math.tanh %793 : vector<16x64xf32>
    %795 = vector.extract_strided_slice %776 {offsets = [0, 192], sizes = [16, 64], strides = [1, 1]} : vector<16x256xf32> to vector<16x64xf32>
    %cst_301 = arith.constant 0.000000e+00 : f32
    %796 = vector.broadcast %cst_301 : f32 to vector<16x64xf32>
    %797 = arith.subf %796, %795 : vector<16x64xf32>
    %798 = math.exp %797 : vector<16x64xf32>
    %cst_302 = arith.constant 1.000000e+00 : f32
    %799 = vector.broadcast %cst_302 : f32 to vector<16x64xf32>
    %800 = arith.addf %799, %798 : vector<16x64xf32>
    %cst_303 = arith.constant 1.000000e+00 : f32
    %801 = vector.broadcast %cst_303 : f32 to vector<16x64xf32>
    %802 = arith.divf %801, %800 : vector<16x64xf32>
    %803 = arith.mulf %792, %765 : vector<16x64xf32>
    %804 = arith.mulf %784, %794 : vector<16x64xf32>
    %805 = arith.addf %803, %804 : vector<16x64xf32>
    %806 = math.tanh %805 : vector<16x64xf32>
    %807 = arith.mulf %802, %806 : vector<16x64xf32>
    %c15_i32 = arith.constant 15 : i32
    %808 = vector.broadcast %c15_i32 : i32 to vector<16x1xi32>
    %809 = arith.cmpi sgt, %21, %808 : vector<16x1xi32>
    %810 = vector.shape_cast %809 : vector<16x1xi1> to vector<16x1xi1>
    %811 = vector.broadcast %810 : vector<16x1xi1> to vector<16x64xi1>
    %812 = arith.select %811, %807, %762 : vector<16x64xi1>, vector<16x64xf32>
    %813 = vector.shape_cast %809 : vector<16x1xi1> to vector<16x1xi1>
    %814 = vector.broadcast %813 : vector<16x1xi1> to vector<16x64xi1>
    %815 = arith.select %814, %805, %765 : vector<16x64xi1>, vector<16x64xf32>
    %cst_304 = arith.constant 0.000000e+00 : f32
    %816 = vector.shape_cast %809 : vector<16x1xi1> to vector<16x1xi1>
    %817 = vector.broadcast %816 : vector<16x1xi1> to vector<16x64xi1>
    %818 = vector.broadcast %cst_304 : f32 to vector<16x64xf32>
    %819 = arith.select %817, %807, %818 : vector<16x64xi1>, vector<16x64xf32>
    %820 = vector.shape_cast %819 : vector<16x64xf32> to vector<1x16x64xf32>
    %c15_305 = arith.constant 15 : index
    %c0_306 = arith.constant 0 : index
    %c0_307 = arith.constant 0 : index
    %821 = vector.load %arg15[%c15_305, %c0_306, %c0_307] : memref<16x16x64xf32, #tpu.memory_space<vmem>>, vector<1x16x64xf32>
    tpu.vector_store %arg15[%c15_305, %c0_306, %c0_307], %820 {strides = array<i32>} : memref<16x16x64xf32, #tpu.memory_space<vmem>>, vector<1x16x64xf32>,
    %c0_308 = arith.constant 0 : index
    %c0_309 = arith.constant 0 : index
    %822 = vector.load %arg12[%c0_308, %c0_309] : memref<16x64xf32, #tpu.memory_space<vmem>>, vector<16x64xf32>
    tpu.vector_store %arg12[%c0_308, %c0_309], %812 {strides = array<i32>} : memref<16x64xf32, #tpu.memory_space<vmem>>, vector<16x64xf32>,
    %c0_310 = arith.constant 0 : index
    %c0_311 = arith.constant 0 : index
    %823 = vector.load %arg13[%c0_310, %c0_311] : memref<16x64xf32, #tpu.memory_space<vmem>>, vector<16x64xf32>
    tpu.vector_store %arg13[%c0_310, %c0_311], %815 {strides = array<i32>} : memref<16x64xf32, #tpu.memory_space<vmem>>, vector<16x64xf32>,
    %c0_312 = arith.constant 0 : index
    %c0_313 = arith.constant 0 : index
    %c0_314 = arith.constant 0 : index
    %824 = vector.load %arg15[%c0_312, %c0_313, %c0_314] : memref<16x16x64xf32, #tpu.memory_space<vmem>>, vector<16x16x64xf32>
    %825 = tpu.transpose %824, [1, 0, 2] : vector<16x16x64xf32> -> vector<16x16x64xf32>
    %826 = vector.shape_cast %825 : vector<16x16x64xf32> to vector<256x64xf32>
    %c0_315 = arith.constant 0 : index
    %c0_316 = arith.constant 0 : index
    %827 = vector.load %arg9[%c0_315, %c0_316] : memref<64x128xf32, #tpu.memory_space<vmem>>, vector<64x128xf32>
    %cst_317 = arith.constant dense<0.000000e+00> : vector<256x128xf32>
    %828 = tpu.matmul %826, %827, %cst_317 {dimension_numbers = #tpu.dot_dimension_numbers<[1], [0], [0], [1], [0, 0, 1, 1], [], []>} : vector<256x64xf32>, vector<64x128xf32>, vector<256x128xf32> -> vector<256x128xf32>
    %c0_318 = arith.constant 0 : index
    %c0_319 = arith.constant 0 : index
    %829 = vector.load %arg10[%c0_318, %c0_319] : memref<1x128xf32, #tpu.memory_space<vmem>>, vector<1x128xf32>
    %830 = vector.broadcast %829 : vector<1x128xf32> to vector<256x128xf32>
    %831 = arith.addf %828, %830 : vector<256x128xf32>
    %832 = vector.shape_cast %831 : vector<256x128xf32> to vector<16x16x128xf32>
    %c0_320 = arith.constant 0 : index
    %c0_321 = arith.constant 0 : index
    %c0_322 = arith.constant 0 : index
    %833 = vector.load %arg11[%c0_320, %c0_321, %c0_322] : memref<16x16x128xf32, #tpu.memory_space<vmem>>, vector<16x16x128xf32>
    tpu.vector_store %arg11[%c0_320, %c0_321, %c0_322], %832 {strides = array<i32>} : memref<16x16x128xf32, #tpu.memory_space<vmem>>, vector<16x16x128xf32>,
    return
  }
  func.func @transform_0(%arg0: i32) -> (i32, i32, i32) {
    %c0_i32 = arith.constant 0 : i32
    %c0_i32_0 = arith.constant 0 : i32
    %c0_i32_1 = arith.constant 0 : i32
    return %c0_i32, %arg0, %c0_i32_0 : i32, i32, i32
  }
  func.func @transform_1(%arg0: i32) -> (i32, i32) {
    %c0_i32 = arith.constant 0 : i32
    %c0_i32_0 = arith.constant 0 : i32
    return %arg0, %c0_i32 : i32, i32
  }
  func.func @transform_2(%arg0: i32) -> (i32, i32) {
    %c0_i32 = arith.constant 0 : i32
    %c0_i32_0 = arith.constant 0 : i32
    return %arg0, %c0_i32 : i32, i32
  }
  func.func @transform_3(%arg0: i32) -> (i32, i32) {
    %c0_i32 = arith.constant 0 : i32
    %c0_i32_0 = arith.constant 0 : i32
    %c0_i32_1 = arith.constant 0 : i32
    return %c0_i32, %c0_i32_0 : i32, i32
  }
  func.func @transform_4(%arg0: i32) -> (i32, i32) {
    %c0_i32 = arith.constant 0 : i32
    %c0_i32_0 = arith.constant 0 : i32
    %c0_i32_1 = arith.constant 0 : i32
    return %c0_i32, %c0_i32_0 : i32, i32
  }
  func.func @transform_5(%arg0: i32) -> (i32, i32) {
    %c0_i32 = arith.constant 0 : i32
    %c0_i32_0 = arith.constant 0 : i32
    %c0_i32_1 = arith.constant 0 : i32
    return %c0_i32, %c0_i32_0 : i32, i32
  }
  func.func @transform_6(%arg0: i32) -> (i32, i32) {
    %c0_i32 = arith.constant 0 : i32
    %c0_i32_0 = arith.constant 0 : i32
    %c0_i32_1 = arith.constant 0 : i32
    return %c0_i32, %c0_i32_0 : i32, i32
  }
  func.func @transform_7(%arg0: i32) -> (i32, i32) {
    %c0_i32 = arith.constant 0 : i32
    %c0_i32_0 = arith.constant 0 : i32
    %c0_i32_1 = arith.constant 0 : i32
    return %c0_i32, %c0_i32_0 : i32, i32
  }
  func.func @transform_8(%arg0: i32) -> (i32, i32) {
    %c0_i32 = arith.constant 0 : i32
    %c0_i32_0 = arith.constant 0 : i32
    %c0_i32_1 = arith.constant 0 : i32
    return %c0_i32, %c0_i32_0 : i32, i32
  }
  func.func @transform_9(%arg0: i32) -> (i32, i32) {
    %c0_i32 = arith.constant 0 : i32
    %c0_i32_0 = arith.constant 0 : i32
    %c0_i32_1 = arith.constant 0 : i32
    return %c0_i32, %c0_i32_0 : i32, i32
  }
  func.func @transform_10(%arg0: i32) -> (i32, i32, i32) {
    %c0_i32 = arith.constant 0 : i32
    %c0_i32_0 = arith.constant 0 : i32
    %c0_i32_1 = arith.constant 0 : i32
    return %arg0, %c0_i32, %c0_i32_0 : i32, i32, i32
  }
  func.func @transform_11(%arg0: i32) -> (i32, i32) {
    %c0_i32 = arith.constant 0 : i32
    %c0_i32_0 = arith.constant 0 : i32
    return %arg0, %c0_i32 : i32, i32
  }
  func.func @transform_12(%arg0: i32) -> (i32, i32) {
    %c0_i32 = arith.constant 0 : i32
    %c0_i32_0 = arith.constant 0 : i32
    return %arg0, %c0_i32 : i32, i32
  }
}

</mosaic_0001>

<bundles_post_ra>
// kernel: tpu_custom_call.1
= control target key start
LH: loop header
LB: loop body
LE: loop exit
PB: predicated region body
PF: predicated region fallthrough
CT: control target
= control target key end

     0   :  { %18 = vsyncpa [#allocation5], 0  ;;  %s7471_s0 = inlined_call_operand.vmem [shape: s32[16,16,1], index: 0, kind: input, shape index: {}]   ;;  %s7472_s1 = inlined_call_operand.vmem [shape: s32[16,1], index: 1, kind: input, shape index: {}]   ;;  %s7473_s2 = inlined_call_operand.vmem [shape: f32[16,4], index: 2, kind: input, shape index: {}]   ;;  %s7474_s3 = inlined_call_operand.hbm [shape: f32[4,64], index: 3, kind: input, shape index: {}]   ;;  %s7475_s4 = inlined_call_operand.vmem [shape: f32[1,64], index: 4, kind: input, shape index: {}]   ;;  %s7476_s5 = inlined_call_operand.vmem [shape: f32[128,256], index: 5, kind: input, shape index: {}]   ;;  %s7477_s6 = inlined_call_operand.hbm [shape: f32[64,256], index: 6, kind: input, shape index: {}]   ;;  %s7478_s7 = inlined_call_operand.vmem [shape: f32[1,256], index: 7, kind: input, shape index: {}]   ;;  %s7479_s8 = inlined_call_operand.vmem [shape: f32[64,128], index: 8, kind: input, shape index: {}]   ;;  %s7480_s9 = inlined_call_operand.hbm [shape: f32[1,128], index: 9, kind: input, shape index: {}]   ;;  %s7481_s10 = inlined_call_operand.hbm [shape: f32[16,16,128], index: 10, kind: output, shape index: {0}]   ;;  %s7482_s11 = inlined_call_operand.hbm [shape: f32[16,64], index: 11, kind: output, shape index: {1}]   ;;  %s7483_s12 = inlined_call_operand.hbm [shape: f32[16,64], index: 12, kind: output, shape index: {2}]  }
   0x1   :  { %19 = vsyncpa [#allocation8], 0 }
   0x2   :  { %20 = vsyncpa [#allocation6], 0 }
   0x3   :  { %21 = vsyncpa [#allocation12], 0  ;;  %s5528_s21 = smov [#allocation7]  }
   0x4   :  { %s47_s22 = sshll.u32 %s5528_s21, 4  ;;  %s48_s22 = int_to_ptr.vmem [resolvable:$true] %s47_s22 }
   0x5   :  { %s5408_s23 = scalar_lea.vmem %s48_s22, 2048  ;;  %p5413_p1 = scmp.lt.s32.totalorder %s48_s22, %s48_s22 }
   0x6   :  { %p5409_p0 = scmp.ne.s32.totalorder %s48_s22, %s5408_s23  ;;  %p5414_p2 = scmp.lt.s32.totalorder %s5408_s23, %s5408_s23 }
   0x8   :  { %p5415_p3 = por %p5414_p2, %p5413_p1 }
   0xa   :  { %p5416_p4 = pnand %p5415_p3, %p5409_p0 }
   0xc   :  { %5419 = shalt.err (!%p5416_p4)
}
   0xd   :  { %s5529_s24 = smov 256   ;;  %s5530_s25 = smov 16  }
   0xe   :  { %53 = dma.hbm_to_vmem [thread:$0]  %s7477_s6, 2048, %s48_s22, [#allocation8], %s5529_s24, %s5529_s24, %s5530_s25  }
   0xf   :  { %s5531_s28 = smov [#allocation4]   ;;  %s5532_s30 = smov [#allocation9]  }
  0x10   :  { %s34_s29 = sshll.u32 %s5531_s28, 4  ;;  %s64_s13 = sshll.u32 %s5532_s30, 4  ;;  %s35_s29 = int_to_ptr.vmem [resolvable:$true] %s34_s29  ;;  %s65_s13 = int_to_ptr.vmem [resolvable:$true] %s64_s13 }
  0x11   :  { %s5428_s14 = scalar_lea.vmem %s35_s29, 64  ;;  %p5433_p6 = scmp.lt.s32.totalorder %s35_s29, %s35_s29 }
  0x12   :  { %p5429_p5 = scmp.ne.s32.totalorder %s35_s29, %s5428_s14  ;;  %p5434_p7 = scmp.lt.s32.totalorder %s5428_s14, %s5428_s14 }
  0x14   :  { %p5435_p8 = por %p5434_p7, %p5433_p6 }
  0x16   :  { %p5436_p9 = pnand %p5435_p8, %p5429_p5 }
  0x18   :  { %5439 = shalt.err (!%p5436_p9)
}
  0x19   :  { %37 = dma.hbm_to_vmem [thread:$0]  %s7474_s3, 64, %s35_s29, [#allocation5]  }
  0x1a   :  { %s5448_s17 = scalar_lea.vmem %s65_s13, 16  ;;  %s5452_s6 = scalar_lea.vmem %s65_s13, 32 }
  0x1b   :  { %p5449_p10 = scmp.ne.s32.totalorder %s65_s13, %s5448_s17  ;;  %p5453_p11 = scmp.lt.s32.totalorder %s65_s13, %s65_s13 }
  0x1c   :  { %p5454_p12 = scmp.lt.s32.totalorder %s5452_s6, %s5448_s17 }
  0x1e   :  { %p5455_p13 = por %p5454_p12, %p5453_p11 }
  0x20   :  { %p5456_p0 = pnand %p5455_p13, %p5449_p10 }
  0x22   :  { %5459 = shalt.err (!%p5456_p0)
}
  0x23   :  { %67 = dma.hbm_to_vmem [thread:$0]  %s7480_s9, 16, %s65_s13, [#allocation8]  }
  0x24   :  { %5520 = dma.done.wait [#allocation5], 64  }
  0x25   :  { %5521 = vsyncadd [#allocation5], 4294967232 }
  0x26   :  { %5522 = dma.done.wait [#allocation8], 2064  }
  0x27   :  { %5523 = vsyncadd [#allocation8], 4294965232  ;;  %v7486_v0 = vmov 0   ;;  %v7484_v1 = vmov 0.0   ;;  %vm94_vm0 = vcmask 1043456   ;;  %vm87_vm1 = vcmask 31744  }
  0x28   :  { %5006 = vset.pattern.permute.xlu0 %v7486_v0  ;;  %5007 = vset.pattern.permute.xlu1 %v7486_v0  ;;  %v175_v2 = vld [vmem:[%s7471_s0] sm:$0xff]  ;;  %v176_v3 = vld [vmem:[%s7471_s0 + $0x8] sm:$0xff]  ;;  %v430_v8 = vld [vmem:[%s7476_s5 + $0xf8] sm:$0xff]  ;;  %v173_v57 = vlaneseq  ;;  %v5535_v60 = vmov 1.0   ;;  %s5536_s27 = smov 64   ;;  %vm786_vm12 = vcmask 523264  }
  0x29   :  { %507 = vmatprep.mubr.f32.mxu1 %v7484_v1  ;;  %v5630_v4 = vld [vmem:[%s7472_s1] sm:$0xff]  ;;  %208 = vperm.xlu0 %5006, %v175_v2   ;;  %v78_v7 = vld [vmem:[%s7473_s2 + $0x8] sm:$0xff]  ;;  %v429_v9 = vld [vmem:[%s7476_s5 + $0xf0] sm:$0xff] }
  0x2a   :  { %v79_v5 = vld [vmem:[#allocation4] sm:$0xf]  ;;  %v428_v10 = vld [vmem:[%s7476_s5 + $0xe8] sm:$0xff]  ;;  %vm923_vm2 = vcmp.gt.s32.totalorder %v5630_v4, 0  ;;  %443 = vmatprep.subr.mxu1 %v430_v8  ;;  %v426_v12 = vld [vmem:[%s7476_s5 + $0xd8] sm:$0xff]  ;;  %v5808_v58 = vand.u32 127, %v173_v57 }
  0x2b   :  { %v77_v6 = vld [vmem:[%s7473_s2] sm:$0xff]  ;;  %4905 = vmatprep.subr.msk.mxu0 %vm94_vm0, %v79_v5  ;;  %444 = vmatpush1.msra.mxu1 %v429_v9  ;;  %v425_v13 = vld [vmem:[%s7476_s5 + $0xd0] sm:$0xff]  ;;  %v925_v14 = vsel %vm923_vm2, 1, %v7486_v0  ;;  %v424_v15 = vld [vmem:[%s7476_s5 + $0xc8] sm:$0xff]  ;;  %vm1099_vm10 = vcmp.gt.s32.totalorder %v5630_v4, 1 }
  0x2c   :  { %4907 = vmatprep.mubr.msk.f32.mxu0 %vm87_vm1, %v77_v6  ;;  %4906 = vmatpush3.msk.msra.mxu0 %vm94_vm0, %v79_v5  ;;  %v427_v11 = vld [vmem:[%s7476_s5 + $0xe0] sm:$0xff]  ;;  %v422_v18 = vld [vmem:[%s7476_s5 + $0xb8] sm:$0xff]  ;;  %v421_v20 = vld [vmem:[%s7476_s5 + $0xb0] sm:$0xff]  ;;  %v5820_v6 = vshrl.u32 %v173_v57, 7 }
  0x2d   :  { %4908 = vmatmul.mubr.msk.f32.vlgmr.msra.gmra.mxu0 %vm87_vm1, %v78_v7  ;;  %211 = vperm.xlu0 %5006, %v176_v3   ;;  %v423_v16 = vld [vmem:[%s7476_s5 + $0xc0] sm:$0xff]  ;;  %v5673_v19 = vld [vmem:[#allocation7 + $0x70] sm:$0xff]  ;;  %v5678_v21 = vld [vmem:[#allocation7 + $0x68] sm:$0xff]  ;;  %vm1284_vm1 = vcmp.gt.s32.totalorder %v5630_v4, 2 }
  0x2e   :  { %445 = vmatprep.subr.mxu1 %v428_v10  ;;  %854 = vmatprep.mubr.f32.mxu0 %v7484_v1  ;;  %v5667_v17 = vld [vmem:[#allocation7 + $0x78] sm:$0xff]  ;;  %v5680_v22 = vld [vmem:[#allocation7 + $0x60] sm:$0xff]  ;;  %v5692_v26 = vld [vmem:[#allocation7 + $0x50] sm:$0xff]  ;;  %7490 = vst [vmem:[#allocation18_spill] sm:$0xff] %v5820_v6  ;;  %v435_v7 = vsub.s32 0, %v5820_v6 }
  0x2f   :  { %446 = vmatpush1.msra.mxu1 %v427_v11  ;;  %806 = vmatprep.subr.mxu0 %v5667_v17  ;;  %v420_v23 = vld [vmem:[%s7476_s5 + $0xa8] sm:$0xff]  ;;  %v5686_v24 = vld [vmem:[#allocation7 + $0x58] sm:$0xff]  ;;  %v417_v29 = vld [vmem:[%s7476_s5 + $0x90] sm:$0xff] }
  0x30   :  { %447 = vmatprep.subr.mxu1 %v426_v12  ;;  %807 = vmatpush1.msra.mxu0 %v5673_v19  ;;  %v419_v25 = vld [vmem:[%s7476_s5 + $0xa0] sm:$0xff]  ;;  %v418_v27 = vld [vmem:[%s7476_s5 + $0x98] sm:$0xff]  ;;  %v5698_v28 = vld [vmem:[#allocation7 + $0x48] sm:$0xff] }
  0x31   :  { %448 = vmatpush1.msra.mxu1 %v425_v13  ;;  %928 = vperm.xlu0 %5006, %v925_v14   ;;  %v5704_v30 = vld [vmem:[#allocation7 + $0x40] sm:$0xff]  ;;  %v5710_v32 = vld [vmem:[#allocation7 + $0x38] sm:$0xff]  ;;  %v5716_v34 = vld [vmem:[#allocation7 + $0x30] sm:$0xff] }
  0x32   :  { %449 = vmatprep.subr.mxu1 %v424_v15  ;;  %808 = vmatprep.subr.mxu0 %v5678_v21  ;;  %v416_v31 = vld [vmem:[%s7476_s5 + $0x88] sm:$0xff]  ;;  %v415_v33 = vld [vmem:[%s7476_s5 + $0x80] sm:$0xff]  ;;  %v414_v35 = vld [vmem:[%s7476_s5 + $0x78] sm:$0xff] }
  0x33   :  { %450 = vmatpush1.msra.mxu1 %v423_v16  ;;  %809 = vmatpush1.msra.mxu0 %v5680_v22  ;;  %v5722_v36 = vld [vmem:[#allocation7 + $0x28] sm:$0xff]  ;;  %v5728_v38 = vld [vmem:[#allocation7 + $0x20] sm:$0xff]  ;;  %v5734_v40 = vld [vmem:[#allocation7 + $0x18] sm:$0xff] }
  0x34   :  { %451 = vmatprep.subr.mxu1 %v422_v18  ;;  %810 = vmatprep.subr.mxu0 %v5686_v24  ;;  %v413_v37 = vld [vmem:[%s7476_s5 + $0x70] sm:$0xff]  ;;  %v412_v39 = vld [vmem:[%s7476_s5 + $0x68] sm:$0xff]  ;;  %v411_v41 = vld [vmem:[%s7476_s5 + $0x60] sm:$0xff] }
  0x35   :  { %452 = vmatpush1.msra.mxu1 %v421_v20  ;;  %811 = vmatpush1.msra.mxu0 %v5692_v26  ;;  %v5740_v42 = vld [vmem:[#allocation7 + $0x10] sm:$0xff]  ;;  %v5746_v44 = vld [vmem:[#allocation7 + $0x8] sm:$0xff]  ;;  %v5752_v46 = vld [vmem:[#allocation7] sm:$0xff] }
  0x36   :  { %453 = vmatprep.subr.mxu1 %v420_v23  ;;  %812 = vmatprep.subr.mxu0 %v5698_v28  ;;  %v410_v43 = vld [vmem:[%s7476_s5 + $0x58] sm:$0xff]  ;;  %v409_v45 = vld [vmem:[%s7476_s5 + $0x50] sm:$0xff]  ;;  %v408_v47 = vld [vmem:[%s7476_s5 + $0x48] sm:$0xff] }
  0x37   :  { %454 = vmatpush1.msra.mxu1 %v419_v25  ;;  %813 = vmatpush1.msra.mxu0 %v5704_v30  ;;  %v407_v48 = vld [vmem:[%s7476_s5 + $0x40] sm:$0xff]  ;;  %v406_v49 = vld [vmem:[%s7476_s5 + $0x38] sm:$0xff]  ;;  %v405_v50 = vld [vmem:[%s7476_s5 + $0x30] sm:$0xff] }
  0x38   :  { %455 = vmatprep.subr.mxu1 %v418_v27  ;;  %814 = vmatprep.subr.mxu0 %v5710_v32  ;;  %v404_v51 = vld [vmem:[%s7476_s5 + $0x28] sm:$0xff]  ;;  %v403_v52 = vld [vmem:[%s7476_s5 + $0x20] sm:$0xff]  ;;  %v402_v53 = vld [vmem:[%s7476_s5 + $0x18] sm:$0xff]  ;;  %v439_v27 = vsub.s32 1, %v5820_v6 }
  0x39   :  { %456 = vmatpush1.msra.mxu1 %v417_v29  ;;  %815 = vmatpush1.msra.mxu0 %v5716_v34  ;;  %v401_v54 = vld [vmem:[%s7476_s5 + $0x10] sm:$0xff]  ;;  %v400_v55 = vld [vmem:[%s7476_s5 + $0x8] sm:$0xff]  ;;  %v399_v56 = vld [vmem:[%s7476_s5] sm:$0xff] }
  0x3a   :  { %457 = vmatprep.subr.mxu1 %v416_v31  ;;  %816 = vmatprep.subr.mxu0 %v5722_v36  ;;  %v4731_v63 = vld [vmem:[%s7475_s4] ss:$0 sm:$0xff] }
  0x3b   :  { %458 = vmatpush1.msra.mxu1 %v415_v33  ;;  %817 = vmatpush1.msra.mxu0 %v5728_v38  ;;  %v431_v8 = vld [vmem:[%s7478_s7] sm:$0x3] }
  0x3c   :  { %459 = vmatprep.subr.mxu1 %v414_v35  ;;  %818 = vmatprep.subr.mxu0 %v5734_v40  ;;  %v5826_v9 = vrot.slane %v431_v8, %v435_v7  ;;  %v5831_v33 = vrot.slane %v431_v8, %v439_v27 }
  0x3d   :  { %460 = vmatpush1.msra.mxu1 %v413_v37  ;;  %819 = vmatpush1.msra.mxu0 %v5740_v42 }
  0x3e   :  { %461 = vmatprep.subr.mxu1 %v412_v39  ;;  %820 = vmatprep.subr.mxu0 %v5746_v44 }
  0x3f   :  { %462 = vmatpush1.msra.mxu1 %v411_v41  ;;  %821 = vmatpush1.msra.mxu0 %v5752_v46 }
  0x40   :  { %463 = vmatprep.subr.mxu1 %v410_v43  ;;  %855 = vmatmul.mubr.f32.vlgmr.msra.gmra.mxu0 %v7484_v1 }
  0x41   :  { %464 = vmatpush1.msra.mxu1 %v409_v45  ;;  %860 = vmatprep.mubr.f32.mxu0 %v7484_v1 }
  0x42   :  { %465 = vmatprep.subr.mxu1 %v408_v47  ;;  %990 = vmatprep.subr.mxu0 %v5667_v17 }
  0x43   :  { %466 = vmatpush1.msra.mxu1 %v407_v48  ;;  %991 = vmatpush1.msra.mxu0 %v5673_v19 }
  0x44   :  { %467 = vmatprep.subr.mxu1 %v406_v49  ;;  %861 = vmatmul.mubr.f32.gmra.mxu0 %v7484_v1 }
  0x45   :  { %468 = vmatpush1.msra.mxu1 %v405_v50  ;;  %992 = vmatprep.subr.mxu0 %v5678_v21 }
  0x46   :  { %469 = vmatprep.subr.mxu1 %v404_v51  ;;  %993 = vmatpush1.msra.mxu0 %v5680_v22 }
  0x47   :  { %470 = vmatpush1.msra.mxu1 %v403_v52  ;;  %994 = vmatprep.subr.mxu0 %v5686_v24 }
  0x48   :  { %471 = vmatprep.subr.mxu1 %v402_v53  ;;  %995 = vmatpush1.msra.mxu0 %v5692_v26 }
  0x49   :  { %472 = vmatpush1.msra.mxu1 %v401_v54  ;;  %996 = vmatprep.subr.mxu0 %v5698_v28 }
  0x4a   :  { %473 = vmatprep.subr.mxu1 %v400_v55  ;;  %997 = vmatpush1.msra.mxu0 %v5704_v30  ;;  %v5838_v55 = vld [vmem:[%s7472_s1 + $0x8] sm:$0xff] }
  0x4b   :  { %474 = vmatpush1.msra.mxu1 %v399_v56  ;;  %1038 = vmatprep.mubr.f32.mxu0 %v7484_v1  ;;  %vm924_vm5 = vcmp.gt.s32.totalorder %v5838_v55, 0  ;;  %vm1100_vm11 = vcmp.gt.s32.totalorder %v5838_v55, 1  ;;  %vm1285_vm2 = vcmp.gt.s32.totalorder %v5838_v55, 2 }
  0x4c   :  { %998 = vmatprep.subr.mxu0 %v5710_v32 }
  0x4d   :  { %999 = vmatpush1.msra.mxu0 %v5716_v34 }
  0x4e   :  { %1000 = vmatprep.subr.mxu0 %v5722_v36 }
  0x4f   :  { %1001 = vmatpush1.msra.mxu0 %v5728_v38 }
  0x50   :  { %1002 = vmatprep.subr.mxu0 %v5734_v40 }
  0x51   :  { %1003 = vmatpush1.msra.mxu0 %v5740_v42 }
  0x52   :  { %1004 = vmatprep.subr.mxu0 %v5746_v44 }
  0x53   :  { %1005 = vmatpush1.msra.mxu0 %v5752_v46 }
  0x54   :  { %1175 = vmatprep.subr.mxu0 %v5667_v17 }
  0xa4   :  { %v209_v59 = vpop.permute.xlu0 %208 }
  0xa5   :  { %vm303_vm3 = vcmp.eq.s32.totalorder %v5808_v58, %v209_v59 }
  0xa6   :  { %4767 = vmatmul.mubr.msk.f32.vlgmr.msra.gmra.mxu1 %vm303_vm3, %v5535_v60 }
  0xa7   :  { %513 = vmatprep.mubr.f32.mxu1 %v7484_v1 }
  0xa8   :  { %v212_v61 = vpop.permute.xlu0 %211 }
  0xa9   :  { %vm304_vm4 = vcmp.eq.s32.totalorder %v5808_v58, %v212_v61  ;;  %v926_v61 = vsel %vm924_vm5, 1, %v7486_v0 }
  0xaa   :  { %4768 = vmatmul.mubr.msk.f32.gmra.mxu1 %vm304_vm4, %v5535_v60 }
  0xab   :  { %519 = vmatprep.mubr.f32.mxu1 %v7484_v1 }
  0xed   :  { %v4909_v62 = vpop.f32.mrf.mxu0 }
  0xee   :  { %v170_v2 = vadd.f32 %v4909_v62, %v4731_v63  ;;  %v177_v62 = vld [vmem:[%s7471_s0 + $0x10] sm:$0xff] }
  0xef   :  { %v164_v3 = vpop.f32.mrf.mxu0 }
  0xf0   :  { %v165_v5 = vadd.f32 %v4731_v63, %v164_v3  ;;  %v178_v63 = vld [vmem:[%s7471_s0 + $0x18] sm:$0xff] }
  0xf2   :  { %899 = vrot.lane.b32.xlu1 %v165_v5, %s5536_s27 }
 0x100   :  { %v856_v10 = vpop.f32.mrf.mxu0 }
 0x102   :  { %v858_v15 = vpop.f32.mrf.mxu0 }
 0x104   :  { %v862_v23 = vpop.f32.mrf.mxu0 }
 0x106   :  { %v864_v47 = vpop.f32.mrf.mxu0 }
 0x166   :  { %v509_v11 = vpop.f32.mrf.mxu1 }
 0x167   :  { %v510_v12 = vadd.f32 %v509_v11, %v5826_v9 }
 0x168   :  { %v511_v13 = vpop.f32.mrf.mxu1 }
 0x169   :  { %v867_v14 = vadd.f32 %v856_v10, %v510_v12  ;;  %v512_v37 = vadd.f32 %v511_v13, %v5831_v33  ;;  %v900_v10 = vpop.permute.xlu1 %899  ;;  %v929_v12 = vpop.permute.xlu0 %928 }
 0x16a   :  { %v515_v16 = vpop.f32.mrf.mxu1  ;;  %vm933_vm6 = vcmp.eq.s32.totalorder %v929_v12, 1 }
 0x16b   :  { %v871_v18 = vsub.f32 0.0, %v867_v14  ;;  %v516_v20 = vadd.f32 %v515_v16, %v5826_v9  ;;  %v868_v41 = vadd.f32 %v858_v15, %v512_v37 }
 0x16c   :  { %v517_v39 = vpop.f32.mrf.mxu1 }
 0x16d   :  { %v873_v25 = vmul.f32 1.442695, %v871_v18  ;;  %v869_v29 = vadd.f32 %v862_v23, %v516_v20  ;;  %v518_v43 = vadd.f32 %v517_v39, %v5831_v33  ;;  %v885_v3 = vsub.f32 0.0, %v868_v41 }
 0x16f   :  { %5008 = vpow2.f32 %v873_v25  ;;  %v872_v31 = vsub.f32 0.0, %v869_v29  ;;  %v870_v49 = vadd.f32 %v864_v47, %v518_v43  ;;  %v887_v5 = vmul.f32 1.442695, %v885_v3 }
 0x171   :  { %v875_v35 = vmul.f32 1.442695, %v872_v31  ;;  %v886_v7 = vsub.f32 0.0, %v870_v49 }
 0x173   :  { %5010 = vpow2.f32 %v875_v35 }
 0x174   :  { %5012 = vtanh.f32 %v868_v41 }
 0x17c   :  { %v5009_v45 = vpop.eup %5008 }
 0x17d   :  { %v877_v48 = vadd.f32 1.0, %v5009_v45 }
 0x17f   :  { %5014 = vrcp.f32 %v877_v48 }
 0x180   :  { %v5011_v50 = vpop.eup %5010  ;;  %5016 = vtanh.f32 %v870_v49 }
 0x181   :  { %v878_v51 = vadd.f32 1.0, %v5011_v50  ;;  %v5013_v52 = vpop.eup %5012 }
 0x183   :  { %5018 = vrcp.f32 %v878_v51 }
 0x184   :  { %5020 = vpow2.f32 %v887_v5 }
 0x18c   :  { %v5015_v53 = vpop.eup %5014 }
 0x18d   :  { %v907_v54 = vmul.f32 %v5015_v53, %v5013_v52  ;;  %v5017_v56 = vpop.eup %5016  ;;  %v905_v13 = vmul.f32 %v5015_v53, %v900_v10  ;;  %v1101_v52 = vsel %vm1099_vm10, 1, %v7486_v0  ;;  %v1102_v53 = vsel %vm1100_vm11, 1, %v7486_v0 }
 0x18f   :  { %911 = vrot.lane.b32.xlu1 %v907_v54, %s5536_s27 }
 0x190   :  { %v5019_v57 = vpop.eup %5018 }
 0x191   :  { %v908_v59 = vmul.f32 %v5019_v57, %v5017_v56  ;;  %v5021_v8 = vpop.eup %5020 }
 0x192   :  { %v891_v11 = vadd.f32 1.0, %v5021_v8 }
 0x193   :  { %901 = vrot.lane.b32.xlu1 %v170_v2, %s5536_s27  ;;  %913 = vrot.lane.b32.xlu0 %v908_v59, %s5536_s27  ;;  %v889_v2 = vmul.f32 1.442695, %v886_v7 }
 0x195   :  { %5022 = vpow2.f32 %v889_v2 }
 0x196   :  { %5024 = vrcp.f32 %v891_v11 }
 0x197   :  { %931 = vperm.xlu1 %5007, %v926_v61   ;;  %214 = vperm.xlu0 %5006, %v177_v62  }
 0x19b   :  { %217 = vperm.xlu0 %5006, %v178_v63  }
 0x1a2   :  { %v5023_v15 = vpop.eup %5022 }
 0x1a3   :  { %v892_v20 = vadd.f32 1.0, %v5023_v15  ;;  %v5025_v31 = vpop.eup %5024 }
 0x201   :  { %v912_v14 = vpop.permute.xlu1 %911 }
 0x202   :  { %v917_v16 = vadd.f32 %v912_v14, %v905_v13 }
 0x204   :  { %5026 = vtanh.f32 %v917_v16  ;;  %v5852_v18 = vsel %vm933_vm6, %v917_v16, %v900_v10 }
 0x205   :  { %v902_v23 = vpop.permute.xlu1 %901  ;;  %v914_v27 = vpop.permute.xlu0 %913  ;;  %5028 = vrcp.f32 %v892_v20 }
 0x206   :  { %v906_v25 = vmul.f32 %v5019_v57, %v902_v23 }
 0x208   :  { %v918_v29 = vadd.f32 %v914_v27, %v906_v25 }
 0x20a   :  { %5030 = vtanh.f32 %v918_v29 }
 0x211   :  { %v5027_v35 = vpop.eup %5026 }
 0x212   :  { %v932_v37 = vpop.permute.xlu1 %931  ;;  %v921_v39 = vmul.f32 %v5027_v35, %v5025_v31  ;;  %v215_v41 = vpop.permute.xlu0 %214 }
 0x213   :  { %vm934_vm7 = vcmp.eq.s32.totalorder %v932_v37, 1  ;;  %vm305_vm8 = vcmp.eq.s32.totalorder %v5808_v58, %v215_v41  ;;  %v5029_v47 = vpop.eup %5028 }
 0x214   :  { %v5855_v43 = vsel %vm934_vm7, %v918_v29, %v902_v23  ;;  %v5858_v45 = vsel %vm933_vm6, %v921_v39, 0.0  ;;  %4769 = vmatmul.mubr.msk.f32.gmra.mxu1 %vm305_vm8, %v5535_v60  ;;  %vm1470_vm8 = vcmp.gt.s32.totalorder %v5838_v55, 3 }
 0x215   :  { %941 = vrot.lane.b32.xlu1 %v5858_v45, %s5536_s27  ;;  %525 = vmatprep.mubr.f32.mxu1 %v7484_v1 }
 0x216   :  { %v218_v49 = vpop.permute.xlu0 %217 }
 0x217   :  { %v5031_v48 = vpop.eup %5030  ;;  %vm306_vm9 = vcmp.eq.s32.totalorder %v5808_v58, %v218_v49  ;;  %v179_v49 = vld [vmem:[%s7471_s0 + $0x20] sm:$0xff] }
 0x218   :  { %v922_v50 = vmul.f32 %v5031_v48, %v5029_v47  ;;  %4770 = vmatmul.mubr.msk.f32.gmra.mxu1 %vm306_vm9, %v5535_v60 }
 0x219   :  { %531 = vmatprep.mubr.f32.mxu1 %v7484_v1 }
 0x21a   :  { %v5867_v51 = vsel %vm934_vm7, %v922_v50, 0.0  ;;  %v180_v50 = vld [vmem:[%s7471_s0 + $0x28] sm:$0xff]  ;;  %vm1469_vm7 = vcmp.gt.s32.totalorder %v5630_v4, 3  ;;  %v1472_v4 = vsel %vm1470_vm8, 1, %v7486_v0 }
 0x21b   :  { %943 = vrot.lane.b32.xlu1 %v5867_v51, %s5536_s27 }
 0x21f   :  { %1104 = vperm.xlu1 %5007, %v1101_v52  }
 0x223   :  { %1107 = vperm.xlu1 %5007, %v1102_v53  }
 0x287   :  { %v942_v54 = vpop.permute.xlu1 %941 }
 0x288   :  { %947 = vst.msk [vmem:[#allocation3] sm:$0xff] %vm786_vm12, %v942_v54  ;;  %4799 = vmatmul.mubr.msk.f32.vlgmr.msra.gmra.mxu0 %vm786_vm12, %v942_v54 }
 0x289   :  { %1044 = vmatprep.mubr.f32.mxu0 %v7484_v1  ;;  %1176 = vmatpush1.msra.mxu0 %v5673_v19 }
 0x28a   :  { %1177 = vmatprep.subr.mxu0 %v5678_v21 }
 0x28b   :  { %1178 = vmatpush1.msra.mxu0 %v5680_v22 }
 0x28c   :  { %1179 = vmatprep.subr.mxu0 %v5686_v24 }
 0x28d   :  { %v944_v56 = vpop.permute.xlu1 %943  ;;  %1180 = vmatpush1.msra.mxu0 %v5692_v26 }
 0x28e   :  { %948 = vst.msk [vmem:[#allocation3 + $0x8] sm:$0xff] %vm786_vm12, %v944_v56  ;;  %4800 = vmatmul.mubr.msk.f32.gmra.mxu0 %vm786_vm12, %v944_v56  ;;  %1181 = vmatprep.subr.mxu0 %v5698_v28 }
 0x28f   :  { %1182 = vmatpush1.msra.mxu0 %v5704_v30  ;;  %1223 = vmatprep.mubr.f32.mxu0 %v7484_v1 }
 0x290   :  { %1183 = vmatprep.subr.mxu0 %v5710_v32 }
 0x291   :  { %1184 = vmatpush1.msra.mxu0 %v5716_v34 }
 0x292   :  { %1185 = vmatprep.subr.mxu0 %v5722_v36 }
 0x293   :  { %1186 = vmatpush1.msra.mxu0 %v5728_v38 }
 0x294   :  { %1187 = vmatprep.subr.mxu0 %v5734_v40 }
 0x295   :  { %1188 = vmatpush1.msra.mxu0 %v5740_v42 }
 0x296   :  { %1189 = vmatprep.subr.mxu0 %v5746_v44 }
 0x297   :  { %1190 = vmatpush1.msra.mxu0 %v5752_v46 }
 0x298   :  { %1360 = vmatprep.subr.mxu0 %v5667_v17 }
 0x2d4   :  { %v521_v57 = vpop.f32.mrf.mxu1 }
 0x2d5   :  { %v522_v61 = vadd.f32 %v521_v57, %v5826_v9 }
 0x2d6   :  { %v523_v59 = vpop.f32.mrf.mxu1 }
 0x2d7   :  { %v524_v17 = vadd.f32 %v523_v59, %v5831_v33 }
 0x2d8   :  { %v527_v3 = vpop.f32.mrf.mxu1 }
 0x2d9   :  { %v528_v2 = vadd.f32 %v527_v3, %v5826_v9 }
 0x2da   :  { %v529_v15 = vpop.f32.mrf.mxu1 }
 0x2db   :  { %v530_v25 = vadd.f32 %v529_v15, %v5831_v33 }
 0x348   :  { %v1040_v62 = vpop.f32.mrf.mxu0 }
 0x349   :  { %v1051_v63 = vadd.f32 %v1040_v62, %v522_v61  ;;  %v1105_v61 = vpop.permute.xlu1 %1104 }
 0x34a   :  { %v1042_v7 = vpop.f32.mrf.mxu0  ;;  %vm1109_vm13 = vcmp.eq.s32.totalorder %v1105_v61, 1 }
 0x34b   :  { %v1055_v5 = vsub.f32 0.0, %v1051_v63  ;;  %v1052_v14 = vadd.f32 %v1042_v7, %v524_v17 }
 0x34d   :  { %v1057_v8 = vmul.f32 1.442695, %v1055_v5  ;;  %v1069_v52 = vsub.f32 0.0, %v1052_v14 }
 0x34e   :  { %v1046_v10 = vpop.f32.mrf.mxu0 }
 0x34f   :  { %5032 = vpow2.f32 %v1057_v8  ;;  %v1053_v11 = vadd.f32 %v1046_v10, %v528_v2  ;;  %v1071_v53 = vmul.f32 1.442695, %v1069_v52  ;;  %v1108_v8 = vpop.permute.xlu1 %1107 }
 0x350   :  { %v1048_v23 = vpop.f32.mrf.mxu0  ;;  %vm1110_vm14 = vcmp.eq.s32.totalorder %v1108_v8, 1 }
 0x351   :  { %v1056_v12 = vsub.f32 0.0, %v1053_v11  ;;  %v1054_v27 = vadd.f32 %v1048_v23, %v530_v25 }
 0x353   :  { %v1059_v13 = vmul.f32 1.442695, %v1056_v12  ;;  %v1070_v54 = vsub.f32 0.0, %v1054_v27 }
 0x355   :  { %5034 = vpow2.f32 %v1059_v13  ;;  %v1073_v56 = vmul.f32 1.442695, %v1070_v54 }
 0x356   :  { %5036 = vtanh.f32 %v1052_v14 }
 0x35c   :  { %v5033_v16 = vpop.eup %5032 }
 0x35d   :  { %v1061_v20 = vadd.f32 1.0, %v5033_v16 }
 0x35f   :  { %5038 = vrcp.f32 %v1061_v20 }
 0x360   :  { %5040 = vtanh.f32 %v1054_v27 }
 0x362   :  { %v5035_v29 = vpop.eup %5034 }
 0x363   :  { %v1062_v31 = vadd.f32 1.0, %v5035_v29  ;;  %v5037_v35 = vpop.eup %5036 }
 0x365   :  { %5042 = vrcp.f32 %v1062_v31  ;;  %v1286_v31 = vsel %vm1284_vm1, 1, %v7486_v0 }
 0x366   :  { %5044 = vpow2.f32 %v1071_v53 }
 0x367   :  { %5046 = vpow2.f32 %v1073_v56 }
 0x36c   :  { %v5039_v37 = vpop.eup %5038 }
 0x36d   :  { %v1083_v39 = vmul.f32 %v5039_v37, %v5037_v35  ;;  %v5041_v41 = vpop.eup %5040  ;;  %v1081_v62 = vmul.f32 %v5039_v37, %v5852_v18  ;;  %v1287_v35 = vsel %vm1285_vm2, 1, %v7486_v0 }
 0x36f   :  { %1087 = vrot.lane.b32.xlu0 %v1083_v39, %s5536_s27 }
 0x372   :  { %v5043_v47 = vpop.eup %5042 }
 0x373   :  { %v1084_v48 = vmul.f32 %v5043_v47, %v5041_v41  ;;  %v5045_v57 = vpop.eup %5044  ;;  %v1082_v10 = vmul.f32 %v5043_v47, %v5855_v43 }
 0x374   :  { %v1075_v59 = vadd.f32 1.0, %v5045_v57  ;;  %v5047_v3 = vpop.eup %5046 }
 0x375   :  { %1089 = vrot.lane.b32.xlu0 %v1084_v48, %s5536_s27  ;;  %v1076_v2 = vadd.f32 1.0, %v5047_v3 }
 0x376   :  { %5048 = vrcp.f32 %v1075_v59 }
 0x379   :  { %220 = vperm.xlu0 %5006, %v179_v49  }
 0x37d   :  { %223 = vperm.xlu0 %5006, %v180_v50  }
 0x383   :  { %v5049_v17 = vpop.eup %5048 }
 0x3e1   :  { %v1088_v63 = vpop.permute.xlu0 %1087 }
 0x3e2   :  { %v1093_v5 = vadd.f32 %v1088_v63, %v1081_v62 }
 0x3e4   :  { %5050 = vtanh.f32 %v1093_v5  ;;  %v5912_v7 = vsel %vm1109_vm13, %v1093_v5, %v5852_v18 }
 0x3e5   :  { %5052 = vrcp.f32 %v1076_v2 }
 0x3e7   :  { %v1090_v11 = vpop.permute.xlu0 %1089 }
 0x3e8   :  { %v1094_v12 = vadd.f32 %v1090_v11, %v1082_v10  ;;  %v181_v11 = vld [vmem:[%s7471_s0 + $0x30] sm:$0xff] }
 0x3ea   :  { %5054 = vtanh.f32 %v1094_v12  ;;  %v5917_v13 = vsel %vm1110_vm14, %v1094_v12, %v5855_v43  ;;  %v182_v12 = vld [vmem:[%s7471_s0 + $0x38] sm:$0xff] }
 0x3f1   :  { %v5051_v14 = vpop.eup %5050 }
 0x3f2   :  { %v1097_v15 = vmul.f32 %v5051_v14, %v5049_v17  ;;  %v5053_v23 = vpop.eup %5052 }
 0x3f4   :  { %v221_v16 = vpop.permute.xlu0 %220  ;;  %v5921_v18 = vsel %vm1109_vm13, %v1097_v15, %v5858_v45  ;;  %v5924_v20 = vsel %vm1109_vm13, %v1097_v15, 0.0 }
 0x3f5   :  { %7491 = vst [vmem:[#allocation19_spill] sm:$0xff] %v5924_v20  ;;  %vm307_vm15 = vcmp.eq.s32.totalorder %v5808_v58, %v221_v16  ;;  %1151 = vrot.lane.b32.xlu1 %v5921_v18, %s5536_s27 }
 0x3f6   :  { %4771 = vmatmul.mubr.msk.f32.gmra.mxu1 %vm307_vm15, %v5535_v60  ;;  %vm1655_vm15 = vcmp.gt.s32.totalorder %v5838_v55, 4 }
 0x3f7   :  { %v5055_v43 = vpop.eup %5054  ;;  %537 = vmatprep.mubr.f32.mxu1 %v7484_v1 }
 0x3f8   :  { %v224_v25 = vpop.permute.xlu0 %223  ;;  %v1098_v27 = vmul.f32 %v5055_v43, %v5053_v23 }
 0x3f9   :  { %vm308_vm0 = vcmp.eq.s32.totalorder %v5808_v58, %v224_v25 }
 0x3fa   :  { %4772 = vmatmul.mubr.msk.f32.gmra.mxu1 %vm308_vm0, %v5535_v60  ;;  %v5936_v45 = vsel %vm1110_vm14, %v1098_v27, %v5867_v51  ;;  %v5939_v29 = vsel %vm1110_vm14, %v1098_v27, 0.0 }
 0x3fb   :  { %7492 = vst [vmem:[#allocation20_spill] sm:$0xff] %v5939_v29  ;;  %1153 = vrot.lane.b32.xlu1 %v5936_v45, %s5536_s27  ;;  %543 = vmatprep.mubr.f32.mxu1 %v7484_v1 }
 0x3ff   :  { %1289 = vperm.xlu1 %5007, %v1286_v31  }
 0x403   :  { %1292 = vperm.xlu1 %5007, %v1287_v35  }
 0x467   :  { %v1152_v37 = vpop.permute.xlu1 %1151 }
 0x468   :  { %4801 = vmatmul.mubr.msk.f32.vlgmr.msra.gmra.mxu0 %vm786_vm12, %v1152_v37 }
 0x469   :  { %1229 = vmatprep.mubr.f32.mxu0 %v7484_v1  ;;  %1361 = vmatpush1.msra.mxu0 %v5673_v19 }
 0x46a   :  { %1362 = vmatprep.subr.mxu0 %v5678_v21 }
 0x46b   :  { %1363 = vmatpush1.msra.mxu0 %v5680_v22 }
 0x46c   :  { %1364 = vmatprep.subr.mxu0 %v5686_v24 }
 0x46d   :  { %v1154_v51 = vpop.permute.xlu1 %1153  ;;  %1365 = vmatpush1.msra.mxu0 %v5692_v26 }
 0x46e   :  { %4802 = vmatmul.mubr.msk.f32.gmra.mxu0 %vm786_vm12, %v1154_v51  ;;  %1366 = vmatprep.subr.mxu0 %v5698_v28 }
 0x46f   :  { %1367 = vmatpush1.msra.mxu0 %v5704_v30  ;;  %1408 = vmatprep.mubr.f32.mxu0 %v7484_v1 }
 0x470   :  { %1368 = vmatprep.subr.mxu0 %v5710_v32 }
 0x471   :  { %1369 = vmatpush1.msra.mxu0 %v5716_v34 }
 0x472   :  { %1370 = vmatprep.subr.mxu0 %v5722_v36 }
 0x473   :  { %1371 = vmatpush1.msra.mxu0 %v5728_v38 }
 0x474   :  { %1372 = vmatprep.subr.mxu0 %v5734_v40 }
 0x475   :  { %1373 = vmatpush1.msra.mxu0 %v5740_v42 }
 0x476   :  { %1374 = vmatprep.subr.mxu0 %v5746_v44 }
 0x477   :  { %1375 = vmatpush1.msra.mxu0 %v5752_v46 }
 0x47a   :  { %v1290_v25 = vpop.permute.xlu1 %1289 }
 0x47b   :  { %vm1294_vm3 = vcmp.eq.s32.totalorder %v1290_v25, 1 }
 0x4b6   :  { %v533_v19 = vpop.f32.mrf.mxu1 }
 0x4b7   :  { %v534_v22 = vadd.f32 %v533_v19, %v5826_v9 }
 0x4b8   :  { %v535_v21 = vpop.f32.mrf.mxu1 }
 0x4b9   :  { %v536_v49 = vadd.f32 %v535_v21, %v5831_v33  ;;  %v1293_v21 = vpop.permute.xlu1 %1292 }
 0x4ba   :  { %v539_v28 = vpop.f32.mrf.mxu1  ;;  %vm1295_vm4 = vcmp.eq.s32.totalorder %v1293_v21, 1 }
 0x4bb   :  { %v540_v34 = vadd.f32 %v539_v28, %v5826_v9 }
 0x4bc   :  { %v541_v52 = vpop.f32.mrf.mxu1 }
 0x4bd   :  { %v542_v57 = vadd.f32 %v541_v52, %v5831_v33 }
 0x528   :  { %v1225_v24 = vpop.f32.mrf.mxu0 }
 0x529   :  { %v1236_v26 = vadd.f32 %v1225_v24, %v534_v22 }
 0x52a   :  { %v1227_v32 = vpop.f32.mrf.mxu0 }
 0x52b   :  { %v1240_v30 = vsub.f32 0.0, %v1236_v26  ;;  %v1237_v50 = vadd.f32 %v1227_v32, %v536_v49 }
 0x52d   :  { %v1242_v36 = vmul.f32 1.442695, %v1240_v30  ;;  %v1254_v17 = vsub.f32 0.0, %v1237_v50 }
 0x52e   :  { %v1231_v39 = vpop.f32.mrf.mxu0 }
 0x52f   :  { %5056 = vpow2.f32 %v1242_v36  ;;  %v1238_v41 = vadd.f32 %v1231_v39, %v540_v34  ;;  %v1256_v14 = vmul.f32 1.442695, %v1254_v17 }
 0x530   :  { %v1233_v56 = vpop.f32.mrf.mxu0 }
 0x531   :  { %v1241_v47 = vsub.f32 0.0, %v1238_v41  ;;  %v1239_v59 = vadd.f32 %v1233_v56, %v542_v57 }
 0x533   :  { %v1244_v48 = vmul.f32 1.442695, %v1241_v47  ;;  %v1255_v15 = vsub.f32 0.0, %v1239_v59 }
 0x535   :  { %5058 = vpow2.f32 %v1244_v48  ;;  %v1258_v16 = vmul.f32 1.442695, %v1255_v15 }
 0x536   :  { %5060 = vtanh.f32 %v1237_v50  ;;  %v1471_v50 = vsel %vm1469_vm7, 1, %v7486_v0 }
 0x53c   :  { %v5057_v53 = vpop.eup %5056 }
 0x53d   :  { %v1246_v54 = vadd.f32 1.0, %v5057_v53 }
 0x53f   :  { %5062 = vrcp.f32 %v1246_v54 }
 0x540   :  { %5064 = vtanh.f32 %v1239_v59 }
 0x542   :  { %v5059_v61 = vpop.eup %5058 }
 0x543   :  { %v1247_v62 = vadd.f32 1.0, %v5059_v61  ;;  %v5061_v63 = vpop.eup %5060 }
 0x545   :  { %5066 = vrcp.f32 %v1247_v62 }
 0x546   :  { %5068 = vpow2.f32 %v1256_v14 }
 0x547   :  { %5070 = vpow2.f32 %v1258_v16 }
 0x54c   :  { %v5063_v3 = vpop.eup %5062 }
 0x54d   :  { %v1268_v5 = vmul.f32 %v5063_v3, %v5061_v63  ;;  %v5065_v2 = vpop.eup %5064  ;;  %v1266_v27 = vmul.f32 %v5063_v3, %v5912_v7 }
 0x54f   :  { %1272 = vrot.lane.b32.xlu0 %v1268_v5, %s5536_s27 }
 0x552   :  { %v5067_v8 = vpop.eup %5066 }
 0x553   :  { %v1269_v10 = vmul.f32 %v5067_v8, %v5065_v2  ;;  %v5069_v23 = vpop.eup %5068  ;;  %v1267_v22 = vmul.f32 %v5067_v8, %v5917_v13 }
 0x554   :  { %v1260_v43 = vadd.f32 1.0, %v5069_v23  ;;  %v5071_v35 = vpop.eup %5070 }
 0x555   :  { %1274 = vrot.lane.b32.xlu0 %v1269_v10, %s5536_s27  ;;  %v1261_v19 = vadd.f32 1.0, %v5071_v35 }
 0x556   :  { %5072 = vrcp.f32 %v1260_v43 }
 0x559   :  { %226 = vperm.xlu0 %5006, %v181_v11  }
 0x55d   :  { %229 = vperm.xlu0 %5006, %v182_v12  }
 0x563   :  { %v5073_v30 = vpop.eup %5072 }
 0x5c1   :  { %v1273_v31 = vpop.permute.xlu0 %1272 }
 0x5c2   :  { %v1278_v37 = vadd.f32 %v1273_v31, %v1266_v27 }
 0x5c4   :  { %5074 = vtanh.f32 %v1278_v37  ;;  %v5981_v51 = vsel %vm1294_vm3, %v1278_v37, %v5912_v7 }
 0x5c5   :  { %5076 = vrcp.f32 %v1261_v19 }
 0x5c7   :  { %v1275_v24 = vpop.permute.xlu0 %1274 }
 0x5c8   :  { %v1279_v26 = vadd.f32 %v1275_v24, %v1267_v22 }
 0x5ca   :  { %5078 = vtanh.f32 %v1279_v26  ;;  %v5986_v28 = vsel %vm1295_vm4, %v1279_v26, %v5917_v13  ;;  %v183_v26 = vld [vmem:[%s7471_s0 + $0x40] sm:$0xff] }
 0x5d1   :  { %v5075_v32 = vpop.eup %5074 }
 0x5d2   :  { %v1282_v34 = vmul.f32 %v5075_v32, %v5073_v30  ;;  %v5077_v41 = vpop.eup %5076  ;;  %v184_v30 = vld [vmem:[%s7471_s0 + $0x48] sm:$0xff]  ;;  %v6032_v32 = vld [vmem:[#allocation7 + $0x78] sm:$0xff] }
 0x5d3   :  { %1545 = vmatprep.subr.mxu0 %v6032_v32 }
 0x5d4   :  { %v227_v36 = vpop.permute.xlu0 %226  ;;  %v5990_v7 = vsel %vm1294_vm3, %v1282_v34, %v5921_v18  ;;  %v5993_v39 = vsel %vm1294_vm3, %v1282_v34, 0.0  ;;  %v6034_v34 = vld [vmem:[#allocation7 + $0x70] sm:$0xff] }
 0x5d5   :  { %vm309_vm5 = vcmp.eq.s32.totalorder %v5808_v58, %v227_v36  ;;  %1336 = vrot.lane.b32.xlu1 %v5990_v7, %s5536_s27  ;;  %v6036_v36 = vld [vmem:[#allocation7 + $0x68] sm:$0xff] }
 0x5d6   :  { %4773 = vmatmul.mubr.msk.f32.gmra.mxu1 %vm309_vm5, %v5535_v60 }
 0x5d7   :  { %v5079_v13 = vpop.eup %5078  ;;  %549 = vmatprep.mubr.f32.mxu1 %v7484_v1 }
 0x5d8   :  { %v230_v47 = vpop.permute.xlu0 %229  ;;  %v1283_v48 = vmul.f32 %v5079_v13, %v5077_v41  ;;  %v6039_v41 = vld [vmem:[#allocation7 + $0x60] sm:$0xff]  ;;  %v6042_v13 = vld [vmem:[#allocation7 + $0x58] sm:$0xff] }
 0x5d9   :  { %vm310_vm6 = vcmp.eq.s32.totalorder %v5808_v58, %v230_v47  ;;  %v6045_v47 = vld [vmem:[#allocation7 + $0x50] sm:$0xff] }
 0x5da   :  { %4774 = vmatmul.mubr.msk.f32.gmra.mxu1 %vm310_vm6, %v5535_v60  ;;  %v6005_v18 = vsel %vm1295_vm4, %v1283_v48, %v5936_v45  ;;  %v6008_v49 = vsel %vm1295_vm4, %v1283_v48, 0.0  ;;  %v6048_v48 = vld [vmem:[#allocation7 + $0x48] sm:$0xff] }
 0x5db   :  { %7493 = vst [vmem:[#allocation21_spill] sm:$0xff] %v6008_v49  ;;  %1338 = vrot.lane.b32.xlu1 %v6005_v18, %s5536_s27  ;;  %555 = vmatprep.mubr.f32.mxu1 %v7484_v1 }
 0x5df   :  { %1474 = vperm.xlu1 %5007, %v1471_v50   ;;  %v6051_v50 = vld [vmem:[#allocation7 + $0x40] sm:$0xff] }
 0x5e3   :  { %1477 = vperm.xlu1 %5007, %v1472_v4   ;;  %v6054_v4 = vld [vmem:[#allocation7 + $0x38] sm:$0xff] }
 0x647   :  { %v1337_v52 = vpop.permute.xlu1 %1336 }
 0x648   :  { %4803 = vmatmul.mubr.msk.f32.vlgmr.msra.gmra.mxu0 %vm786_vm12, %v1337_v52  ;;  %v6057_v52 = vld [vmem:[#allocation7 + $0x30] sm:$0xff] }
 0x649   :  { %1414 = vmatprep.mubr.f32.mxu0 %v7484_v1  ;;  %1546 = vmatpush1.msra.mxu0 %v6034_v34 }
 0x64a   :  { %1547 = vmatprep.subr.mxu0 %v6036_v36 }
 0x64b   :  { %1548 = vmatpush1.msra.mxu0 %v6039_v41 }
 0x64c   :  { %1549 = vmatprep.subr.mxu0 %v6042_v13 }
 0x64d   :  { %v1339_v45 = vpop.permute.xlu1 %1338  ;;  %1550 = vmatpush1.msra.mxu0 %v6045_v47 }
 0x64e   :  { %4804 = vmatmul.mubr.msk.f32.gmra.mxu0 %vm786_vm12, %v1339_v45  ;;  %1551 = vmatprep.subr.mxu0 %v6048_v48  ;;  %v6060_v45 = vld [vmem:[#allocation7 + $0x28] sm:$0xff] }
 0x64f   :  { %1593 = vmatprep.mubr.f32.mxu0 %v7484_v1  ;;  %1552 = vmatpush1.msra.mxu0 %v6051_v50 }
 0x650   :  { %1553 = vmatprep.subr.mxu0 %v6054_v4 }
 0x651   :  { %1554 = vmatpush1.msra.mxu0 %v6057_v52 }
 0x652   :  { %1555 = vmatprep.subr.mxu0 %v6060_v45 }
 0x653   :  { %1556 = vmatpush1.msra.mxu0 %v5728_v38 }
 0x654   :  { %1557 = vmatprep.subr.mxu0 %v5734_v40 }
 0x655   :  { %1558 = vmatpush1.msra.mxu0 %v5740_v42 }
 0x656   :  { %1559 = vmatprep.subr.mxu0 %v5746_v44 }
 0x657   :  { %1560 = vmatpush1.msra.mxu0 %v5752_v46 }
 0x658   :  { %1730 = vmatprep.subr.mxu0 %v6032_v32 }
 0x696   :  { %v545_v53 = vpop.f32.mrf.mxu1 }
 0x697   :  { %v546_v56 = vadd.f32 %v545_v53, %v5826_v9 }
 0x698   :  { %v547_v54 = vpop.f32.mrf.mxu1 }
 0x699   :  { %v548_v12 = vadd.f32 %v547_v54, %v5831_v33 }
 0x69a   :  { %v551_v61 = vpop.f32.mrf.mxu1 }
 0x69b   :  { %v552_v3 = vadd.f32 %v551_v61, %v5826_v9 }
 0x69c   :  { %v553_v14 = vpop.f32.mrf.mxu1 }
 0x69d   :  { %v554_v43 = vadd.f32 %v553_v14, %v5831_v33 }
 0x708   :  { %v1410_v57 = vpop.f32.mrf.mxu0 }
 0x709   :  { %v1421_v59 = vadd.f32 %v1410_v57, %v546_v56 }
 0x70a   :  { %v1412_v63 = vpop.f32.mrf.mxu0 }
 0x70b   :  { %v1425_v62 = vsub.f32 0.0, %v1421_v59  ;;  %v1422_v17 = vadd.f32 %v1412_v63, %v548_v12 }
 0x70d   :  { %v1427_v5 = vmul.f32 1.442695, %v1425_v62  ;;  %v1439_v53 = vsub.f32 0.0, %v1422_v17  ;;  %v1475_v62 = vpop.permute.xlu1 %1474 }
 0x70e   :  { %v1416_v2 = vpop.f32.mrf.mxu0  ;;  %vm1479_vm9 = vcmp.eq.s32.totalorder %v1475_v62, 1 }
 0x70f   :  { %5080 = vpow2.f32 %v1427_v5  ;;  %v1423_v8 = vadd.f32 %v1416_v2, %v552_v3  ;;  %v1441_v54 = vmul.f32 1.442695, %v1439_v53 }
 0x710   :  { %v1418_v23 = vpop.f32.mrf.mxu0 }
 0x711   :  { %v1426_v10 = vsub.f32 0.0, %v1423_v8  ;;  %v1424_v25 = vadd.f32 %v1418_v23, %v554_v43  ;;  %v1478_v3 = vpop.permute.xlu1 %1477 }
 0x712   :  { %vm1480_vm10 = vcmp.eq.s32.totalorder %v1478_v3, 1 }
 0x713   :  { %v1429_v11 = vmul.f32 1.442695, %v1426_v10  ;;  %v1440_v56 = vsub.f32 0.0, %v1424_v25 }
 0x715   :  { %5082 = vpow2.f32 %v1429_v11  ;;  %v1443_v57 = vmul.f32 1.442695, %v1440_v56 }
 0x716   :  { %5084 = vtanh.f32 %v1422_v17 }
 0x71c   :  { %v5081_v15 = vpop.eup %5080 }
 0x71d   :  { %v1431_v16 = vadd.f32 1.0, %v5081_v15 }
 0x71f   :  { %5086 = vrcp.f32 %v1431_v16 }
 0x720   :  { %5088 = vtanh.f32 %v1424_v25 }
 0x722   :  { %v5083_v27 = vpop.eup %5082 }
 0x723   :  { %v1432_v31 = vadd.f32 1.0, %v5083_v27  ;;  %v5085_v35 = vpop.eup %5084 }
 0x725   :  { %5090 = vrcp.f32 %v1432_v31 }
 0x726   :  { %5092 = vpow2.f32 %v1441_v54 }
 0x727   :  { %5094 = vpow2.f32 %v1443_v57 }
 0x72c   :  { %v5087_v37 = vpop.eup %5086 }
 0x72d   :  { %v1453_v19 = vmul.f32 %v5087_v37, %v5085_v35  ;;  %v5089_v21 = vpop.eup %5088  ;;  %v1451_v38 = vmul.f32 %v5087_v37, %v5981_v51  ;;  %v1657_v35 = vsel %vm1655_vm15, 1, %v7486_v0 }
 0x72f   :  { %1457 = vrot.lane.b32.xlu0 %v1453_v19, %s5536_s27 }
 0x732   :  { %v5091_v22 = vpop.eup %5090 }
 0x733   :  { %v1454_v24 = vmul.f32 %v5091_v22, %v5089_v21  ;;  %v5093_v59 = vpop.eup %5092  ;;  %v1452_v5 = vmul.f32 %v5091_v22, %v5986_v28 }
 0x734   :  { %v1445_v61 = vadd.f32 1.0, %v5093_v59  ;;  %v5095_v63 = vpop.eup %5094 }
 0x735   :  { %1459 = vrot.lane.b32.xlu0 %v1454_v24, %s5536_s27  ;;  %v1446_v46 = vadd.f32 1.0, %v5095_v63 }
 0x736   :  { %5096 = vrcp.f32 %v1445_v61 }
 0x739   :  { %232 = vperm.xlu0 %5006, %v183_v26  }
 0x73d   :  { %235 = vperm.xlu0 %5006, %v184_v30  }
 0x743   :  { %v5097_v11 = vpop.eup %5096 }
 0x7a1   :  { %v1458_v40 = vpop.permute.xlu0 %1457 }
 0x7a2   :  { %v1463_v42 = vadd.f32 %v1458_v40, %v1451_v38 }
 0x7a4   :  { %5098 = vtanh.f32 %v1463_v42  ;;  %v6074_v44 = vsel %vm1479_vm9, %v1463_v42, %v5981_v51 }
 0x7a5   :  { %5100 = vrcp.f32 %v1446_v46 }
 0x7a7   :  { %v1460_v2 = vpop.permute.xlu0 %1459 }
 0x7a8   :  { %v1464_v8 = vadd.f32 %v1460_v2, %v1452_v5 }
 0x7aa   :  { %5102 = vtanh.f32 %v1464_v8  ;;  %v6079_v10 = vsel %vm1480_vm10, %v1464_v8, %v5986_v28 }
 0x7b1   :  { %v5099_v12 = vpop.eup %5098 }
 0x7b2   :  { %v1467_v17 = vmul.f32 %v5099_v12, %v5097_v11  ;;  %v5101_v16 = vpop.eup %5100 }
 0x7b4   :  { %v233_v14 = vpop.permute.xlu0 %232  ;;  %v6083_v51 = vsel %vm1479_vm9, %v1467_v17, %v5990_v7  ;;  %v6086_v15 = vsel %vm1479_vm9, %v1467_v17, 0.0  ;;  %v6097_v7 = vld [vmem:[%s7472_s1] sm:$0xff] }
 0x7b5   :  { %7494 = vst [vmem:[#allocation22_spill] sm:$0xff] %v6086_v15  ;;  %vm311_vm11 = vcmp.eq.s32.totalorder %v5808_v58, %v233_v14  ;;  %1521 = vrot.lane.b32.xlu1 %v6083_v51, %s5536_s27  ;;  %vm1654_vm14 = vcmp.gt.s32.totalorder %v6097_v7, 4  ;;  %vm1839_vm4 = vcmp.gt.s32.totalorder %v6097_v7, 5 }
 0x7b6   :  { %4775 = vmatmul.mubr.msk.f32.gmra.mxu1 %vm311_vm11, %v5535_v60  ;;  %v1656_v31 = vsel %vm1654_vm14, 1, %v7486_v0 }
 0x7b7   :  { %v5103_v28 = vpop.eup %5102  ;;  %561 = vmatprep.mubr.f32.mxu1 %v7484_v1 }
 0x7b8   :  { %v236_v23 = vpop.permute.xlu0 %235  ;;  %v1468_v43 = vmul.f32 %v5103_v28, %v5101_v16 }
 0x7b9   :  { %vm312_vm13 = vcmp.eq.s32.totalorder %v5808_v58, %v236_v23 }
 0x7ba   :  { %4776 = vmatmul.mubr.msk.f32.gmra.mxu1 %vm312_vm13, %v5535_v60  ;;  %v6103_v25 = vsel %vm1480_vm10, %v1468_v43, %v6005_v18  ;;  %v6106_v27 = vsel %vm1480_vm10, %v1468_v43, 0.0  ;;  %v185_v43 = vld [vmem:[%s7471_s0 + $0x50] sm:$0xff]  ;;  %vm2024_vm10 = vcmp.gt.s32.totalorder %v6097_v7, 6 }
 0x7bb   :  { %7495 = vst [vmem:[#allocation23_spill] sm:$0xff] %v6106_v27  ;;  %1523 = vrot.lane.b32.xlu1 %v6103_v25, %s5536_s27  ;;  %567 = vmatprep.mubr.f32.mxu1 %v7484_v1 }
 0x7bf   :  { %1659 = vperm.xlu1 %5007, %v1656_v31   ;;  %v186_v31 = vld [vmem:[%s7471_s0 + $0x58] sm:$0xff] }
 0x7c3   :  { %1662 = vperm.xlu1 %5007, %v1657_v35   ;;  %v6140_v35 = vld [vmem:[#allocation7 + $0x20] sm:$0xff] }
 0x827   :  { %v1522_v37 = vpop.permute.xlu1 %1521 }
 0x828   :  { %4805 = vmatmul.mubr.msk.f32.vlgmr.msra.gmra.mxu0 %vm786_vm12, %v1522_v37  ;;  %v6142_v37 = vld [vmem:[#allocation7 + $0x18] sm:$0xff] }
 0x829   :  { %1599 = vmatprep.mubr.f32.mxu0 %v7484_v1  ;;  %1731 = vmatpush1.msra.mxu0 %v6034_v34 }
 0x82a   :  { %1732 = vmatprep.subr.mxu0 %v6036_v36 }
 0x82b   :  { %1733 = vmatpush1.msra.mxu0 %v6039_v41 }
 0x82c   :  { %1734 = vmatprep.subr.mxu0 %v6042_v13 }
 0x82d   :  { %v1524_v18 = vpop.permute.xlu1 %1523  ;;  %1735 = vmatpush1.msra.mxu0 %v6045_v47 }
 0x82e   :  { %4806 = vmatmul.mubr.msk.f32.gmra.mxu0 %vm786_vm12, %v1524_v18  ;;  %1736 = vmatprep.subr.mxu0 %v6048_v48  ;;  %v6144_v18 = vld [vmem:[#allocation7 + $0x10] sm:$0xff] }
 0x82f   :  { %1737 = vmatpush1.msra.mxu0 %v6051_v50  ;;  %1778 = vmatprep.mubr.f32.mxu0 %v7484_v1 }
 0x830   :  { %1738 = vmatprep.subr.mxu0 %v6054_v4 }
 0x831   :  { %1739 = vmatpush1.msra.mxu0 %v6057_v52 }
 0x832   :  { %1740 = vmatprep.subr.mxu0 %v6060_v45 }
 0x833   :  { %1741 = vmatpush1.msra.mxu0 %v6140_v35 }
 0x834   :  { %1742 = vmatprep.subr.mxu0 %v6142_v37 }
 0x835   :  { %1743 = vmatpush1.msra.mxu0 %v6144_v18 }
 0x876   :  { %v557_v55 = vpop.f32.mrf.mxu1 }
 0x877   :  { %v558_v21 = vadd.f32 %v557_v55, %v5826_v9  ;;  %v6147_v55 = vld [vmem:[#allocation7 + $0x8] sm:$0xff] }
 0x878   :  { %v559_v19 = vpop.f32.mrf.mxu1  ;;  %1744 = vmatprep.subr.mxu0 %v6147_v55 }
 0x879   :  { %v560_v38 = vadd.f32 %v559_v19, %v5831_v33  ;;  %v6150_v19 = vld [vmem:[#allocation7] sm:$0xff] }
 0x87a   :  { %v563_v26 = vpop.f32.mrf.mxu1  ;;  %1745 = vmatpush1.msra.mxu0 %v6150_v19 }
 0x87b   :  { %v564_v54 = vadd.f32 %v563_v26, %v5826_v9  ;;  %1915 = vmatprep.subr.mxu0 %v6032_v32 }
 0x87c   :  { %v565_v63 = vpop.f32.mrf.mxu1 }
 0x87d   :  { %v566_v5 = vadd.f32 %v565_v63, %v5831_v33 }
 0x8e8   :  { %v1595_v22 = vpop.f32.mrf.mxu0 }
 0x8e9   :  { %v1606_v24 = vadd.f32 %v1595_v22, %v558_v21 }
 0x8ea   :  { %v1597_v53 = vpop.f32.mrf.mxu0 }
 0x8eb   :  { %v1610_v30 = vsub.f32 0.0, %v1606_v24  ;;  %v1607_v40 = vadd.f32 %v1597_v53, %v560_v38 }
 0x8ed   :  { %v1612_v56 = vmul.f32 1.442695, %v1610_v30  ;;  %v1624_v21 = vsub.f32 0.0, %v1607_v40 }
 0x8ee   :  { %v1601_v57 = vpop.f32.mrf.mxu0 }
 0x8ef   :  { %5104 = vpow2.f32 %v1612_v56  ;;  %v1608_v59 = vadd.f32 %v1601_v57, %v564_v54  ;;  %v1626_v22 = vmul.f32 1.442695, %v1624_v21  ;;  %v1660_v54 = vpop.permute.xlu1 %1659 }
 0x8f0   :  { %v1603_v3 = vpop.f32.mrf.mxu0  ;;  %vm1664_vm0 = vcmp.eq.s32.totalorder %v1660_v54, 1 }
 0x8f1   :  { %v1611_v61 = vsub.f32 0.0, %v1608_v59  ;;  %v1609_v2 = vadd.f32 %v1603_v3, %v566_v5 }
 0x8f3   :  { %v1614_v62 = vmul.f32 1.442695, %v1611_v61  ;;  %v1625_v24 = vsub.f32 0.0, %v1609_v2 }
 0x8f5   :  { %5106 = vpow2.f32 %v1614_v62  ;;  %v1628_v26 = vmul.f32 1.442695, %v1625_v24 }
 0x8f6   :  { %5108 = vtanh.f32 %v1607_v40  ;;  %v1663_v40 = vpop.permute.xlu1 %1662 }
 0x8f7   :  { %vm1665_vm1 = vcmp.eq.s32.totalorder %v1663_v40, 1 }
 0x8fc   :  { %v5105_v42 = vpop.eup %5104 }
 0x8fd   :  { %v1616_v46 = vadd.f32 1.0, %v5105_v42 }
 0x8ff   :  { %5110 = vrcp.f32 %v1616_v46 }
 0x900   :  { %5112 = vtanh.f32 %v1609_v2 }
 0x902   :  { %v5107_v8 = vpop.eup %5106 }
 0x903   :  { %v1617_v11 = vadd.f32 1.0, %v5107_v8  ;;  %v5109_v12 = vpop.eup %5108 }
 0x905   :  { %5114 = vrcp.f32 %v1617_v11 }
 0x906   :  { %5116 = vpow2.f32 %v1626_v22 }
 0x907   :  { %5118 = vpow2.f32 %v1628_v26 }
 0x90c   :  { %v5111_v17 = vpop.eup %5110 }
 0x90d   :  { %v1638_v14 = vmul.f32 %v5111_v17, %v5109_v12  ;;  %v5113_v16 = vpop.eup %5112  ;;  %v1636_v56 = vmul.f32 %v5111_v17, %v6074_v44 }
 0x90f   :  { %1642 = vrot.lane.b32.xlu0 %v1638_v14, %s5536_s27 }
 0x912   :  { %v5115_v28 = vpop.eup %5114 }
 0x913   :  { %v1639_v23 = vmul.f32 %v5115_v28, %v5113_v16  ;;  %v5117_v30 = vpop.eup %5116  ;;  %v1637_v63 = vmul.f32 %v5115_v28, %v6079_v10 }
 0x914   :  { %v1630_v53 = vadd.f32 1.0, %v5117_v30  ;;  %v5119_v59 = vpop.eup %5118 }
 0x915   :  { %1644 = vrot.lane.b32.xlu0 %v1639_v23, %s5536_s27  ;;  %v1631_v38 = vadd.f32 1.0, %v5119_v59  ;;  %v1841_v23 = vsel %vm1839_vm4, 1, %v7486_v0 }
 0x916   :  { %5120 = vrcp.f32 %v1630_v53 }
 0x919   :  { %238 = vperm.xlu0 %5006, %v185_v43   ;;  %v6195_v43 = vld [vmem:[%s7472_s1 + $0x8] sm:$0xff] }
 0x91a   :  { %vm1840_vm5 = vcmp.gt.s32.totalorder %v6195_v43, 5  ;;  %vm2025_vm11 = vcmp.gt.s32.totalorder %v6195_v43, 6 }
 0x91d   :  { %241 = vperm.xlu0 %5006, %v186_v31  }
 0x923   :  { %v5121_v5 = vpop.eup %5120 }
 0x981   :  { %v1643_v57 = vpop.permute.xlu0 %1642 }
 0x982   :  { %v1648_v61 = vadd.f32 %v1643_v57, %v1636_v56 }
 0x984   :  { %5122 = vtanh.f32 %v1648_v61  ;;  %v6159_v62 = vsel %vm1664_vm0, %v1648_v61, %v6074_v44 }
 0x985   :  { %5124 = vrcp.f32 %v1631_v38 }
 0x987   :  { %v1645_v42 = vpop.permute.xlu0 %1644 }
 0x988   :  { %v1649_v46 = vadd.f32 %v1645_v42, %v1637_v63 }
 0x98a   :  { %5126 = vtanh.f32 %v1649_v46  ;;  %v6164_v3 = vsel %vm1665_vm1, %v1649_v46, %v6079_v10 }
 0x991   :  { %v5123_v2 = vpop.eup %5122 }
 0x992   :  { %v1652_v8 = vmul.f32 %v5123_v2, %v5121_v5  ;;  %v5125_v17 = vpop.eup %5124 }
 0x994   :  { %v239_v11 = vpop.permute.xlu0 %238  ;;  %v6168_v44 = vsel %vm1664_vm0, %v1652_v8, %v6083_v51  ;;  %v6171_v12 = vsel %vm1664_vm0, %v1652_v8, 0.0 }
 0x995   :  { %7496 = vst [vmem:[#allocation24_spill] sm:$0xff] %v6171_v12  ;;  %vm313_vm2 = vcmp.eq.s32.totalorder %v5808_v58, %v239_v11  ;;  %1706 = vrot.lane.b32.xlu1 %v6168_v44, %s5536_s27 }
 0x996   :  { %4777 = vmatmul.mubr.msk.f32.gmra.mxu1 %vm313_vm2, %v5535_v60  ;;  %vm2210_vm2 = vcmp.gt.s32.totalorder %v6195_v43, 7 }
 0x997   :  { %v5127_v10 = vpop.eup %5126  ;;  %573 = vmatprep.mubr.f32.mxu1 %v7484_v1 }
 0x998   :  { %v242_v14 = vpop.permute.xlu0 %241  ;;  %v1653_v16 = vmul.f32 %v5127_v10, %v5125_v17 }
 0x999   :  { %vm314_vm3 = vcmp.eq.s32.totalorder %v5808_v58, %v242_v14 }
 0x99a   :  { %4778 = vmatmul.mubr.msk.f32.gmra.mxu1 %vm314_vm3, %v5535_v60  ;;  %v6183_v51 = vsel %vm1665_vm1, %v1653_v16, %v6103_v25  ;;  %v6186_v28 = vsel %vm1665_vm1, %v1653_v16, 0.0  ;;  %v1842_v25 = vsel %vm1840_vm5, 1, %v7486_v0  ;;  %vm2209_vm1 = vcmp.gt.s32.totalorder %v6097_v7, 7 }
 0x99b   :  { %7497 = vst [vmem:[#allocation25_spill] sm:$0xff] %v6186_v28  ;;  %1708 = vrot.lane.b32.xlu1 %v6183_v51, %s5536_s27  ;;  %579 = vmatprep.mubr.f32.mxu1 %v7484_v1 }
 0x99f   :  { %1844 = vperm.xlu1 %5007, %v1841_v23  }
 0x9a3   :  { %1847 = vperm.xlu1 %5007, %v1842_v25  }
 0xa07   :  { %v1707_v31 = vpop.permute.xlu1 %1706 }
 0xa08   :  { %4807 = vmatmul.mubr.msk.f32.vlgmr.msra.gmra.mxu0 %vm786_vm12, %v1707_v31 }
 0xa09   :  { %1784 = vmatprep.mubr.f32.mxu0 %v7484_v1  ;;  %1916 = vmatpush1.msra.mxu0 %v6034_v34 }
 0xa0a   :  { %1917 = vmatprep.subr.mxu0 %v6036_v36 }
 0xa0b   :  { %1918 = vmatpush1.msra.mxu0 %v6039_v41 }
 0xa0c   :  { %1919 = vmatprep.subr.mxu0 %v6042_v13 }
 0xa0d   :  { %v1709_v21 = vpop.permute.xlu1 %1708  ;;  %1920 = vmatpush1.msra.mxu0 %v6045_v47 }
 0xa0e   :  { %4808 = vmatmul.mubr.msk.f32.gmra.mxu0 %vm786_vm12, %v1709_v21  ;;  %1921 = vmatprep.subr.mxu0 %v6048_v48 }
 0xa0f   :  { %1922 = vmatpush1.msra.mxu0 %v6051_v50  ;;  %1963 = vmatprep.mubr.f32.mxu0 %v7484_v1 }
 0xa10   :  { %1923 = vmatprep.subr.mxu0 %v6054_v4 }
 0xa11   :  { %1924 = vmatpush1.msra.mxu0 %v6057_v52 }
 0xa12   :  { %1925 = vmatprep.subr.mxu0 %v6060_v45 }
 0xa13   :  { %1926 = vmatpush1.msra.mxu0 %v6140_v35 }
 0xa14   :  { %1927 = vmatprep.subr.mxu0 %v6142_v37 }
 0xa15   :  { %1928 = vmatpush1.msra.mxu0 %v6144_v18 }
 0xa16   :  { %1929 = vmatprep.subr.mxu0 %v6147_v55 }
 0xa17   :  { %1930 = vmatpush1.msra.mxu0 %v6150_v19 }
 0xa18   :  { %2100 = vmatprep.subr.mxu0 %v6032_v32 }
 0xa56   :  { %v569_v22 = vpop.f32.mrf.mxu1 }
 0xa57   :  { %v570_v26 = vadd.f32 %v569_v22, %v5826_v9 }
 0xa58   :  { %v571_v24 = vpop.f32.mrf.mxu1 }
 0xa59   :  { %v572_v46 = vadd.f32 %v571_v24, %v5831_v33 }
 0xa5a   :  { %v575_v54 = vpop.f32.mrf.mxu1 }
 0xa5b   :  { %v576_v59 = vadd.f32 %v575_v54, %v5826_v9 }
 0xa5c   :  { %v577_v2 = vpop.f32.mrf.mxu1 }
 0xa5d   :  { %v578_v10 = vadd.f32 %v577_v2, %v5831_v33 }
 0xac8   :  { %v1780_v30 = vpop.f32.mrf.mxu0 }
 0xac9   :  { %v1791_v53 = vadd.f32 %v1780_v30, %v570_v26  ;;  %v187_v30 = vld [vmem:[%s7471_s0 + $0x60] sm:$0xff] }
 0xaca   :  { %v1782_v57 = vpop.f32.mrf.mxu0 }
 0xacb   :  { %v1795_v56 = vsub.f32 0.0, %v1791_v53  ;;  %v1792_v5 = vadd.f32 %v1782_v57, %v572_v46  ;;  %v188_v53 = vld [vmem:[%s7471_s0 + $0x68] sm:$0xff] }
 0xacd   :  { %v1797_v61 = vmul.f32 1.442695, %v1795_v56  ;;  %v1809_v54 = vsub.f32 0.0, %v1792_v5 }
 0xace   :  { %v1786_v38 = vpop.f32.mrf.mxu0 }
 0xacf   :  { %5128 = vpow2.f32 %v1797_v61  ;;  %v1793_v40 = vadd.f32 %v1786_v38, %v576_v59  ;;  %v1811_v56 = vmul.f32 1.442695, %v1809_v54  ;;  %v2026_v54 = vsel %vm2024_vm10, 1, %v7486_v0 }
 0xad0   :  { %v1788_v17 = vpop.f32.mrf.mxu0 }
 0xad1   :  { %v1796_v63 = vsub.f32 0.0, %v1793_v40  ;;  %v1794_v14 = vadd.f32 %v1788_v17, %v578_v10  ;;  %v1845_v40 = vpop.permute.xlu1 %1844 }
 0xad2   :  { %vm1849_vm6 = vcmp.eq.s32.totalorder %v1845_v40, 1 }
 0xad3   :  { %v1799_v42 = vmul.f32 1.442695, %v1796_v63  ;;  %v1810_v57 = vsub.f32 0.0, %v1794_v14 }
 0xad5   :  { %5130 = vpow2.f32 %v1799_v42  ;;  %v1813_v59 = vmul.f32 1.442695, %v1810_v57 }
 0xad6   :  { %5132 = vtanh.f32 %v1792_v5 }
 0xadc   :  { %v5129_v8 = vpop.eup %5128 }
 0xadd   :  { %v1801_v11 = vadd.f32 1.0, %v5129_v8 }
 0xadf   :  { %5134 = vrcp.f32 %v1801_v11  ;;  %v1848_v11 = vpop.permute.xlu1 %1847 }
 0xae0   :  { %5136 = vtanh.f32 %v1794_v14  ;;  %vm1850_vm7 = vcmp.eq.s32.totalorder %v1848_v11, 1 }
 0xae2   :  { %v5131_v16 = vpop.eup %5130 }
 0xae3   :  { %v1802_v23 = vadd.f32 1.0, %v5131_v16  ;;  %v5133_v25 = vpop.eup %5132 }
 0xae5   :  { %5138 = vrcp.f32 %v1802_v23 }
 0xae6   :  { %5140 = vpow2.f32 %v1811_v56  ;;  %v2027_v56 = vsel %vm2025_vm11, 1, %v7486_v0 }
 0xae7   :  { %5142 = vpow2.f32 %v1813_v59 }
 0xaec   :  { %v5135_v31 = vpop.eup %5134 }
 0xaed   :  { %v1823_v21 = vmul.f32 %v5135_v31, %v5133_v25  ;;  %v5137_v22 = vpop.eup %5136  ;;  %v1821_v63 = vmul.f32 %v5135_v31, %v6159_v62 }
 0xaef   :  { %1827 = vrot.lane.b32.xlu0 %v1823_v21, %s5536_s27 }
 0xaf2   :  { %v5139_v24 = vpop.eup %5138 }
 0xaf3   :  { %v1824_v26 = vmul.f32 %v5139_v24, %v5137_v22  ;;  %v5141_v61 = vpop.eup %5140  ;;  %v1822_v17 = vmul.f32 %v5139_v24, %v6164_v3 }
 0xaf4   :  { %v1815_v38 = vadd.f32 1.0, %v5141_v61  ;;  %v5143_v46 = vpop.eup %5142 }
 0xaf5   :  { %1829 = vrot.lane.b32.xlu0 %v1824_v26, %s5536_s27  ;;  %v1816_v5 = vadd.f32 1.0, %v5143_v46 }
 0xaf6   :  { %5144 = vrcp.f32 %v1815_v38 }
 0xaf9   :  { %244 = vperm.xlu0 %5006, %v187_v30  }
 0xafd   :  { %247 = vperm.xlu0 %5006, %v188_v53  }
 0xb03   :  { %v5145_v23 = vpop.eup %5144 }
 0xb61   :  { %v1828_v42 = vpop.permute.xlu0 %1827 }
 0xb62   :  { %v1833_v2 = vadd.f32 %v1828_v42, %v1821_v63 }
 0xb64   :  { %5146 = vtanh.f32 %v1833_v2  ;;  %v6234_v8 = vsel %vm1849_vm6, %v1833_v2, %v6159_v62 }
 0xb65   :  { %5148 = vrcp.f32 %v1816_v5 }
 0xb67   :  { %v1830_v10 = vpop.permute.xlu0 %1829 }
 0xb68   :  { %v1834_v14 = vadd.f32 %v1830_v10, %v1822_v17 }
 0xb6a   :  { %5150 = vtanh.f32 %v1834_v14  ;;  %v6239_v16 = vsel %vm1850_vm7, %v1834_v14, %v6164_v3 }
 0xb71   :  { %v5147_v25 = vpop.eup %5146 }
 0xb72   :  { %v1837_v31 = vmul.f32 %v5147_v25, %v5145_v23  ;;  %v5149_v24 = vpop.eup %5148 }
 0xb74   :  { %v245_v21 = vpop.permute.xlu0 %244  ;;  %v6243_v62 = vsel %vm1849_vm6, %v1837_v31, %v6168_v44  ;;  %v6246_v22 = vsel %vm1849_vm6, %v1837_v31, 0.0 }
 0xb75   :  { %7498 = vst [vmem:[#allocation26_spill] sm:$0xff] %v6246_v22  ;;  %vm315_vm8 = vcmp.eq.s32.totalorder %v5808_v58, %v245_v21  ;;  %1891 = vrot.lane.b32.xlu1 %v6243_v62, %s5536_s27 }
 0xb76   :  { %4779 = vmatmul.mubr.msk.f32.gmra.mxu1 %vm315_vm8, %v5535_v60  ;;  %vm2395_vm8 = vcmp.gt.s32.totalorder %v6195_v43, 8  ;;  %v197_v43 = vld [vmem:[%s7471_s0 + $0xb0] sm:$0xff] }
 0xb77   :  { %v5151_v3 = vpop.eup %5150  ;;  %585 = vmatprep.mubr.f32.mxu1 %v7484_v1 }
 0xb78   :  { %v248_v26 = vpop.permute.xlu0 %247  ;;  %v1838_v30 = vmul.f32 %v5151_v3, %v5149_v24 }
 0xb79   :  { %vm316_vm9 = vcmp.eq.s32.totalorder %v5808_v58, %v248_v26 }
 0xb7a   :  { %4780 = vmatmul.mubr.msk.f32.gmra.mxu1 %vm316_vm9, %v5535_v60  ;;  %v6258_v44 = vsel %vm1850_vm7, %v1838_v30, %v6183_v51  ;;  %v6261_v53 = vsel %vm1850_vm7, %v1838_v30, 0.0  ;;  %vm2394_vm7 = vcmp.gt.s32.totalorder %v6097_v7, 8 }
 0xb7b   :  { %7499 = vst [vmem:[#allocation27_spill] sm:$0xff] %v6261_v53  ;;  %1893 = vrot.lane.b32.xlu1 %v6258_v44, %s5536_s27  ;;  %591 = vmatprep.mubr.f32.mxu1 %v7484_v1 }
 0xb7f   :  { %2029 = vperm.xlu1 %5007, %v2026_v54  }
 0xb83   :  { %2032 = vperm.xlu1 %5007, %v2027_v56  }
 0xbe7   :  { %v1892_v57 = vpop.permute.xlu1 %1891 }
 0xbe8   :  { %4809 = vmatmul.mubr.msk.f32.vlgmr.msra.gmra.mxu0 %vm786_vm12, %v1892_v57 }
 0xbe9   :  { %1969 = vmatprep.mubr.f32.mxu0 %v7484_v1  ;;  %2101 = vmatpush1.msra.mxu0 %v6034_v34 }
 0xbea   :  { %2102 = vmatprep.subr.mxu0 %v6036_v36 }
 0xbeb   :  { %2103 = vmatpush1.msra.mxu0 %v6039_v41 }
 0xbec   :  { %2104 = vmatprep.subr.mxu0 %v6042_v13 }
 0xbed   :  { %v1894_v51 = vpop.permute.xlu1 %1893  ;;  %2105 = vmatpush1.msra.mxu0 %v6045_v47 }
 0xbee   :  { %4810 = vmatmul.mubr.msk.f32.gmra.mxu0 %vm786_vm12, %v1894_v51  ;;  %2106 = vmatprep.subr.mxu0 %v6048_v48 }
 0xbef   :  { %2107 = vmatpush1.msra.mxu0 %v6051_v50  ;;  %2148 = vmatprep.mubr.f32.mxu0 %v7484_v1 }
 0xbf0   :  { %2108 = vmatprep.subr.mxu0 %v6054_v4 }
 0xbf1   :  { %2109 = vmatpush1.msra.mxu0 %v6057_v52 }
 0xbf2   :  { %2110 = vmatprep.subr.mxu0 %v6060_v45 }
 0xbf3   :  { %2111 = vmatpush1.msra.mxu0 %v6140_v35 }
 0xbf4   :  { %2112 = vmatprep.subr.mxu0 %v6142_v37 }
 0xbf5   :  { %2113 = vmatpush1.msra.mxu0 %v6144_v18 }
 0xbf6   :  { %2114 = vmatprep.subr.mxu0 %v6147_v55 }
 0xbf7   :  { %2115 = vmatpush1.msra.mxu0 %v6150_v19 }
 0xbf8   :  { %2285 = vmatprep.subr.mxu0 %v6032_v32 }
 0xc36   :  { %v581_v59 = vpop.f32.mrf.mxu1 }
 0xc37   :  { %v582_v38 = vadd.f32 %v581_v59, %v5826_v9 }
 0xc38   :  { %v583_v61 = vpop.f32.mrf.mxu1 }
 0xc39   :  { %v584_v32 = vadd.f32 %v583_v61, %v5831_v33 }
 0xc3a   :  { %v587_v42 = vpop.f32.mrf.mxu1 }
 0xc3b   :  { %v588_v5 = vadd.f32 %v587_v42, %v5826_v9  ;;  %v190_v42 = vld [vmem:[%s7471_s0 + $0x78] sm:$0xff] }
 0xc3c   :  { %v589_v31 = vpop.f32.mrf.mxu1 }
 0xc3d   :  { %v590_v26 = vadd.f32 %v589_v31, %v5831_v33 }
 0xca8   :  { %v1965_v40 = vpop.f32.mrf.mxu0 }
 0xca9   :  { %v1976_v63 = vadd.f32 %v1965_v40, %v582_v38 }
 0xcaa   :  { %v1967_v2 = vpop.f32.mrf.mxu0 }
 0xcab   :  { %v1980_v46 = vsub.f32 0.0, %v1976_v63  ;;  %v1977_v25 = vadd.f32 %v1967_v2, %v584_v32  ;;  %v189_v63 = vld [vmem:[%s7471_s0 + $0x70] sm:$0xff] }
 0xcad   :  { %v1982_v11 = vmul.f32 1.442695, %v1980_v46  ;;  %v1994_v46 = vsub.f32 0.0, %v1977_v25 }
 0xcae   :  { %v1971_v17 = vpop.f32.mrf.mxu0 }
 0xcaf   :  { %5152 = vpow2.f32 %v1982_v11  ;;  %v1978_v10 = vadd.f32 %v1971_v17, %v588_v5  ;;  %v1996_v2 = vmul.f32 1.442695, %v1994_v46 }
 0xcb0   :  { %v1973_v3 = vpop.f32.mrf.mxu0 }
 0xcb1   :  { %v1981_v14 = vsub.f32 0.0, %v1978_v10  ;;  %v1979_v30 = vadd.f32 %v1973_v3, %v590_v26 }
 0xcb3   :  { %v1984_v23 = vmul.f32 1.442695, %v1981_v14  ;;  %v1995_v5 = vsub.f32 0.0, %v1979_v30  ;;  %v2030_v14 = vpop.permute.xlu1 %2029 }
 0xcb4   :  { %vm2034_vm13 = vcmp.eq.s32.totalorder %v2030_v14, 1 }
 0xcb5   :  { %5154 = vpow2.f32 %v1984_v23  ;;  %v1998_v11 = vmul.f32 1.442695, %v1995_v5  ;;  %v2212_v5 = vsel %vm2210_vm2, 1, %v7486_v0 }
 0xcb6   :  { %5156 = vtanh.f32 %v1977_v25 }
 0xcb7   :  { %v2033_v3 = vpop.permute.xlu1 %2032 }
 0xcb8   :  { %vm2035_vm14 = vcmp.eq.s32.totalorder %v2033_v3, 1 }
 0xcbc   :  { %v5153_v21 = vpop.eup %5152 }
 0xcbd   :  { %v1986_v24 = vadd.f32 1.0, %v5153_v21 }
 0xcbf   :  { %5158 = vrcp.f32 %v1986_v24 }
 0xcc0   :  { %5160 = vtanh.f32 %v1979_v30 }
 0xcc2   :  { %v5155_v54 = vpop.eup %5154 }
 0xcc3   :  { %v1987_v56 = vadd.f32 1.0, %v5155_v54  ;;  %v5157_v57 = vpop.eup %5156 }
 0xcc5   :  { %5162 = vrcp.f32 %v1987_v56 }
 0xcc6   :  { %5164 = vpow2.f32 %v1996_v2  ;;  %v2211_v2 = vsel %vm2209_vm1, 1, %v7486_v0 }
 0xcc7   :  { %5166 = vpow2.f32 %v1998_v11 }
 0xccc   :  { %v5159_v51 = vpop.eup %5158 }
 0xccd   :  { %v2008_v59 = vmul.f32 %v5159_v51, %v5157_v57  ;;  %v5161_v61 = vpop.eup %5160  ;;  %v2006_v23 = vmul.f32 %v5159_v51, %v6234_v8 }
 0xccf   :  { %2012 = vrot.lane.b32.xlu0 %v2008_v59, %s5536_s27 }
 0xcd2   :  { %v5163_v38 = vpop.eup %5162 }
 0xcd3   :  { %v2009_v40 = vmul.f32 %v5163_v38, %v5161_v61  ;;  %v5165_v17 = vpop.eup %5164  ;;  %v2007_v26 = vmul.f32 %v5163_v38, %v6239_v16 }
 0xcd4   :  { %v2000_v10 = vadd.f32 1.0, %v5165_v17  ;;  %v5167_v31 = vpop.eup %5166 }
 0xcd5   :  { %2014 = vrot.lane.b32.xlu0 %v2009_v40, %s5536_s27  ;;  %v2001_v25 = vadd.f32 1.0, %v5167_v31 }
 0xcd6   :  { %5168 = vrcp.f32 %v2000_v10 }
 0xcd9   :  { %250 = vperm.xlu0 %5006, %v189_v63  }
 0xcdd   :  { %253 = vperm.xlu0 %5006, %v190_v42  }
 0xce3   :  { %v5169_v57 = vpop.eup %5168 }
 0xd41   :  { %v2013_v32 = vpop.permute.xlu0 %2012 }
 0xd42   :  { %v2018_v21 = vadd.f32 %v2013_v32, %v2006_v23 }
 0xd44   :  { %5170 = vtanh.f32 %v2018_v21  ;;  %v6304_v24 = vsel %vm2034_vm13, %v2018_v21, %v6234_v8 }
 0xd45   :  { %5172 = vrcp.f32 %v2001_v25 }
 0xd47   :  { %v2015_v30 = vpop.permute.xlu0 %2014 }
 0xd48   :  { %v2019_v54 = vadd.f32 %v2015_v30, %v2007_v26 }
 0xd4a   :  { %5174 = vtanh.f32 %v2019_v54  ;;  %v6309_v56 = vsel %vm2035_vm14, %v2019_v54, %v6239_v16 }
 0xd51   :  { %v5171_v51 = vpop.eup %5170 }
 0xd52   :  { %v2022_v59 = vmul.f32 %v5171_v51, %v5169_v57  ;;  %v5173_v38 = vpop.eup %5172 }
 0xd54   :  { %v251_v61 = vpop.permute.xlu0 %250  ;;  %v6313_v8 = vsel %vm2034_vm13, %v2022_v59, %v6243_v62  ;;  %v6316_v40 = vsel %vm2034_vm13, %v2022_v59, 0.0 }
 0xd55   :  { %7500 = vst [vmem:[#allocation28_spill] sm:$0xff] %v6316_v40  ;;  %vm317_vm15 = vcmp.eq.s32.totalorder %v5808_v58, %v251_v61  ;;  %2076 = vrot.lane.b32.xlu1 %v6313_v8, %s5536_s27  ;;  %v191_v61 = vld [vmem:[%s7471_s0 + $0x80] sm:$0xff] }
 0xd56   :  { %4781 = vmatmul.mubr.msk.f32.gmra.mxu1 %vm317_vm15, %v5535_v60 }
 0xd57   :  { %v5175_v16 = vpop.eup %5174  ;;  %597 = vmatprep.mubr.f32.mxu1 %v7484_v1 }
 0xd58   :  { %v254_v63 = vpop.permute.xlu0 %253  ;;  %v2023_v42 = vmul.f32 %v5175_v16, %v5173_v38  ;;  %v192_v38 = vld [vmem:[%s7471_s0 + $0x88] sm:$0xff] }
 0xd59   :  { %vm318_vm0 = vcmp.eq.s32.totalorder %v5808_v58, %v254_v63 }
 0xd5a   :  { %4782 = vmatmul.mubr.msk.f32.gmra.mxu1 %vm318_vm0, %v5535_v60  ;;  %v6328_v62 = vsel %vm2035_vm14, %v2023_v42, %v6258_v44  ;;  %v6331_v46 = vsel %vm2035_vm14, %v2023_v42, 0.0 }
 0xd5b   :  { %7501 = vst [vmem:[#allocation29_spill] sm:$0xff] %v6331_v46  ;;  %2078 = vrot.lane.b32.xlu1 %v6328_v62, %s5536_s27  ;;  %603 = vmatprep.mubr.f32.mxu1 %v7484_v1 }
 0xd5f   :  { %2214 = vperm.xlu1 %5007, %v2211_v2  }
 0xd63   :  { %2217 = vperm.xlu1 %5007, %v2212_v5  }
 0xdc7   :  { %v2077_v11 = vpop.permute.xlu1 %2076 }
 0xdc8   :  { %4811 = vmatmul.mubr.msk.f32.vlgmr.msra.gmra.mxu0 %vm786_vm12, %v2077_v11 }
 0xdc9   :  { %2154 = vmatprep.mubr.f32.mxu0 %v7484_v1  ;;  %2286 = vmatpush1.msra.mxu0 %v6034_v34 }
 0xdca   :  { %2287 = vmatprep.subr.mxu0 %v6036_v36 }
 0xdcb   :  { %2288 = vmatpush1.msra.mxu0 %v6039_v41 }
 0xdcc   :  { %2289 = vmatprep.subr.mxu0 %v6042_v13 }
 0xdcd   :  { %v2079_v44 = vpop.permute.xlu1 %2078  ;;  %2290 = vmatpush1.msra.mxu0 %v6045_v47 }
 0xdce   :  { %4812 = vmatmul.mubr.msk.f32.gmra.mxu0 %vm786_vm12, %v2079_v44  ;;  %2291 = vmatprep.subr.mxu0 %v6048_v48 }
 0xdcf   :  { %2292 = vmatpush1.msra.mxu0 %v6051_v50  ;;  %2333 = vmatprep.mubr.f32.mxu0 %v7484_v1 }
 0xdd0   :  { %2293 = vmatprep.subr.mxu0 %v6054_v4 }
 0xdd1   :  { %2294 = vmatpush1.msra.mxu0 %v6057_v52 }
 0xdd2   :  { %2295 = vmatprep.subr.mxu0 %v6060_v45 }
 0xdd3   :  { %2296 = vmatpush1.msra.mxu0 %v6140_v35 }
 0xdd4   :  { %2297 = vmatprep.subr.mxu0 %v6142_v37 }
 0xdd5   :  { %2298 = vmatpush1.msra.mxu0 %v6144_v18 }
 0xdd6   :  { %2299 = vmatprep.subr.mxu0 %v6147_v55 }
 0xdd7   :  { %2300 = vmatpush1.msra.mxu0 %v6150_v19 }
 0xdda   :  { %v2215_v44 = vpop.permute.xlu1 %2214 }
 0xddb   :  { %vm2219_vm3 = vcmp.eq.s32.totalorder %v2215_v44, 1 }
 0xe16   :  { %v593_v34 = vpop.f32.mrf.mxu1 }
 0xe17   :  { %v594_v41 = vadd.f32 %v593_v34, %v5826_v9 }
 0xe18   :  { %v595_v36 = vpop.f32.mrf.mxu1 }
 0xe19   :  { %v596_v55 = vadd.f32 %v595_v36, %v5831_v33 }
 0xe1a   :  { %v599_v48 = vpop.f32.mrf.mxu1 }
 0xe1b   :  { %v600_v52 = vadd.f32 %v599_v48, %v5826_v9 }
 0xe1c   :  { %v601_v10 = vpop.f32.mrf.mxu1 }
 0xe1d   :  { %v602_v31 = vadd.f32 %v601_v10, %v5831_v33 }
 0xe88   :  { %v2150_v13 = vpop.f32.mrf.mxu0 }
 0xe89   :  { %v2161_v47 = vadd.f32 %v2150_v13, %v594_v41 }
 0xe8a   :  { %v2152_v4 = vpop.f32.mrf.mxu0 }
 0xe8b   :  { %v2165_v50 = vsub.f32 0.0, %v2161_v47  ;;  %v2162_v19 = vadd.f32 %v2152_v4, %v596_v55 }
 0xe8d   :  { %v2167_v45 = vmul.f32 1.442695, %v2165_v50  ;;  %v2179_v16 = vsub.f32 0.0, %v2162_v19  ;;  %v2218_v50 = vpop.permute.xlu1 %2217 }
 0xe8e   :  { %v2156_v35 = vpop.f32.mrf.mxu0  ;;  %vm2220_vm4 = vcmp.eq.s32.totalorder %v2218_v50, 1 }
 0xe8f   :  { %5176 = vpow2.f32 %v2167_v45  ;;  %v2163_v37 = vadd.f32 %v2156_v35, %v600_v52  ;;  %v2181_v63 = vmul.f32 1.442695, %v2179_v16 }
 0xe90   :  { %v2158_v32 = vpop.f32.mrf.mxu0 }
 0xe91   :  { %v2166_v18 = vsub.f32 0.0, %v2163_v37  ;;  %v2164_v21 = vadd.f32 %v2158_v32, %v602_v31  ;;  %v2396_v31 = vsel %vm2394_vm7, 1, %v7486_v0 }
 0xe93   :  { %v2169_v17 = vmul.f32 1.442695, %v2166_v18  ;;  %v2180_v42 = vsub.f32 0.0, %v2164_v21 }
 0xe95   :  { %5178 = vpow2.f32 %v2169_v17  ;;  %v2183_v2 = vmul.f32 1.442695, %v2180_v42 }
 0xe96   :  { %5180 = vtanh.f32 %v2162_v19 }
 0xe9c   :  { %v5177_v14 = vpop.eup %5176 }
 0xe9d   :  { %v2171_v23 = vadd.f32 1.0, %v5177_v14 }
 0xe9f   :  { %5182 = vrcp.f32 %v2171_v23 }
 0xea0   :  { %5184 = vtanh.f32 %v2164_v21 }
 0xea2   :  { %v5179_v25 = vpop.eup %5178 }
 0xea3   :  { %v2172_v3 = vadd.f32 1.0, %v5179_v25  ;;  %v5181_v26 = vpop.eup %5180 }
 0xea5   :  { %5186 = vrcp.f32 %v2172_v3 }
 0xea6   :  { %5188 = vpow2.f32 %v2181_v63 }
 0xea7   :  { %5190 = vpow2.f32 %v2183_v2 }
 0xeac   :  { %v5183_v30 = vpop.eup %5182 }
 0xead   :  { %v2193_v54 = vmul.f32 %v5183_v30, %v5181_v26  ;;  %v5185_v57 = vpop.eup %5184  ;;  %v2191_v34 = vmul.f32 %v5183_v30, %v6304_v24 }
 0xeaf   :  { %2197 = vrot.lane.b32.xlu0 %v2193_v54, %s5536_s27 }
 0xeb2   :  { %v5187_v51 = vpop.eup %5186 }
 0xeb3   :  { %v2194_v59 = vmul.f32 %v5187_v51, %v5185_v57  ;;  %v5189_v5 = vpop.eup %5188  ;;  %v2192_v4 = vmul.f32 %v5187_v51, %v6309_v56 }
 0xeb4   :  { %v2185_v11 = vadd.f32 1.0, %v5189_v5  ;;  %v5191_v41 = vpop.eup %5190 }
 0xeb5   :  { %2199 = vrot.lane.b32.xlu0 %v2194_v59, %s5536_s27  ;;  %v2186_v48 = vadd.f32 1.0, %v5191_v41 }
 0xeb6   :  { %5192 = vrcp.f32 %v2185_v11 }
 0xeb9   :  { %256 = vperm.xlu0 %5006, %v191_v61  }
 0xebd   :  { %259 = vperm.xlu0 %5006, %v192_v38  }
 0xec3   :  { %v5193_v37 = vpop.eup %5192 }
 0xf21   :  { %v2198_v36 = vpop.permute.xlu0 %2197 }
 0xf22   :  { %v2203_v13 = vadd.f32 %v2198_v36, %v2191_v34 }
 0xf24   :  { %5194 = vtanh.f32 %v2203_v13  ;;  %v6373_v47 = vsel %vm2219_vm3, %v2203_v13, %v6304_v24 }
 0xf25   :  { %5196 = vrcp.f32 %v2186_v48 }
 0xf27   :  { %v2200_v52 = vpop.permute.xlu0 %2199 }
 0xf28   :  { %v2204_v45 = vadd.f32 %v2200_v52, %v2192_v4  ;;  %v6420_v4 = vld [vmem:[#allocation7 + $0x78] sm:$0xff]  ;;  %v6424_v52 = vld [vmem:[#allocation7 + $0x70] sm:$0xff] }
 0xf29   :  { %2470 = vmatprep.subr.mxu1 %v6420_v4  ;;  %2655 = vmatprep.subr.mxu0 %v6420_v4 }
 0xf2a   :  { %5198 = vtanh.f32 %v2204_v45  ;;  %v6378_v35 = vsel %vm2220_vm4, %v2204_v45, %v6309_v56  ;;  %2471 = vmatpush1.msra.mxu1 %v6424_v52 }
 0xf31   :  { %v5195_v18 = vpop.eup %5194 }
 0xf32   :  { %v2207_v17 = vmul.f32 %v5195_v18, %v5193_v37  ;;  %v5197_v10 = vpop.eup %5196 }
 0xf34   :  { %v257_v55 = vpop.permute.xlu0 %256  ;;  %v6382_v24 = vsel %vm2219_vm3, %v2207_v17, %v6313_v8  ;;  %v6385_v19 = vsel %vm2219_vm3, %v2207_v17, 0.0  ;;  %v193_v17 = vld [vmem:[%s7471_s0 + $0x90] sm:$0xff] }
 0xf35   :  { %7502 = vst [vmem:[#allocation30_spill] sm:$0xff] %v6385_v19  ;;  %vm319_vm5 = vcmp.eq.s32.totalorder %v5808_v58, %v257_v55  ;;  %2261 = vrot.lane.b32.xlu1 %v6382_v24, %s5536_s27 }
 0xf36   :  { %4783 = vmatmul.mubr.msk.f32.gmra.mxu1 %vm319_vm5, %v5535_v60 }
 0xf37   :  { %v5199_v56 = vpop.eup %5198  ;;  %609 = vmatprep.mubr.f32.mxu1 %v7484_v1 }
 0xf38   :  { %v260_v14 = vpop.permute.xlu0 %259  ;;  %v2208_v23 = vmul.f32 %v5199_v56, %v5197_v10 }
 0xf39   :  { %vm320_vm6 = vcmp.eq.s32.totalorder %v5808_v58, %v260_v14  ;;  %v194_v14 = vld [vmem:[%s7471_s0 + $0x98] sm:$0xff] }
 0xf3a   :  { %4784 = vmatmul.mubr.msk.f32.gmra.mxu1 %vm320_vm6, %v5535_v60  ;;  %v6397_v8 = vsel %vm2220_vm4, %v2208_v23, %v6328_v62  ;;  %v6400_v32 = vsel %vm2220_vm4, %v2208_v23, 0.0  ;;  %v195_v23 = vld [vmem:[%s7471_s0 + $0xa0] sm:$0xff] }
 0xf3b   :  { %7503 = vst [vmem:[#allocation31_spill] sm:$0xff] %v6400_v32  ;;  %2263 = vrot.lane.b32.xlu1 %v6397_v8, %s5536_s27  ;;  %615 = vmatprep.mubr.f32.mxu1 %v7484_v1 }
 0xf3f   :  { %2399 = vperm.xlu1 %5007, %v2396_v31   ;;  %v6446_v31 = vld [vmem:[#allocation7 + $0x68] sm:$0xff] }
 0xf40   :  { %2472 = vmatprep.subr.mxu1 %v6446_v31 }
 0xfa7   :  { %v2262_v21 = vpop.permute.xlu1 %2261 }
 0xfa8   :  { %4813 = vmatmul.mubr.msk.f32.vlgmr.msra.gmra.mxu0 %vm786_vm12, %v2262_v21  ;;  %v196_v21 = vld [vmem:[%s7471_s0 + $0xa8] sm:$0xff] }
 0xfa9   :  { %2339 = vmatprep.mubr.f32.mxu0 %v7484_v1  ;;  %2656 = vmatpush1.msra.mxu0 %v6424_v52 }
 0xfaa   :  { %2657 = vmatprep.subr.mxu0 %v6446_v31 }
 0xfad   :  { %v2264_v7 = vpop.permute.xlu1 %2263 }
 0xfae   :  { %4814 = vmatmul.mubr.msk.f32.gmra.mxu0 %vm786_vm12, %v2264_v7  ;;  %v6452_v7 = vld [vmem:[#allocation7 + $0x60] sm:$0xff] }
 0xfaf   :  { %2703 = vmatprep.mubr.f32.mxu0 %v7484_v1  ;;  %2473 = vmatpush1.msra.mxu1 %v6452_v7 }
 0xfb0   :  { %2658 = vmatpush1.msra.mxu0 %v6452_v7 }
 0xff6   :  { %v605_v62 = vpop.f32.mrf.mxu1 }
 0xff7   :  { %v606_v3 = vadd.f32 %v605_v62, %v5826_v9  ;;  %v2397_v62 = vsel %vm2395_vm8, 1, %v7486_v0 }
 0xff8   :  { %v607_v25 = vpop.f32.mrf.mxu1 }
 0xff9   :  { %v608_v2 = vadd.f32 %v607_v25, %v5831_v33  ;;  %v198_v25 = vld [vmem:[%s7471_s0 + $0xb8] sm:$0xff] }
 0xffa   :  { %v611_v54 = vpop.f32.mrf.mxu1 }
 0xffb   :  { %v612_v59 = vadd.f32 %v611_v54, %v5826_v9  ;;  %v202_v54 = vld [vmem:[%s7471_s0 + $0xd8] sm:$0xff] }
 0xffc   :  { %v613_v11 = vpop.f32.mrf.mxu1 }
 0xffd   :  { %v614_v41 = vadd.f32 %v613_v11, %v5831_v33  ;;  %v6506_v11 = vld [vmem:[#allocation7 + $0x30] sm:$0xff] }
0x1068   :  { %v2335_v26 = vpop.f32.mrf.mxu0 }
0x1069   :  { %v2346_v30 = vadd.f32 %v2335_v26, %v606_v3  ;;  %v199_v3 = vld [vmem:[%s7471_s0 + $0xc0] sm:$0xff]  ;;  %v200_v26 = vld [vmem:[%s7471_s0 + $0xc8] sm:$0xff] }
0x106a   :  { %v2337_v51 = vpop.f32.mrf.mxu0 }
0x106b   :  { %v2350_v57 = vsub.f32 0.0, %v2346_v30  ;;  %v6413_v5 = vadd.f32 %v2337_v51, %v608_v2  ;;  %v201_v30 = vld [vmem:[%s7471_s0 + $0xd0] sm:$0xff]  ;;  %v203_v51 = vld [vmem:[%s7471_s0 + $0xe0] sm:$0xff] }
0x106c   :  { %v6504_v2 = vld [vmem:[#allocation7 + $0x38] sm:$0xff] }
0x106d   :  { %v2352_v61 = vmul.f32 1.442695, %v2350_v57  ;;  %v6476_v57 = vld [vmem:[#allocation7 + $0x58] sm:$0xff] }
0x106e   :  { %v2341_v38 = vpop.f32.mrf.mxu0  ;;  %2474 = vmatprep.subr.mxu1 %v6476_v57  ;;  %2659 = vmatprep.subr.mxu0 %v6476_v57 }
0x106f   :  { %5200 = vpow2.f32 %v2352_v61  ;;  %v2348_v16 = vadd.f32 %v2341_v38, %v612_v59  ;;  %v6482_v59 = vld [vmem:[#allocation7 + $0x50] sm:$0xff]  ;;  %v204_v61 = vld [vmem:[%s7471_s0 + $0xe8] sm:$0xff] }
0x1070   :  { %v2343_v36 = vpop.f32.mrf.mxu0  ;;  %2475 = vmatpush1.msra.mxu1 %v6482_v59  ;;  %2660 = vmatpush1.msra.mxu0 %v6482_v59  ;;  %v205_v38 = vld [vmem:[%s7471_s0 + $0xf0] sm:$0xff] }
0x1071   :  { %v2351_v63 = vsub.f32 0.0, %v2348_v16  ;;  %v6417_v13 = vadd.f32 %v2343_v36, %v614_v41  ;;  %v206_v16 = vld [vmem:[%s7471_s0 + $0xf8] sm:$0xff] }
0x1072   :  { %v6515_v36 = vld [vmem:[#allocation7 + $0x18] sm:$0xff]  ;;  %v6519_v41 = vld [vmem:[#allocation7 + $0x10] sm:$0xff] }
0x1073   :  { %v2354_v42 = vmul.f32 1.442695, %v2351_v63  ;;  %v6496_v63 = vld [vmem:[#allocation7 + $0x48] sm:$0xff] }
0x1074   :  { %2476 = vmatprep.subr.mxu1 %v6496_v63  ;;  %2661 = vmatprep.subr.mxu0 %v6496_v63 }
0x1075   :  { %5202 = vpow2.f32 %v2354_v42  ;;  %v6500_v42 = vld [vmem:[#allocation7 + $0x40] sm:$0xff] }
0x1076   :  { %5204 = vtanh.f32 %v6413_v5  ;;  %2477 = vmatpush1.msra.mxu1 %v6500_v42  ;;  %2662 = vmatpush1.msra.mxu0 %v6500_v42 }
0x1077   :  { %2478 = vmatprep.subr.mxu1 %v6504_v2  ;;  %2663 = vmatprep.subr.mxu0 %v6504_v2 }
0x1078   :  { %2479 = vmatpush1.msra.mxu1 %v6506_v11  ;;  %2664 = vmatpush1.msra.mxu0 %v6506_v11 }
0x107c   :  { %v5201_v44 = vpop.eup %5200 }
0x107d   :  { %v2356_v34 = vadd.f32 1.0, %v5201_v44  ;;  %v6508_v44 = vld [vmem:[#allocation7 + $0x28] sm:$0xff] }
0x107e   :  { %2480 = vmatprep.subr.mxu1 %v6508_v44  ;;  %2665 = vmatprep.subr.mxu0 %v6508_v44 }
0x107f   :  { %5206 = vrcp.f32 %v2356_v34  ;;  %v6511_v34 = vld [vmem:[#allocation7 + $0x20] sm:$0xff] }
0x1080   :  { %5208 = vtanh.f32 %v6417_v13  ;;  %2481 = vmatpush1.msra.mxu1 %v6511_v34  ;;  %2666 = vmatpush1.msra.mxu0 %v6511_v34 }
0x1081   :  { %2482 = vmatprep.subr.mxu1 %v6515_v36  ;;  %2667 = vmatprep.subr.mxu0 %v6515_v36 }
0x1082   :  { %v5203_v48 = vpop.eup %5202  ;;  %2483 = vmatpush1.msra.mxu1 %v6519_v41  ;;  %2668 = vmatpush1.msra.mxu0 %v6519_v41 }
0x1083   :  { %v2357_v50 = vadd.f32 1.0, %v5203_v48  ;;  %v5205_v45 = vpop.eup %5204  ;;  %v6523_v48 = vld [vmem:[#allocation7 + $0x8] sm:$0xff] }
0x1084   :  { %2484 = vmatprep.subr.mxu1 %v6523_v48  ;;  %2669 = vmatprep.subr.mxu0 %v6523_v48 }
0x1085   :  { %5210 = vrcp.f32 %v2357_v50  ;;  %v6527_v50 = vld [vmem:[#allocation7] sm:$0xff] }
0x1086   :  { %2485 = vmatpush1.msra.mxu1 %v6527_v50  ;;  %2670 = vmatpush1.msra.mxu0 %v6527_v50 }
0x1087   :  { %2840 = vmatprep.subr.mxu1 %v6420_v4  ;;  %3025 = vmatprep.subr.mxu0 %v6420_v4 }
0x108c   :  { %v6428_v37 = vpop.eup %5206 }
0x108d   :  { %v2378_v18 = vmul.f32 %v6428_v37, %v5205_v45  ;;  %v5209_v55 = vpop.eup %5208  ;;  %v2364_v45 = vsub.f32 0.0, %v6413_v5 }
0x108f   :  { %2382 = vrot.lane.b32.xlu0 %v2378_v18, %s5536_s27  ;;  %v2366_v18 = vmul.f32 1.442695, %v2364_v45 }
0x1091   :  { %5212 = vpow2.f32 %v2366_v18 }
0x1092   :  { %v6435_v10 = vpop.eup %5210 }
0x1093   :  { %262 = vperm.xlu0 %5006, %v193_v17   ;;  %v2379_v56 = vmul.f32 %v6435_v10, %v5209_v55  ;;  %v2365_v17 = vsub.f32 0.0, %v6417_v13  ;;  %v2377_v4 = vmul.f32 %v6435_v10, %v6378_v35 }
0x1095   :  { %2384 = vrot.lane.b32.xlu1 %v2379_v56, %s5536_s27  ;;  %v2368_v55 = vmul.f32 1.442695, %v2365_v17 }
0x1097   :  { %265 = vperm.xlu0 %5006, %v194_v14   ;;  %5214 = vpow2.f32 %v2368_v55 }
0x1099   :  { %268 = vperm.xlu1 %5007, %v195_v23   ;;  %v2400_v23 = vpop.permute.xlu1 %2399 }
0x109a   :  { %vm2404_vm9 = vcmp.eq.s32.totalorder %v2400_v23, 1 }
0x109b   :  { %271 = vperm.xlu0 %5006, %v196_v21   ;;  %v2376_v21 = vmul.f32 %v6428_v37, %v6373_v47 }
0x109d   :  { %2402 = vperm.xlu1 %5007, %v2397_v62  }
0x109e   :  { %v5213_v56 = vpop.eup %5212 }
0x109f   :  { %274 = vperm.xlu0 %5006, %v197_v43   ;;  %v2370_v14 = vadd.f32 1.0, %v5213_v56 }
0x10a1   :  { %277 = vperm.xlu1 %5007, %v198_v25   ;;  %5216 = vrcp.f32 %v2370_v14 }
0x10a3   :  { %280 = vperm.xlu0 %5006, %v199_v3  }
0x10a4   :  { %v5215_v43 = vpop.eup %5214 }
0x10a5   :  { %283 = vperm.xlu1 %5007, %v200_v26   ;;  %v2371_v13 = vadd.f32 1.0, %v5215_v43 }
0x10a7   :  { %286 = vperm.xlu0 %5006, %v201_v30  }
0x10a9   :  { %289 = vperm.xlu1 %5007, %v202_v54  }
0x10ab   :  { %292 = vperm.xlu0 %5006, %v203_v51  }
0x10ad   :  { %295 = vperm.xlu1 %5007, %v204_v61  }
0x10ae   :  { %v5217_v37 = vpop.eup %5216 }
0x10af   :  { %298 = vperm.xlu0 %5006, %v205_v38  }
0x10b1   :  { %301 = vperm.xlu1 %5007, %v206_v16  }
0x1101   :  { %v2383_v62 = vpop.permute.xlu0 %2382 }
0x1102   :  { %v2388_v25 = vadd.f32 %v2383_v62, %v2376_v21 }
0x1104   :  { %5218 = vtanh.f32 %v2388_v25  ;;  %v6544_v5 = vsel %vm2404_vm9, %v2388_v25, %v6373_v47 }
0x1105   :  { %5220 = vrcp.f32 %v2371_v13 }
0x1107   :  { %v2385_v3 = vpop.permute.xlu1 %2384 }
0x1108   :  { %v2389_v26 = vadd.f32 %v2385_v3, %v2377_v4 }
0x110a   :  { %5222 = vtanh.f32 %v2389_v26 }
0x110e   :  { %v263_v30 = vpop.permute.xlu0 %262 }
0x110f   :  { %vm321_vm10 = vcmp.eq.s32.totalorder %v5808_v58, %v263_v30 }
0x1110   :  { %4785 = vmatmul.mubr.msk.f32.gmra.mxu1 %vm321_vm10, %v5535_v60 }
0x1111   :  { %v5219_v54 = vpop.eup %5218  ;;  %621 = vmatprep.mubr.f32.mxu1 %v7484_v1 }
0x1112   :  { %v266_v51 = vpop.permute.xlu0 %265  ;;  %v2392_v47 = vmul.f32 %v5219_v54, %v5217_v37  ;;  %v5221_v16 = vpop.eup %5220 }
0x1113   :  { %vm322_vm11 = vcmp.eq.s32.totalorder %v5808_v58, %v266_v51 }
0x1114   :  { %4786 = vmatmul.mubr.msk.f32.gmra.mxu1 %vm322_vm11, %v5535_v60  ;;  %v269_v10 = vpop.permute.xlu1 %268  ;;  %v6555_v61 = vsel %vm2404_vm9, %v2392_v47, %v6382_v24  ;;  %v6558_v38 = vsel %vm2404_vm9, %v2392_v47, 0.0  ;;  %v6569_v24 = vld [vmem:[%s7472_s1] sm:$0xff] }
0x1115   :  { %7504 = vst [vmem:[#allocation32_spill] sm:$0xff] %v6558_v38  ;;  %2446 = vrot.lane.b32.xlu0 %v6555_v61, %s5536_s27  ;;  %627 = vmatprep.mubr.f32.mxu1 %v7484_v1  ;;  %vm323_vm13 = vcmp.eq.s32.totalorder %v5808_v58, %v269_v10  ;;  %vm2579_vm15 = vcmp.gt.s32.totalorder %v6569_v24, 9 }
0x1116   :  { %v272_v45 = vpop.permute.xlu0 %271  ;;  %v2581_v62 = vsel %vm2579_vm15, 1, %v7486_v0  ;;  %vm2764_vm15 = vcmp.gt.s32.totalorder %v6569_v24, 10 }
0x1117   :  { %v5223_v18 = vpop.eup %5222  ;;  %vm324_vm0 = vcmp.eq.s32.totalorder %v5808_v58, %v272_v45 }
0x1118   :  { %4787 = vmatmul.mubr.msk.f32.gmra.mxu1 %vm323_vm13, %v5535_v60  ;;  %v2393_v17 = vmul.f32 %v5223_v18, %v5221_v16  ;;  %v2403_v55 = vpop.permute.xlu1 %2402 }
0x1119   :  { %vm2405_vm14 = vcmp.eq.s32.totalorder %v2403_v55, 1  ;;  %633 = vmatprep.mubr.f32.mxu1 %v7484_v1 }
0x111a   :  { %v6573_v56 = vsel %vm2405_vm14, %v2389_v26, %v6378_v35  ;;  %v6575_v14 = vsel %vm2405_vm14, %v2393_v17, 0.0  ;;  %v6578_v23 = vsel %vm2405_vm14, %v2393_v17, %v6397_v8  ;;  %v275_v21 = vpop.permute.xlu0 %274  ;;  %v6589_v35 = vld [vmem:[%s7472_s1 + $0x8] sm:$0xff] }
0x111b   :  { %7505 = vst [vmem:[#allocation33_spill] sm:$0xff] %v6575_v14  ;;  %2448 = vrot.lane.b32.xlu1 %v6578_v23, %s5536_s27  ;;  %vm2580_vm1 = vcmp.gt.s32.totalorder %v6589_v35, 9  ;;  %vm325_vm2 = vcmp.eq.s32.totalorder %v5808_v58, %v275_v21 }
0x111c   :  { %4788 = vmatmul.mubr.msk.f32.gmra.mxu1 %vm324_vm0, %v5535_v60  ;;  %v278_v8 = vpop.permute.xlu1 %277  ;;  %v2582_v43 = vsel %vm2580_vm1, 1, %v7486_v0  ;;  %vm2765_vm0 = vcmp.gt.s32.totalorder %v6589_v35, 10 }
0x111d   :  { %639 = vmatprep.mubr.f32.mxu1 %v7484_v1  ;;  %vm326_vm3 = vcmp.eq.s32.totalorder %v5808_v58, %v278_v8 }
0x111e   :  { %v281_v25 = vpop.permute.xlu0 %280 }
0x111f   :  { %2584 = vperm.xlu1 %5007, %v2581_v62   ;;  %vm327_vm4 = vcmp.eq.s32.totalorder %v5808_v58, %v281_v25 }
0x1120   :  { %4789 = vmatmul.mubr.msk.f32.gmra.mxu1 %vm325_vm2, %v5535_v60  ;;  %v284_v13 = vpop.permute.xlu1 %283 }
0x1121   :  { %645 = vmatprep.mubr.f32.mxu1 %v7484_v1  ;;  %vm328_vm5 = vcmp.eq.s32.totalorder %v5808_v58, %v284_v13 }
0x1122   :  { %v287_v4 = vpop.permute.xlu0 %286 }
0x1123   :  { %2587 = vperm.xlu1 %5007, %v2582_v43   ;;  %vm329_vm6 = vcmp.eq.s32.totalorder %v5808_v58, %v287_v4 }
0x1124   :  { %4790 = vmatmul.mubr.msk.f32.gmra.mxu1 %vm326_vm3, %v5535_v60  ;;  %v290_v3 = vpop.permute.xlu1 %289  ;;  %vm2949_vm3 = vcmp.gt.s32.totalorder %v6569_v24, 11 }
0x1125   :  { %651 = vmatprep.mubr.f32.mxu1 %v7484_v1  ;;  %vm330_vm7 = vcmp.eq.s32.totalorder %v5808_v58, %v290_v3 }
0x1126   :  { %v293_v26 = vpop.permute.xlu0 %292 }
0x1127   :  { %vm331_vm8 = vcmp.eq.s32.totalorder %v5808_v58, %v293_v26 }
0x1128   :  { %4791 = vmatmul.mubr.msk.f32.gmra.mxu1 %vm327_vm4, %v5535_v60  ;;  %v296_v30 = vpop.permute.xlu1 %295  ;;  %vm2950_vm4 = vcmp.gt.s32.totalorder %v6589_v35, 11 }
0x1129   :  { %657 = vmatprep.mubr.f32.mxu1 %v7484_v1  ;;  %vm332_vm9 = vcmp.eq.s32.totalorder %v5808_v58, %v296_v30 }
0x112a   :  { %v299_v37 = vpop.permute.xlu0 %298 }
0x112b   :  { %vm333_vm10 = vcmp.eq.s32.totalorder %v5808_v58, %v299_v37 }
0x112c   :  { %4792 = vmatmul.mubr.msk.f32.gmra.mxu1 %vm328_vm5, %v5535_v60  ;;  %v302_v54 = vpop.permute.xlu1 %301 }
0x112d   :  { %663 = vmatprep.mubr.f32.mxu1 %v7484_v1  ;;  %vm334_vm11 = vcmp.eq.s32.totalorder %v5808_v58, %v302_v54 }
0x1130   :  { %4793 = vmatmul.mubr.msk.f32.gmra.mxu1 %vm329_vm6, %v5535_v60 }
0x1131   :  { %669 = vmatprep.mubr.f32.mxu1 %v7484_v1 }
0x1134   :  { %4794 = vmatmul.mubr.msk.f32.gmra.mxu1 %vm330_vm7, %v5535_v60  ;;  %vm3134_vm7 = vcmp.gt.s32.totalorder %v6569_v24, 12 }
0x1135   :  { %675 = vmatprep.mubr.f32.mxu1 %v7484_v1 }
0x1138   :  { %4795 = vmatmul.mubr.msk.f32.gmra.mxu1 %vm331_vm8, %v5535_v60  ;;  %vm3135_vm8 = vcmp.gt.s32.totalorder %v6589_v35, 12 }
0x1139   :  { %681 = vmatprep.mubr.f32.mxu1 %v7484_v1 }
0x113c   :  { %4796 = vmatmul.mubr.msk.f32.gmra.mxu1 %vm332_vm9, %v5535_v60 }
0x113d   :  { %687 = vmatprep.mubr.f32.mxu1 %v7484_v1 }
0x1140   :  { %4797 = vmatmul.mubr.msk.f32.gmra.mxu1 %vm333_vm10, %v5535_v60 }
0x1141   :  { %693 = vmatprep.mubr.f32.mxu1 %v7484_v1 }
0x1144   :  { %4798 = vmatmul.mubr.msk.f32.gmra.mxu1 %vm334_vm11, %v5535_v60  ;;  %vm3319_vm11 = vcmp.gt.s32.totalorder %v6569_v24, 13 }
0x1145   :  { %2518 = vmatprep.mubr.f32.mxu1 %v7484_v1 }
0x1187   :  { %v2447_v51 = vpop.permute.xlu0 %2446 }
0x1188   :  { %4815 = vmatmul.mubr.msk.f32.vlgmr.msra.gmra.mxu1 %vm786_vm12, %v2447_v51 }
0x1189   :  { %2524 = vmatprep.mubr.f32.mxu1 %v7484_v1  ;;  %2841 = vmatpush1.msra.mxu1 %v6424_v52 }
0x118a   :  { %2842 = vmatprep.subr.mxu1 %v6446_v31 }
0x118b   :  { %2843 = vmatpush1.msra.mxu1 %v6452_v7 }
0x118c   :  { %2844 = vmatprep.subr.mxu1 %v6476_v57 }
0x118d   :  { %v2449_v47 = vpop.permute.xlu1 %2448  ;;  %2845 = vmatpush1.msra.mxu1 %v6482_v59 }
0x118e   :  { %4816 = vmatmul.mubr.msk.f32.gmra.mxu1 %vm786_vm12, %v2449_v47  ;;  %2846 = vmatprep.subr.mxu1 %v6496_v63 }
0x118f   :  { %2847 = vmatpush1.msra.mxu1 %v6500_v42  ;;  %2888 = vmatprep.mubr.f32.mxu1 %v7484_v1 }
0x1190   :  { %2848 = vmatprep.subr.mxu1 %v6504_v2 }
0x1191   :  { %2849 = vmatpush1.msra.mxu1 %v6506_v11 }
0x1192   :  { %2850 = vmatprep.subr.mxu1 %v6508_v44 }
0x1193   :  { %2851 = vmatpush1.msra.mxu1 %v6511_v34 }
0x1194   :  { %2852 = vmatprep.subr.mxu1 %v6515_v36 }
0x1195   :  { %2853 = vmatpush1.msra.mxu1 %v6519_v41 }
0x1196   :  { %2854 = vmatprep.subr.mxu1 %v6523_v48 }
0x1197   :  { %2855 = vmatpush1.msra.mxu1 %v6527_v50 }
0x11d0   :  { %v617_v58 = vpop.f32.mrf.mxu1 }
0x11d1   :  { %v618_v49 = vadd.f32 %v617_v58, %v5826_v9 }
0x11d2   :  { %v619_v60 = vpop.f32.mrf.mxu1 }
0x11d4   :  { %v623_v10 = vpop.f32.mrf.mxu1 }
0x11d5   :  { %v624_v32 = vadd.f32 %v623_v10, %v5826_v9 }
0x11d6   :  { %v625_v16 = vpop.f32.mrf.mxu1 }
0x11d7   :  { %v626_v58 = vadd.f32 %v625_v16, %v5831_v33 }
0x11d8   :  { %v6642_v45 = vpop.f32.mrf.mxu1 }
0x11da   :  { %v6644_v18 = vpop.f32.mrf.mxu1 }
0x11dc   :  { %v6646_v17 = vpop.f32.mrf.mxu1 }
0x11de   :  { %v6648_v55 = vpop.f32.mrf.mxu1 }
0x11e0   :  { %v6650_v21 = vpop.f32.mrf.mxu1 }
0x11e2   :  { %v6652_v62 = vpop.f32.mrf.mxu1 }
0x11e4   :  { %v6654_v8 = vpop.f32.mrf.mxu1 }
0x11e6   :  { %v6656_v43 = vpop.f32.mrf.mxu1 }
0x11e8   :  { %v6658_v25 = vpop.f32.mrf.mxu1 }
0x11ea   :  { %v6660_v13 = vpop.f32.mrf.mxu1 }
0x11ec   :  { %v6662_v4 = vpop.f32.mrf.mxu1 }
0x11ee   :  { %v6664_v3 = vpop.f32.mrf.mxu1 }
0x11f0   :  { %v6666_v26 = vpop.f32.mrf.mxu1 }
0x11f2   :  { %v6668_v30 = vpop.f32.mrf.mxu1 }
0x11f4   :  { %v6670_v37 = vpop.f32.mrf.mxu1 }
0x11f6   :  { %v6672_v54 = vpop.f32.mrf.mxu1 }
0x11f8   :  { %v6674_v51 = vpop.f32.mrf.mxu1 }
0x11fa   :  { %v6676_v47 = vpop.f32.mrf.mxu1 }
0x11fc   :  { %v6678_v1 = vpop.f32.mrf.mxu1 }
0x11fe   :  { %v6680_v0 = vpop.f32.mrf.mxu1 }
0x1200   :  { %v6682_v14 = vpop.f32.mrf.mxu1 }
0x1201   :  { %7506 = vst [vmem:[#allocation34_spill] sm:$0xff] %v6682_v14 }
0x1202   :  { %v6684_v6 = vpop.f32.mrf.mxu1 }
0x1203   :  { %7507 = vst [vmem:[#allocation35_spill] sm:$0xff] %v6684_v6  ;;  %v620_v6 = vadd.f32 %v619_v60, %v5831_v33  ;;  %v2585_v60 = vpop.permute.xlu1 %2584 }
0x1204   :  { %v6686_v46 = vpop.f32.mrf.mxu1  ;;  %vm2589_vm13 = vcmp.eq.s32.totalorder %v2585_v60, 1 }
0x1205   :  { %7508 = vst [vmem:[#allocation36_spill] sm:$0xff] %v6686_v46 }
0x1206   :  { %v6688_v28 = vpop.f32.mrf.mxu1 }
0x1207   :  { %7509 = vst [vmem:[#allocation37_spill] sm:$0xff] %v6688_v28 }
0x1248   :  { %v2520_v19 = vpop.f32.mrf.mxu1 }
0x1249   :  { %v2531_v22 = vadd.f32 %v2520_v19, %v618_v49 }
0x124a   :  { %v2522_v20 = vpop.f32.mrf.mxu1 }
0x124b   :  { %v2535_v15 = vsub.f32 0.0, %v2531_v22  ;;  %v2532_v46 = vadd.f32 %v2522_v20, %v620_v6 }
0x124d   :  { %v2537_v53 = vmul.f32 1.442695, %v2535_v15  ;;  %v2549_v20 = vsub.f32 0.0, %v2532_v46 }
0x124e   :  { %v2526_v27 = vpop.f32.mrf.mxu1 }
0x124f   :  { %5224 = vpow2.f32 %v2537_v53  ;;  %v2533_v29 = vadd.f32 %v2526_v27, %v624_v32 }
0x1250   :  { %v2528_v12 = vpop.f32.mrf.mxu1 }
0x1251   :  { %v2536_v38 = vsub.f32 0.0, %v2533_v29  ;;  %v2534_v49 = vadd.f32 %v2528_v12, %v626_v58 }
0x1253   :  { %v2539_v14 = vmul.f32 1.442695, %v2536_v38  ;;  %v2550_v38 = vsub.f32 0.0, %v2534_v49 }
0x1255   :  { %5226 = vpow2.f32 %v2539_v14 }
0x1256   :  { %5228 = vtanh.f32 %v2532_v46 }
0x125c   :  { %v5225_v40 = vpop.eup %5224 }
0x125d   :  { %v2541_v28 = vadd.f32 1.0, %v5225_v40  ;;  %v2551_v40 = vmul.f32 1.442695, %v2549_v20 }
0x125f   :  { %5230 = vrcp.f32 %v2541_v28  ;;  %v2553_v28 = vmul.f32 1.442695, %v2550_v38 }
0x1260   :  { %5232 = vtanh.f32 %v2534_v49  ;;  %v2588_v49 = vpop.permute.xlu1 %2587 }
0x1261   :  { %vm2590_vm14 = vcmp.eq.s32.totalorder %v2588_v49, 1  ;;  %v636_v49 = vadd.f32 %v6646_v17, %v5826_v9 }
0x1262   :  { %v5227_v22 = vpop.eup %5226 }
0x1263   :  { %v2542_v19 = vadd.f32 1.0, %v5227_v22  ;;  %v5229_v15 = vpop.eup %5228 }
0x1265   :  { %5234 = vrcp.f32 %v2542_v19 }
0x1266   :  { %5236 = vpow2.f32 %v2551_v40 }
0x1267   :  { %5238 = vpow2.f32 %v2553_v28 }
0x126c   :  { %v5231_v27 = vpop.eup %5230 }
0x126d   :  { %v2563_v29 = vmul.f32 %v5231_v27, %v5229_v15  ;;  %v5233_v53 = vpop.eup %5232  ;;  %v2561_v10 = vmul.f32 %v5231_v27, %v6544_v5 }
0x126f   :  { %2567 = vrot.lane.b32.xlu0 %v2563_v29, %s5536_s27 }
0x1272   :  { %v5235_v32 = vpop.eup %5234 }
0x1273   :  { %v2564_v6 = vmul.f32 %v5235_v32, %v5233_v53  ;;  %v5237_v12 = vpop.eup %5236  ;;  %v2562_v15 = vmul.f32 %v5235_v32, %v6573_v56 }
0x1274   :  { %v2555_v14 = vadd.f32 1.0, %v5237_v12  ;;  %v5239_v58 = vpop.eup %5238 }
0x1275   :  { %2569 = vrot.lane.b32.xlu0 %v2564_v6, %s5536_s27  ;;  %v2556_v46 = vadd.f32 1.0, %v5239_v58  ;;  %v7511_v58 = vmov 0.0  }
0x1276   :  { %5240 = vrcp.f32 %v2555_v14 }
0x1283   :  { %v5241_v6 = vpop.eup %5240 }
0x12e1   :  { %v2568_v16 = vpop.permute.xlu0 %2567 }
0x12e2   :  { %v2573_v22 = vadd.f32 %v2568_v16, %v2561_v10 }
0x12e4   :  { %5242 = vtanh.f32 %v2573_v22  ;;  %v6699_v19 = vsel %vm2589_vm13, %v2573_v22, %v6544_v5 }
0x12e5   :  { %5244 = vrcp.f32 %v2556_v46 }
0x12e7   :  { %v2570_v29 = vpop.permute.xlu0 %2569 }
0x12e8   :  { %v2574_v53 = vadd.f32 %v2570_v29, %v2562_v15 }
0x12ea   :  { %5246 = vtanh.f32 %v2574_v53  ;;  %v6703_v27 = vsel %vm2590_vm14, %v2574_v53, %v6573_v56 }
0x12f1   :  { %v5243_v20 = vpop.eup %5242 }
0x12f2   :  { %v2577_v40 = vmul.f32 %v5243_v20, %v5241_v6  ;;  %v5245_v32 = vpop.eup %5244 }
0x12f4   :  { %v6707_v38 = vsel %vm2589_vm13, %v2577_v40, %v6555_v61  ;;  %v6710_v5 = vsel %vm2589_vm13, %v2577_v40, 0.0  ;;  %v7510_v61 = vmov 0   ;;  %v632_v40 = vadd.f32 %v6644_v18, %v5831_v33 }
0x12f5   :  { %2631 = vrot.lane.b32.xlu0 %v6707_v38, %s5536_s27  ;;  %v2766_v60 = vsel %vm2764_vm15, 1, %v7510_v61  ;;  %v2767_v10 = vsel %vm2765_vm0, 1, %v7510_v61  ;;  %vm3320_vm13 = vcmp.gt.s32.totalorder %v6589_v35, 13 }
0x12f7   :  { %v5247_v28 = vpop.eup %5246 }
0x12f8   :  { %v2578_v12 = vmul.f32 %v5247_v28, %v5245_v32 }
0x12fa   :  { %v6716_v56 = vsel %vm2590_vm14, %v2578_v12, %v6578_v23  ;;  %v6718_v14 = vsel %vm2590_vm14, %v2578_v12, 0.0 }
0x12fb   :  { %2633 = vrot.lane.b32.xlu1 %v6716_v56, %s5536_s27 }
0x12ff   :  { %2769 = vperm.xlu1 %5007, %v2766_v60   ;;  %v638_v60 = vadd.f32 %v6648_v55, %v5831_v33 }
0x1303   :  { %2772 = vperm.xlu1 %5007, %v2767_v10  }
0x1367   :  { %v2632_v16 = vpop.permute.xlu0 %2631 }
0x1368   :  { %4817 = vmatmul.mubr.msk.f32.vlgmr.msra.gmra.mxu0 %vm786_vm12, %v2632_v16 }
0x1369   :  { %2709 = vmatprep.mubr.f32.mxu0 %v7511_v58  ;;  %3026 = vmatpush1.msra.mxu0 %v6424_v52  ;;  %v630_v52 = vadd.f32 %v6642_v45, %v5826_v9 }
0x136a   :  { %3027 = vmatprep.subr.mxu0 %v6446_v31 }
0x136b   :  { %3028 = vmatpush1.msra.mxu0 %v6452_v7 }
0x136c   :  { %3029 = vmatprep.subr.mxu0 %v6476_v57 }
0x136d   :  { %v2634_v23 = vpop.permute.xlu1 %2633  ;;  %3030 = vmatpush1.msra.mxu0 %v6482_v59 }
0x136e   :  { %4818 = vmatmul.mubr.msk.f32.gmra.mxu0 %vm786_vm12, %v2634_v23  ;;  %3031 = vmatprep.subr.mxu0 %v6496_v63 }
0x136f   :  { %3032 = vmatpush1.msra.mxu0 %v6500_v42  ;;  %3073 = vmatprep.mubr.f32.mxu0 %v7511_v58 }
0x1370   :  { %3033 = vmatprep.subr.mxu0 %v6504_v2 }
0x1371   :  { %3034 = vmatpush1.msra.mxu0 %v6506_v11 }
0x1372   :  { %3035 = vmatprep.subr.mxu0 %v6508_v44 }
0x1373   :  { %3036 = vmatpush1.msra.mxu0 %v6511_v34 }
0x1374   :  { %3037 = vmatprep.subr.mxu0 %v6515_v36 }
0x1375   :  { %3038 = vmatpush1.msra.mxu0 %v6519_v41 }
0x1376   :  { %3039 = vmatprep.subr.mxu0 %v6523_v48 }
0x1377   :  { %3040 = vmatpush1.msra.mxu0 %v6527_v50 }
0x1428   :  { %v2705_v31 = vpop.f32.mrf.mxu0 }
0x1429   :  { %v2716_v7 = vadd.f32 %v2705_v31, %v630_v52 }
0x142a   :  { %v2707_v46 = vpop.f32.mrf.mxu0 }
0x142b   :  { %v2720_v22 = vsub.f32 0.0, %v2716_v7  ;;  %v2717_v32 = vadd.f32 %v2707_v46, %v632_v40 }
0x142d   :  { %v2722_v15 = vmul.f32 1.442695, %v2720_v22  ;;  %v2734_v46 = vsub.f32 0.0, %v2717_v32 }
0x142e   :  { %v2711_v29 = vpop.f32.mrf.mxu0 }
0x142f   :  { %5248 = vpow2.f32 %v2722_v15  ;;  %v2718_v53 = vadd.f32 %v2711_v29, %v636_v49  ;;  %v2736_v49 = vmul.f32 1.442695, %v2734_v46 }
0x1430   :  { %v2713_v12 = vpop.f32.mrf.mxu0 }
0x1431   :  { %v2721_v6 = vsub.f32 0.0, %v2718_v53  ;;  %v2719_v17 = vadd.f32 %v2713_v12, %v638_v60 }
0x1433   :  { %v2724_v20 = vmul.f32 1.442695, %v2721_v6  ;;  %v2735_v55 = vsub.f32 0.0, %v2719_v17  ;;  %v2770_v6 = vpop.permute.xlu1 %2769 }
0x1434   :  { %vm2774_vm1 = vcmp.eq.s32.totalorder %v2770_v6, 1 }
0x1435   :  { %5250 = vpow2.f32 %v2724_v20  ;;  %v2738_v15 = vmul.f32 1.442695, %v2735_v55 }
0x1436   :  { %5252 = vtanh.f32 %v2717_v32 }
0x1437   :  { %v2773_v60 = vpop.permute.xlu1 %2772 }
0x1438   :  { %vm2775_vm2 = vcmp.eq.s32.totalorder %v2773_v60, 1 }
0x143c   :  { %v5249_v28 = vpop.eup %5248 }
0x143d   :  { %v2726_v45 = vadd.f32 1.0, %v5249_v28 }
0x143f   :  { %5254 = vrcp.f32 %v2726_v45 }
0x1440   :  { %5256 = vtanh.f32 %v2719_v17 }
0x1442   :  { %v5251_v10 = vpop.eup %5250 }
0x1443   :  { %v2727_v16 = vadd.f32 1.0, %v5251_v10  ;;  %v5253_v23 = vpop.eup %5252 }
0x1445   :  { %5258 = vrcp.f32 %v2727_v16 }
0x1446   :  { %5260 = vpow2.f32 %v2736_v49 }
0x1447   :  { %5262 = vpow2.f32 %v2738_v15  ;;  %v2952_v15 = vsel %vm2950_vm4, 1, %v7510_v61 }
0x144c   :  { %v5255_v52 = vpop.eup %5254 }
0x144d   :  { %v2748_v31 = vmul.f32 %v5255_v52, %v5253_v23  ;;  %v5257_v18 = vpop.eup %5256  ;;  %v2746_v20 = vmul.f32 %v5255_v52, %v6699_v19 }
0x144f   :  { %2752 = vrot.lane.b32.xlu0 %v2748_v31, %s5536_s27 }
0x1452   :  { %v5259_v7 = vpop.eup %5258 }
0x1453   :  { %v2749_v22 = vmul.f32 %v5259_v7, %v5257_v18  ;;  %v5261_v29 = vpop.eup %5260  ;;  %v2747_v17 = vmul.f32 %v5259_v7, %v6703_v27 }
0x1454   :  { %v2740_v53 = vadd.f32 1.0, %v5261_v29  ;;  %v5263_v28 = vpop.eup %5262 }
0x1455   :  { %2754 = vrot.lane.b32.xlu0 %v2749_v22, %s5536_s27  ;;  %v2741_v32 = vadd.f32 1.0, %v5263_v28 }
0x1456   :  { %5264 = vrcp.f32 %v2740_v53  ;;  %v642_v53 = vadd.f32 %v6650_v21, %v5826_v9 }
0x1463   :  { %v5265_v52 = vpop.eup %5264 }
0x14c1   :  { %v2753_v40 = vpop.permute.xlu0 %2752 }
0x14c2   :  { %v2758_v45 = vadd.f32 %v2753_v40, %v2746_v20 }
0x14c4   :  { %5266 = vtanh.f32 %v2758_v45  ;;  %v6757_v12 = vsel %vm2774_vm1, %v2758_v45, %v6699_v19  ;;  %v648_v45 = vadd.f32 %v6654_v8, %v5826_v9 }
0x14c5   :  { %5268 = vrcp.f32 %v2741_v32 }
0x14c7   :  { %v2755_v10 = vpop.permute.xlu0 %2754 }
0x14c8   :  { %v2759_v16 = vadd.f32 %v2755_v10, %v2747_v17 }
0x14ca   :  { %5270 = vtanh.f32 %v2759_v16  ;;  %v6761_v23 = vsel %vm2775_vm2, %v2759_v16, %v6703_v27 }
0x14d1   :  { %v5267_v31 = vpop.eup %5266 }
0x14d2   :  { %v2762_v18 = vmul.f32 %v5267_v31, %v5265_v52  ;;  %v5269_v7 = vpop.eup %5268  ;;  %v644_v52 = vadd.f32 %v6652_v62, %v5831_v33 }
0x14d4   :  { %v6765_v22 = vsel %vm2774_vm1, %v2762_v18, %v6707_v38  ;;  %v6768_v19 = vsel %vm2774_vm1, %v2762_v18, 0.0  ;;  %v2951_v38 = vsel %vm2949_vm3, 1, %v7510_v61 }
0x14d5   :  { %2816 = vrot.lane.b32.xlu0 %v6765_v22, %s5536_s27 }
0x14d7   :  { %v5271_v46 = vpop.eup %5270 }
0x14d8   :  { %v2763_v49 = vmul.f32 %v5271_v46, %v5269_v7  ;;  %v650_v46 = vadd.f32 %v6656_v43, %v5831_v33 }
0x14da   :  { %v6774_v27 = vsel %vm2775_vm2, %v2763_v49, %v6716_v56  ;;  %v6776_v55 = vsel %vm2775_vm2, %v2763_v49, 0.0 }
0x14db   :  { %2818 = vrot.lane.b32.xlu1 %v6774_v27, %s5536_s27 }
0x14df   :  { %2954 = vperm.xlu1 %5007, %v2951_v38  }
0x14e3   :  { %2957 = vperm.xlu1 %5007, %v2952_v15  }
0x1547   :  { %v2817_v29 = vpop.permute.xlu0 %2816 }
0x1548   :  { %4819 = vmatmul.mubr.msk.f32.vlgmr.msra.gmra.mxu1 %vm786_vm12, %v2817_v29 }
0x1549   :  { %2894 = vmatprep.mubr.f32.mxu1 %v7511_v58 }
0x154d   :  { %v2819_v56 = vpop.permute.xlu1 %2818 }
0x154e   :  { %4820 = vmatmul.mubr.msk.f32.gmra.mxu1 %vm786_vm12, %v2819_v56 }
0x154f   :  { %3258 = vmatprep.mubr.f32.mxu1 %v7511_v58 }
0x1608   :  { %v2890_v6 = vpop.f32.mrf.mxu1 }
0x1609   :  { %v2901_v20 = vadd.f32 %v2890_v6, %v642_v53 }
0x160a   :  { %v2892_v28 = vpop.f32.mrf.mxu1 }
0x160b   :  { %v2905_v40 = vsub.f32 0.0, %v2901_v20  ;;  %v2902_v31 = vadd.f32 %v2892_v28, %v644_v52 }
0x160d   :  { %v2907_v32 = vmul.f32 1.442695, %v2905_v40  ;;  %v2919_v20 = vsub.f32 0.0, %v2902_v31 }
0x160e   :  { %v2896_v60 = vpop.f32.mrf.mxu1 }
0x160f   :  { %5272 = vpow2.f32 %v2907_v32  ;;  %v2903_v17 = vadd.f32 %v2896_v60, %v648_v45  ;;  %v2921_v40 = vmul.f32 1.442695, %v2919_v20  ;;  %v2955_v60 = vpop.permute.xlu1 %2954 }
0x1610   :  { %v2898_v7 = vpop.f32.mrf.mxu1  ;;  %vm2959_vm5 = vcmp.eq.s32.totalorder %v2955_v60, 1 }
0x1611   :  { %v2906_v10 = vsub.f32 0.0, %v2903_v17  ;;  %v2904_v8 = vadd.f32 %v2898_v7, %v650_v46 }
0x1613   :  { %v2909_v16 = vmul.f32 1.442695, %v2906_v10  ;;  %v2920_v43 = vsub.f32 0.0, %v2904_v8 }
0x1615   :  { %5274 = vpow2.f32 %v2909_v16  ;;  %v2923_v28 = vmul.f32 1.442695, %v2920_v43 }
0x1616   :  { %5276 = vtanh.f32 %v2902_v31 }
0x161c   :  { %v5273_v18 = vpop.eup %5272 }
0x161d   :  { %v2911_v21 = vadd.f32 1.0, %v5273_v18 }
0x161f   :  { %5278 = vrcp.f32 %v2911_v21  ;;  %v2958_v21 = vpop.permute.xlu1 %2957 }
0x1620   :  { %5280 = vtanh.f32 %v2904_v8  ;;  %vm2960_vm6 = vcmp.eq.s32.totalorder %v2958_v21, 1 }
0x1622   :  { %v5275_v49 = vpop.eup %5274 }
0x1623   :  { %v2912_v38 = vadd.f32 1.0, %v5275_v49  ;;  %v5277_v15 = vpop.eup %5276 }
0x1625   :  { %5282 = vrcp.f32 %v2912_v38 }
0x1626   :  { %5284 = vpow2.f32 %v2921_v40  ;;  %v3137_v40 = vsel %vm3135_vm8, 1, %v7510_v61 }
0x1627   :  { %5286 = vpow2.f32 %v2923_v28  ;;  %v654_v28 = vadd.f32 %v6658_v25, %v5826_v9 }
0x162c   :  { %v5279_v29 = vpop.eup %5278 }
0x162d   :  { %v2933_v56 = vmul.f32 %v5279_v29, %v5277_v15  ;;  %v5281_v62 = vpop.eup %5280  ;;  %v2931_v17 = vmul.f32 %v5279_v29, %v6757_v12 }
0x162f   :  { %2937 = vrot.lane.b32.xlu0 %v2933_v56, %s5536_s27 }
0x1632   :  { %v5283_v53 = vpop.eup %5282 }
0x1633   :  { %v2934_v6 = vmul.f32 %v5283_v53, %v5281_v62  ;;  %v5285_v45 = vpop.eup %5284  ;;  %v2932_v7 = vmul.f32 %v5283_v53, %v6761_v23 }
0x1634   :  { %v2925_v32 = vadd.f32 1.0, %v5285_v45  ;;  %v5287_v16 = vpop.eup %5286 }
0x1635   :  { %2939 = vrot.lane.b32.xlu0 %v2934_v6, %s5536_s27  ;;  %v2926_v31 = vadd.f32 1.0, %v5287_v16 }
0x1636   :  { %5288 = vrcp.f32 %v2925_v32 }
0x1643   :  { %v5289_v38 = vpop.eup %5288 }
0x16a1   :  { %v2938_v10 = vpop.permute.xlu0 %2937 }
0x16a2   :  { %v2943_v52 = vadd.f32 %v2938_v10, %v2931_v17  ;;  %v660_v10 = vadd.f32 %v6662_v4, %v5826_v9 }
0x16a4   :  { %5290 = vtanh.f32 %v2943_v52  ;;  %v6800_v18 = vsel %vm2959_vm5, %v2943_v52, %v6757_v12 }
0x16a5   :  { %5292 = vrcp.f32 %v2926_v31 }
0x16a7   :  { %v2940_v46 = vpop.permute.xlu0 %2939 }
0x16a8   :  { %v2944_v8 = vadd.f32 %v2940_v46, %v2932_v7  ;;  %v656_v46 = vadd.f32 %v6660_v13, %v5831_v33 }
0x16aa   :  { %5294 = vtanh.f32 %v2944_v8  ;;  %v6804_v49 = vsel %vm2960_vm6, %v2944_v8, %v6761_v23 }
0x16b1   :  { %v5291_v15 = vpop.eup %5290 }
0x16b2   :  { %v2947_v29 = vmul.f32 %v5291_v15, %v5289_v38  ;;  %v5293_v62 = vpop.eup %5292 }
0x16b4   :  { %v6808_v56 = vsel %vm2959_vm5, %v2947_v29, %v6765_v22  ;;  %v6811_v12 = vsel %vm2959_vm5, %v2947_v29, 0.0  ;;  %v3136_v22 = vsel %vm3134_vm7, 1, %v7510_v61  ;;  %v662_v29 = vadd.f32 %v6664_v3, %v5831_v33  ;;  %v5396_v3 = vld [vmem:[#allocation7 + $0x68] sm:$0xff] }
0x16b5   :  { %3001 = vrot.lane.b32.xlu0 %v6808_v56, %s5536_s27 }
0x16b7   :  { %v5295_v53 = vpop.eup %5294 }
0x16b8   :  { %v2948_v6 = vmul.f32 %v5295_v53, %v5293_v62 }
0x16ba   :  { %v6817_v23 = vsel %vm2960_vm6, %v2948_v6, %v6774_v27  ;;  %v6819_v20 = vsel %vm2960_vm6, %v2948_v6, 0.0 }
0x16bb   :  { %3003 = vrot.lane.b32.xlu1 %v6817_v23, %s5536_s27 }
0x16bf   :  { %3139 = vperm.xlu1 %5007, %v3136_v22  }
0x16c3   :  { %3142 = vperm.xlu1 %5007, %v3137_v40  }
0x1727   :  { %v3002_v43 = vpop.permute.xlu0 %3001 }
0x1728   :  { %4821 = vmatmul.mubr.msk.f32.vlgmr.msra.gmra.mxu0 %vm786_vm12, %v3002_v43 }
0x1729   :  { %3079 = vmatprep.mubr.f32.mxu0 %v7511_v58 }
0x172d   :  { %v3004_v27 = vpop.permute.xlu1 %3003 }
0x172e   :  { %4822 = vmatmul.mubr.msk.f32.gmra.mxu0 %vm786_vm12, %v3004_v27 }
0x172f   :  { %3443 = vmatprep.mubr.f32.mxu0 %v7511_v58 }
0x17e8   :  { %v3075_v45 = vpop.f32.mrf.mxu0 }
0x17e9   :  { %v3086_v32 = vadd.f32 %v3075_v45, %v654_v28  ;;  %v3183_v28 = vld [vmem:[#allocation7 + $0x78] sm:$0xff]  ;;  %v6840_v45 = vld [vmem:[#allocation7 + $0x70] sm:$0xff] }
0x17ea   :  { %v3077_v17 = vpop.f32.mrf.mxu0  ;;  %3210 = vmatprep.subr.mxu1 %v3183_v28  ;;  %3395 = vmatprep.subr.mxu0 %v3183_v28 }
0x17eb   :  { %v3090_v60 = vsub.f32 0.0, %v3086_v32  ;;  %v3087_v8 = vadd.f32 %v3077_v17, %v656_v46  ;;  %3211 = vmatpush1.msra.mxu1 %v6840_v45  ;;  %3396 = vmatpush1.msra.mxu0 %v6840_v45  ;;  %v5397_v32 = vld [vmem:[#allocation7 + $0x60] sm:$0xff] }
0x17ec   :  { %3212 = vmatprep.subr.mxu1 %v5396_v3  ;;  %v668_v3 = vadd.f32 %v6668_v30, %v5831_v33 }
0x17ed   :  { %v3092_v16 = vmul.f32 1.442695, %v3090_v60  ;;  %3213 = vmatpush1.msra.mxu1 %v5397_v32 }
0x17ee   :  { %v3081_v52 = vpop.f32.mrf.mxu0  ;;  %3214 = vmatprep.subr.mxu1 %v6476_v57  ;;  %v3104_v57 = vsub.f32 0.0, %v3087_v8 }
0x17ef   :  { %5296 = vpow2.f32 %v3092_v16  ;;  %v3088_v31 = vadd.f32 %v3081_v52, %v660_v10  ;;  %3215 = vmatpush1.msra.mxu1 %v6482_v59 }
0x17f0   :  { %v3083_v15 = vpop.f32.mrf.mxu0  ;;  %3216 = vmatprep.subr.mxu1 %v6496_v63  ;;  %v3106_v59 = vmul.f32 1.442695, %v3104_v57 }
0x17f1   :  { %v3091_v21 = vsub.f32 0.0, %v3088_v31  ;;  %v3089_v4 = vadd.f32 %v3083_v15, %v662_v29  ;;  %3217 = vmatpush1.msra.mxu1 %v6500_v42 }
0x17f2   :  { %3218 = vmatprep.subr.mxu1 %v6504_v2 }
0x17f3   :  { %v3094_v7 = vmul.f32 1.442695, %v3091_v21  ;;  %3219 = vmatpush1.msra.mxu1 %v6506_v11  ;;  %v3105_v63 = vsub.f32 0.0, %v3089_v4 }
0x17f4   :  { %3220 = vmatprep.subr.mxu1 %v6508_v44  ;;  %v3140_v44 = vpop.permute.xlu1 %3139 }
0x17f5   :  { %5298 = vpow2.f32 %v3094_v7  ;;  %3221 = vmatpush1.msra.mxu1 %v6511_v34  ;;  %v3108_v42 = vmul.f32 1.442695, %v3105_v63  ;;  %vm3144_vm9 = vcmp.eq.s32.totalorder %v3140_v44, 1  ;;  %v674_v63 = vadd.f32 %v6672_v54, %v5831_v33  ;;  %v3366_v54 = vld [vmem:[#allocation7 + $0x68] sm:$0xff] }
0x17f6   :  { %5300 = vtanh.f32 %v3087_v8  ;;  %3222 = vmatprep.subr.mxu1 %v6515_v36  ;;  %3397 = vmatprep.subr.mxu0 %v3366_v54 }
0x17f7   :  { %3223 = vmatpush1.msra.mxu1 %v6519_v41 }
0x17f8   :  { %3224 = vmatprep.subr.mxu1 %v6523_v48 }
0x17f9   :  { %3225 = vmatpush1.msra.mxu1 %v6527_v50  ;;  %v3143_v50 = vpop.permute.xlu1 %3142 }
0x17fa   :  { %3580 = vmatprep.subr.mxu1 %v3183_v28  ;;  %vm3145_vm10 = vcmp.eq.s32.totalorder %v3143_v50, 1  ;;  %v3363_v50 = vld [vmem:[#allocation7 + $0x50] sm:$0xff] }
0x17fc   :  { %v5297_v38 = vpop.eup %5296 }
0x17fd   :  { %v3096_v25 = vadd.f32 1.0, %v5297_v38 }
0x17ff   :  { %5302 = vrcp.f32 %v3096_v25 }
0x1800   :  { %5304 = vtanh.f32 %v3089_v4  ;;  %v3322_v4 = vsel %vm3320_vm13, 1, %v7510_v61 }
0x1802   :  { %v5299_v62 = vpop.eup %5298 }
0x1803   :  { %v3097_v53 = vadd.f32 1.0, %v5299_v62  ;;  %v5301_v6 = vpop.eup %5300 }
0x1805   :  { %5306 = vrcp.f32 %v3097_v53 }
0x1806   :  { %5308 = vpow2.f32 %v3106_v59 }
0x1807   :  { %5310 = vpow2.f32 %v3108_v42 }
0x180c   :  { %v5303_v22 = vpop.eup %5302 }
0x180d   :  { %v3118_v40 = vmul.f32 %v5303_v22, %v5301_v6  ;;  %v5305_v13 = vpop.eup %5304  ;;  %v3116_v34 = vmul.f32 %v5303_v22, %v6800_v18 }
0x180f   :  { %3122 = vrot.lane.b32.xlu0 %v3118_v40, %s5536_s27  ;;  %v672_v40 = vadd.f32 %v6670_v37, %v5826_v9 }
0x1812   :  { %v5307_v43 = vpop.eup %5306 }
0x1813   :  { %v3119_v27 = vmul.f32 %v5307_v43, %v5305_v13  ;;  %v5309_v2 = vpop.eup %5308  ;;  %v3117_v10 = vmul.f32 %v5307_v43, %v6804_v49 }
0x1814   :  { %v3110_v11 = vadd.f32 1.0, %v5309_v2  ;;  %v5311_v36 = vpop.eup %5310 }
0x1815   :  { %3124 = vrot.lane.b32.xlu0 %v3119_v27, %s5536_s27  ;;  %v3111_v48 = vadd.f32 1.0, %v5311_v36 }
0x1816   :  { %5312 = vrcp.f32 %v3110_v11 }
0x1823   :  { %v5313_v21 = vpop.eup %5312 }
0x1881   :  { %v3123_v60 = vpop.permute.xlu0 %3122 }
0x1882   :  { %v3128_v17 = vadd.f32 %v3123_v60, %v3116_v34 }
0x1884   :  { %5314 = vtanh.f32 %v3128_v17  ;;  %v6859_v41 = vsel %vm3144_vm9, %v3128_v17, %v6800_v18  ;;  %v3365_v17 = vld [vmem:[#allocation7 + $0x60] sm:$0xff] }
0x1885   :  { %5316 = vrcp.f32 %v3111_v48  ;;  %v3364_v48 = vld [vmem:[#allocation7 + $0x58] sm:$0xff]  ;;  %3398 = vmatpush1.msra.mxu0 %v3365_v17 }
0x1886   :  { %3399 = vmatprep.subr.mxu0 %v3364_v48 }
0x1887   :  { %v3125_v16 = vpop.permute.xlu0 %3124  ;;  %3400 = vmatpush1.msra.mxu0 %v3363_v50 }
0x1888   :  { %v3129_v52 = vadd.f32 %v3125_v16, %v3117_v10  ;;  %v3362_v10 = vld [vmem:[#allocation7 + $0x48] sm:$0xff]  ;;  %v3361_v16 = vld [vmem:[#allocation7 + $0x40] sm:$0xff] }
0x1889   :  { %3401 = vmatprep.subr.mxu0 %v3362_v10 }
0x188a   :  { %5318 = vtanh.f32 %v3129_v52  ;;  %v6863_v31 = vsel %vm3145_vm10, %v3129_v52, %v6804_v49  ;;  %v3360_v52 = vld [vmem:[#allocation7 + $0x38] sm:$0xff]  ;;  %3402 = vmatpush1.msra.mxu0 %v3361_v16 }
0x188b   :  { %3403 = vmatprep.subr.mxu0 %v3360_v52 }
0x1891   :  { %v5315_v7 = vpop.eup %5314 }
0x1892   :  { %v3132_v46 = vmul.f32 %v5315_v7, %v5313_v21  ;;  %v5317_v38 = vpop.eup %5316  ;;  %v3359_v21 = vld [vmem:[#allocation7 + $0x30] sm:$0xff]  ;;  %v3358_v7 = vld [vmem:[#allocation7 + $0x28] sm:$0xff] }
0x1893   :  { %3404 = vmatpush1.msra.mxu0 %v3359_v21 }
0x1894   :  { %v6867_v8 = vsel %vm3144_vm9, %v3132_v46, %v6808_v56  ;;  %v6870_v18 = vsel %vm3144_vm9, %v3132_v46, 0.0  ;;  %v3321_v56 = vsel %vm3319_vm11, 1, %v7510_v61  ;;  %v3357_v46 = vld [vmem:[#allocation7 + $0x20] sm:$0xff]  ;;  %3405 = vmatprep.subr.mxu0 %v3358_v7 }
0x1895   :  { %3186 = vrot.lane.b32.xlu0 %v6867_v8, %s5536_s27  ;;  %3406 = vmatpush1.msra.mxu0 %v3357_v46 }
0x1897   :  { %v5319_v25 = vpop.eup %5318 }
0x1898   :  { %v3133_v15 = vmul.f32 %v5319_v25, %v5317_v38  ;;  %v3356_v38 = vld [vmem:[#allocation7 + $0x18] sm:$0xff]  ;;  %v3355_v25 = vld [vmem:[#allocation7 + $0x10] sm:$0xff] }
0x1899   :  { %3407 = vmatprep.subr.mxu0 %v3356_v38 }
0x189a   :  { %v6876_v49 = vsel %vm3145_vm10, %v3133_v15, %v6817_v23  ;;  %v6878_v29 = vsel %vm3145_vm10, %v3133_v15, 0.0  ;;  %v666_v23 = vadd.f32 %v6666_v26, %v5826_v9  ;;  %v3354_v15 = vld [vmem:[#allocation7 + $0x8] sm:$0xff]  ;;  %3408 = vmatpush1.msra.mxu0 %v3355_v25 }
0x189b   :  { %3188 = vrot.lane.b32.xlu1 %v6876_v49, %s5536_s27  ;;  %3409 = vmatprep.subr.mxu0 %v3354_v15 }
0x189f   :  { %3324 = vperm.xlu1 %5007, %v3321_v56   ;;  %v3353_v56 = vld [vmem:[#allocation7] sm:$0xff] }
0x18a0   :  { %3410 = vmatpush1.msra.mxu0 %v3353_v56 }
0x18a3   :  { %3327 = vperm.xlu1 %5007, %v3322_v4  }
0x1907   :  { %v3187_v62 = vpop.permute.xlu0 %3186 }
0x1908   :  { %4823 = vmatmul.mubr.msk.f32.vlgmr.msra.gmra.mxu1 %vm786_vm12, %v3187_v62 }
0x1909   :  { %3264 = vmatprep.mubr.f32.mxu1 %v7511_v58  ;;  %3581 = vmatpush1.msra.mxu1 %v6840_v45 }
0x190a   :  { %3582 = vmatprep.subr.mxu1 %v3366_v54 }
0x190b   :  { %3583 = vmatpush1.msra.mxu1 %v3365_v17  ;;  %v678_v17 = vadd.f32 %v6674_v51, %v5826_v9 }
0x190c   :  { %3584 = vmatprep.subr.mxu1 %v3364_v48 }
0x190d   :  { %v3189_v24 = vpop.permute.xlu1 %3188  ;;  %3585 = vmatpush1.msra.mxu1 %v3363_v50 }
0x190e   :  { %4824 = vmatmul.mubr.msk.f32.gmra.mxu1 %vm786_vm12, %v3189_v24  ;;  %3586 = vmatprep.subr.mxu1 %v3362_v10 }
0x190f   :  { %3628 = vmatprep.mubr.f32.mxu1 %v7511_v58  ;;  %3587 = vmatpush1.msra.mxu1 %v3361_v16 }
0x1910   :  { %3588 = vmatprep.subr.mxu1 %v3360_v52  ;;  %v684_v52 = vadd.f32 %v6678_v1, %v5826_v9 }
0x1911   :  { %3589 = vmatpush1.msra.mxu1 %v3359_v21 }
0x1912   :  { %3590 = vmatprep.subr.mxu1 %v3358_v7 }
0x1913   :  { %3591 = vmatpush1.msra.mxu1 %v3357_v46 }
0x1914   :  { %3592 = vmatprep.subr.mxu1 %v3356_v38 }
0x1915   :  { %3593 = vmatpush1.msra.mxu1 %v3355_v25 }
0x1916   :  { %3594 = vmatprep.subr.mxu1 %v3354_v15  ;;  %v680_v15 = vadd.f32 %v6676_v47, %v5831_v33 }
0x1917   :  { %3595 = vmatpush1.msra.mxu1 %v3353_v56 }
0x19c8   :  { %v3260_v35 = vpop.f32.mrf.mxu1 }
0x19c9   :  { %v3271_v53 = vadd.f32 %v3260_v35, %v666_v23 }
0x19ca   :  { %v3262_v22 = vpop.f32.mrf.mxu1 }
0x19cb   :  { %v3275_v6 = vsub.f32 0.0, %v3271_v53  ;;  %v6896_v32 = vadd.f32 %v3262_v22, %v668_v3 }
0x19cd   :  { %v3277_v13 = vmul.f32 1.442695, %v3275_v6  ;;  %v3289_v4 = vsub.f32 0.0, %v6896_v32  ;;  %v3325_v6 = vpop.permute.xlu1 %3324 }
0x19ce   :  { %v3266_v43 = vpop.f32.mrf.mxu1  ;;  %vm3329_vm14 = vcmp.eq.s32.totalorder %v3325_v6, 1 }
0x19cf   :  { %5320 = vpow2.f32 %v3277_v13  ;;  %v3273_v27 = vadd.f32 %v3266_v43, %v672_v40  ;;  %v3291_v62 = vmul.f32 1.442695, %v3289_v4 }
0x19d0   :  { %v3268_v59 = vpop.f32.mrf.mxu1 }
0x19d1   :  { %v3276_v28 = vsub.f32 0.0, %v3273_v27  ;;  %v3274_v37 = vadd.f32 %v3268_v59, %v674_v63 }
0x19d3   :  { %v3279_v45 = vmul.f32 1.442695, %v3276_v28  ;;  %v3290_v24 = vsub.f32 0.0, %v3274_v37 }
0x19d5   :  { %5322 = vpow2.f32 %v3279_v45  ;;  %v3293_v23 = vmul.f32 1.442695, %v3290_v24  ;;  %v3328_v45 = vpop.permute.xlu1 %3327  ;;  %v686_v24 = vadd.f32 %v6680_v0, %v5831_v33 }
0x19d6   :  { %5324 = vtanh.f32 %v6896_v32  ;;  %vm3330_vm15 = vcmp.eq.s32.totalorder %v3328_v45, 1 }
0x19dc   :  { %v5321_v26 = vpop.eup %5320 }
0x19dd   :  { %v3281_v57 = vadd.f32 1.0, %v5321_v26 }
0x19df   :  { %5326 = vrcp.f32 %v3281_v57 }
0x19e0   :  { %5328 = vtanh.f32 %v3274_v37 }
0x19e2   :  { %v5323_v42 = vpop.eup %5322 }
0x19e3   :  { %v3282_v2 = vadd.f32 1.0, %v5323_v42  ;;  %v5325_v11 = vpop.eup %5324 }
0x19e5   :  { %5330 = vrcp.f32 %v3282_v2 }
0x19e6   :  { %5332 = vpow2.f32 %v3291_v62 }
0x19e7   :  { %5334 = vpow2.f32 %v3293_v23 }
0x19ec   :  { %v5327_v44 = vpop.eup %5326 }
0x19ed   :  { %v3303_v34 = vmul.f32 %v5327_v44, %v5325_v11  ;;  %v5329_v30 = vpop.eup %5328  ;;  %v3301_v22 = vmul.f32 %v5327_v44, %v6859_v41 }
0x19ef   :  { %3307 = vrot.lane.b32.xlu0 %v3303_v34, %s5536_s27 }
0x19f2   :  { %v6902_v60 = vpop.eup %5330 }
0x19f3   :  { %v3304_v36 = vmul.f32 %v6902_v60, %v5329_v30  ;;  %v5333_v35 = vpop.eup %5332  ;;  %v3302_v3 = vmul.f32 %v6902_v60, %v6863_v31  ;;  %v6946_v60 = vld [vmem:[%s7472_s1 + $0x8] sm:$0xff] }
0x19f4   :  { %v3295_v53 = vadd.f32 1.0, %v5333_v35  ;;  %v5335_v13 = vpop.eup %5334  ;;  %vm3505_vm1 = vcmp.gt.s32.totalorder %v6946_v60, 14  ;;  %vm3690_vm5 = vcmp.gt.s32.totalorder %v6946_v60, 15  ;;  %v7516_v60 = vld [vmem:[#allocation23_spill] sm:$0xff] }
0x19f5   :  { %3309 = vrot.lane.b32.xlu0 %v3304_v36, %s5536_s27  ;;  %v3296_v28 = vadd.f32 1.0, %v5335_v13  ;;  %v3507_v36 = vsel %vm3505_vm1, 1, %v7510_v61 }
0x19f6   :  { %5336 = vrcp.f32 %v3295_v53 }
0x1a03   :  { %v5337_v59 = vpop.eup %5336 }
0x1a61   :  { %v3308_v40 = vpop.permute.xlu0 %3307 }
0x1a62   :  { %v3313_v43 = vadd.f32 %v3308_v40, %v3301_v22 }
0x1a64   :  { %5338 = vtanh.f32 %v3313_v43  ;;  %v6910_v27 = vsel %vm3329_vm14, %v3313_v43, %v6859_v41 }
0x1a65   :  { %5340 = vrcp.f32 %v3296_v28 }
0x1a67   :  { %v3310_v32 = vpop.permute.xlu0 %3309 }
0x1a68   :  { %v3314_v26 = vadd.f32 %v3310_v32, %v3302_v3 }
0x1a6a   :  { %5342 = vtanh.f32 %v3314_v26  ;;  %v6916_v57 = vsel %vm3330_vm15, %v3314_v26, %v6863_v31  ;;  %v6930_v31 = vld [vmem:[%s7472_s1] sm:$0xff] }
0x1a6b   :  { %vm3504_vm0 = vcmp.gt.s32.totalorder %v6930_v31, 14  ;;  %vm3689_vm4 = vcmp.gt.s32.totalorder %v6930_v31, 15  ;;  %v7512_v31 = vld [vmem:[#allocation24_spill] sm:$0xff] }
0x1a6c   :  { %v3506_v30 = vsel %vm3504_vm0, 1, %v7510_v61 }
0x1a71   :  { %v5339_v63 = vpop.eup %5338 }
0x1a72   :  { %v3317_v37 = vmul.f32 %v5339_v63, %v5337_v59  ;;  %v5341_v2 = vpop.eup %5340 }
0x1a74   :  { %v6920_v41 = vsel %vm3329_vm14, %v3317_v37, %v6867_v8  ;;  %v6923_v42 = vsel %vm3329_vm14, %v3317_v37, 0.0 }
0x1a75   :  { %3371 = vrot.lane.b32.xlu0 %v6920_v41, %s5536_s27 }
0x1a77   :  { %v5343_v11 = vpop.eup %5342 }
0x1a78   :  { %v3318_v44 = vmul.f32 %v5343_v11, %v5341_v2 }
0x1a7a   :  { %v6935_v8 = vsel %vm3330_vm15, %v3318_v44, %v6876_v49  ;;  %v6938_v34 = vsel %vm3330_vm15, %v3318_v44, 0.0 }
0x1a7b   :  { %3373 = vrot.lane.b32.xlu1 %v6935_v8, %s5536_s27 }
0x1a7f   :  { %3509 = vperm.xlu1 %5007, %v3506_v30  }
0x1a83   :  { %3512 = vperm.xlu1 %5007, %v3507_v36  }
0x1ae7   :  { %v3372_v49 = vpop.permute.xlu0 %3371 }
0x1ae8   :  { %4825 = vmatmul.mubr.msk.f32.vlgmr.msra.gmra.mxu0 %vm786_vm12, %v3372_v49 }
0x1ae9   :  { %3449 = vmatprep.mubr.f32.mxu0 %v7511_v58 }
0x1aed   :  { %v3374_v54 = vpop.permute.xlu1 %3373 }
0x1aee   :  { %4826 = vmatmul.mubr.msk.f32.gmra.mxu0 %vm786_vm12, %v3374_v54 }
0x1afa   :  { %v3510_v26 = vpop.permute.xlu1 %3509 }
0x1afb   :  { %vm3514_vm2 = vcmp.eq.s32.totalorder %v3510_v26, 1 }
0x1afe   :  { %v3513_v30 = vpop.permute.xlu1 %3512 }
0x1aff   :  { %vm3515_vm3 = vcmp.eq.s32.totalorder %v3513_v30, 1 }
0x1ba8   :  { %v3445_v48 = vpop.f32.mrf.mxu0 }
0x1ba9   :  { %v3456_v50 = vadd.f32 %v3445_v48, %v678_v17 }
0x1baa   :  { %v3447_v16 = vpop.f32.mrf.mxu0 }
0x1bab   :  { %v3460_v10 = vsub.f32 0.0, %v3456_v50  ;;  %v3457_v56 = vadd.f32 %v3447_v16, %v680_v15  ;;  %v7518_v15 = vld [vmem:[#allocation31_spill] sm:$0xff] }
0x1bad   :  { %v3462_v21 = vmul.f32 1.442695, %v3460_v10  ;;  %v3474_v43 = vsub.f32 0.0, %v3457_v56 }
0x1bae   :  { %v3451_v7 = vpop.f32.mrf.mxu0 }
0x1baf   :  { %5344 = vpow2.f32 %v3462_v21  ;;  %v3458_v46 = vadd.f32 %v3451_v7, %v684_v52  ;;  %v3476_v28 = vmul.f32 1.442695, %v3474_v43 }
0x1bb0   :  { %v3453_v62 = vpop.f32.mrf.mxu0 }
0x1bb1   :  { %v3461_v38 = vsub.f32 0.0, %v3458_v46  ;;  %v3459_v1 = vadd.f32 %v3453_v62, %v686_v24  ;;  %v3691_v46 = vsel %vm3689_vm4, 1, %v7510_v61 }
0x1bb3   :  { %v3464_v25 = vmul.f32 1.442695, %v3461_v38  ;;  %v3475_v0 = vsub.f32 0.0, %v3459_v1  ;;  %v7514_v38 = vld [vmem:[#allocation32_spill] sm:$0xff] }
0x1bb5   :  { %5346 = vpow2.f32 %v3464_v25  ;;  %v3478_v45 = vmul.f32 1.442695, %v3475_v0  ;;  %v7517_v25 = vld [vmem:[#allocation27_spill] sm:$0xff] }
0x1bb6   :  { %5348 = vtanh.f32 %v3457_v56 }
0x1bbc   :  { %v5345_v4 = vpop.eup %5344 }
0x1bbd   :  { %v3466_v51 = vadd.f32 1.0, %v5345_v4 }
0x1bbf   :  { %5350 = vrcp.f32 %v3466_v51 }
0x1bc0   :  { %5352 = vtanh.f32 %v3459_v1 }
0x1bc2   :  { %v5347_v23 = vpop.eup %5346 }
0x1bc3   :  { %v3467_v35 = vadd.f32 1.0, %v5347_v23  ;;  %v5349_v53 = vpop.eup %5348 }
0x1bc5   :  { %5354 = vrcp.f32 %v3467_v35 }
0x1bc6   :  { %5356 = vpow2.f32 %v3476_v28 }
0x1bc7   :  { %5358 = vpow2.f32 %v3478_v45 }
0x1bcc   :  { %v5351_v6 = vpop.eup %5350 }
0x1bcd   :  { %v3488_v22 = vmul.f32 %v5351_v6, %v5349_v53  ;;  %v5353_v47 = vpop.eup %5352  ;;  %v3486_v59 = vmul.f32 %v5351_v6, %v6910_v27 }
0x1bcf   :  { %3492 = vrot.lane.b32.xlu0 %v3488_v22, %s5536_s27 }
0x1bd2   :  { %v5355_v40 = vpop.eup %5354 }
0x1bd3   :  { %v3489_v13 = vmul.f32 %v5355_v40, %v5353_v47  ;;  %v5357_v3 = vpop.eup %5356  ;;  %v3487_v36 = vmul.f32 %v5355_v40, %v6916_v57 }
0x1bd4   :  { %v3480_v32 = vadd.f32 1.0, %v5357_v3  ;;  %v5359_v37 = vpop.eup %5358 }
0x1bd5   :  { %3494 = vrot.lane.b32.xlu0 %v3489_v13, %s5536_s27  ;;  %v3481_v44 = vadd.f32 1.0, %v5359_v37 }
0x1bd6   :  { %5360 = vrcp.f32 %v3480_v32 }
0x1be3   :  { %v5361_v48 = vpop.eup %5360 }
0x1c41   :  { %v3493_v63 = vpop.permute.xlu0 %3492 }
0x1c42   :  { %v3498_v2 = vadd.f32 %v3493_v63, %v3486_v59 }
0x1c44   :  { %5362 = vtanh.f32 %v3498_v2  ;;  %v6966_v11 = vsel %vm3514_vm2, %v3498_v2, %v6910_v27  ;;  %v7519_v2 = vld [vmem:[#allocation34_spill] sm:$0xff] }
0x1c45   :  { %5364 = vrcp.f32 %v3481_v44  ;;  %v690_v44 = vadd.f32 %v7519_v2, %v5826_v9 }
0x1c47   :  { %v3495_v49 = vpop.permute.xlu0 %3494 }
0x1c48   :  { %v3499_v54 = vadd.f32 %v3495_v49, %v3487_v36 }
0x1c4a   :  { %5366 = vtanh.f32 %v3499_v54  ;;  %v6970_v17 = vsel %vm3515_vm3, %v3499_v54, %v6916_v57 }
0x1c51   :  { %v5363_v50 = vpop.eup %5362 }
0x1c52   :  { %v3502_v10 = vmul.f32 %v5363_v50, %v5361_v48  ;;  %v5365_v27 = vpop.eup %5364  ;;  %v7520_v48 = vld [vmem:[#allocation36_spill] sm:$0xff] }
0x1c53   :  { %v696_v50 = vadd.f32 %v7520_v48, %v5826_v9 }
0x1c54   :  { %v6974_v16 = vsel %vm3514_vm2, %v3502_v10, %v6920_v41  ;;  %v3692_v41 = vsel %vm3690_vm5, 1, %v7510_v61  ;;  %v3520_v61 = vsel %vm3514_vm2, %v3502_v10, 0.0 }
0x1c55   :  { %3556 = vrot.lane.b32.xlu0 %v6974_v16, %s5536_s27 }
0x1c57   :  { %v5367_v52 = vpop.eup %5366 }
0x1c58   :  { %v3503_v21 = vmul.f32 %v5367_v52, %v5365_v27 }
0x1c5a   :  { %v6980_v7 = vsel %vm3515_vm3, %v3503_v21, %v6935_v8  ;;  %v6982_v57 = vsel %vm3515_vm3, %v3503_v21, 0.0  ;;  %v7513_v8 = vld [vmem:[#allocation28_spill] sm:$0xff] }
0x1c5b   :  { %3558 = vrot.lane.b32.xlu1 %v6980_v7, %s5536_s27 }
0x1c5f   :  { %3694 = vperm.xlu1 %5007, %v3691_v46  }
0x1c63   :  { %3697 = vperm.xlu1 %5007, %v3692_v41   ;;  %v7521_v41 = vld [vmem:[#allocation35_spill] sm:$0xff] }
0x1c67   :  { %1304 = vrot.lane.b32.xlu1 %v5993_v39, %s5536_s27  ;;  %v7515_v39 = vld [vmem:[#allocation20_spill] sm:$0xff] }
0x1c6b   :  { %1674 = vrot.lane.b32.xlu1 %v7512_v31, %s5536_s27  ;;  %v692_v31 = vadd.f32 %v7521_v41, %v5831_v33 }
0x1c6f   :  { %2044 = vrot.lane.b32.xlu1 %v7513_v8, %s5536_s27 }
0x1c73   :  { %2414 = vrot.lane.b32.xlu1 %v7514_v38, %s5536_s27 }
0x1c77   :  { %2784 = vrot.lane.b32.xlu1 %v6768_v19, %s5536_s27 }
0x1c7b   :  { %3154 = vrot.lane.b32.xlu1 %v6870_v18, %s5536_s27 }
0x1c7f   :  { %3524 = vrot.lane.b32.xlu1 %v3520_v61, %s5536_s27 }
0x1c83   :  { %1121 = vrot.lane.b32.xlu1 %v7515_v39, %s5536_s27 }
0x1c87   :  { %1491 = vrot.lane.b32.xlu1 %v7516_v60, %s5536_s27  ;;  %v7522_v60 = vld [vmem:[#allocation37_spill] sm:$0xff] }
0x1c8b   :  { %1861 = vrot.lane.b32.xlu1 %v7517_v25, %s5536_s27  ;;  %v698_v25 = vadd.f32 %v7522_v60, %v5831_v33  ;;  %v7523_v33 = vld [vmem:[#allocation19_spill] sm:$0xff] }
0x1c8f   :  { %2231 = vrot.lane.b32.xlu1 %v7518_v15, %s5536_s27 }
0x1c93   :  { %2601 = vrot.lane.b32.xlu1 %v6718_v14, %s5536_s27 }
0x1c97   :  { %2971 = vrot.lane.b32.xlu1 %v6819_v20, %s5536_s27 }
0x1c9b   :  { %3341 = vrot.lane.b32.xlu1 %v6938_v34, %s5536_s27  ;;  %v7026_v34 = vld [vmem:[#allocation3] sm:$0xff] }
0x1cc7   :  { %v3557_v19 = vpop.permute.xlu0 %3556 }
0x1cc8   :  { %4827 = vmatmul.mubr.msk.f32.vlgmr.msra.gmra.mxu1 %vm786_vm12, %v3557_v19 }
0x1cc9   :  { %3634 = vmatprep.mubr.f32.mxu1 %v7511_v58 }
0x1ccd   :  { %v3559_v18 = vpop.permute.xlu1 %3558 }
0x1cce   :  { %4828 = vmatmul.mubr.msk.f32.gmra.mxu1 %vm786_vm12, %v3559_v18 }
0x1cda   :  { %v7020_v56 = vpop.permute.xlu1 %3694 }
0x1cdb   :  { %vm3699_vm6 = vcmp.eq.s32.totalorder %v7020_v56, 1 }
0x1cde   :  { %v7022_v4 = vpop.permute.xlu1 %3697 }
0x1cdf   :  { %vm3700_vm7 = vcmp.eq.s32.totalorder %v7022_v4, 1 }
0x1ce2   :  { %v1305_v51 = vpop.permute.xlu1 %1304 }
0x1ce3   :  { %1311 = vst.msk [vmem:[#allocation3 + $0x20] sm:$0xff] %vm786_vm12, %v1305_v51 }
0x1ce6   :  { %v1675_v14 = vpop.permute.xlu1 %1674 }
0x1ce7   :  { %1681 = vst.msk [vmem:[#allocation3 + $0x40] sm:$0xff] %vm786_vm12, %v1675_v14 }
0x1cea   :  { %v2045_v20 = vpop.permute.xlu1 %2044  ;;  %v7028_v62 = vld [vmem:[#allocation3 + $0x20] sm:$0xff] }
0x1ceb   :  { %2051 = vst.msk [vmem:[#allocation3 + $0x60] sm:$0xff] %vm786_vm12, %v2045_v20  ;;  %v3771_v58 = vcombine.high %v7026_v34, %v7028_v62 }
0x1cee   :  { %v2415_v24 = vpop.permute.xlu1 %2414  ;;  %v7034_v23 = vld [vmem:[#allocation3 + $0x40] sm:$0xff] }
0x1cef   :  { %2421 = vst.msk [vmem:[#allocation3 + $0x80] sm:$0xff] %vm786_vm12, %v2415_v24 }
0x1cf2   :  { %v2785_v1 = vpop.permute.xlu1 %2784  ;;  %v7036_v35 = vld [vmem:[#allocation3 + $0x60] sm:$0xff] }
0x1cf3   :  { %2791 = vst.msk [vmem:[#allocation3 + $0xa0] sm:$0xff] %vm786_vm12, %v2785_v1  ;;  %v3803_v53 = vcombine.high %v7034_v23, %v7036_v35  ;;  %v3802_v4 = vcombine.low %v7034_v23, %v7036_v35 }
0x1cf6   :  { %v3155_v6 = vpop.permute.xlu1 %3154 }
0x1cf7   :  { %3161 = vst.msk [vmem:[#allocation3 + $0xc0] sm:$0xff] %vm786_vm12, %v3155_v6 }
0x1cfa   :  { %v3525_v22 = vpop.permute.xlu1 %3524 }
0x1cfb   :  { %3531 = vst.msk [vmem:[#allocation3 + $0xe0] sm:$0xff] %vm786_vm12, %v3525_v22 }
0x1cfe   :  { %v1122_v47 = vpop.permute.xlu1 %1121 }
0x1cff   :  { %1127 = vst.msk [vmem:[#allocation3 + $0x18] sm:$0xff] %vm786_vm12, %v1122_v47  ;;  %v7524_v47 = vld [vmem:[#allocation22_spill] sm:$0xff] }
0x1d02   :  { %v1492_v40 = vpop.permute.xlu1 %1491 }
0x1d03   :  { %1497 = vst.msk [vmem:[#allocation3 + $0x38] sm:$0xff] %vm786_vm12, %v1492_v40  ;;  %v7525_v40 = vld [vmem:[#allocation26_spill] sm:$0xff] }
0x1d06   :  { %v1862_v13 = vpop.permute.xlu1 %1861  ;;  %v7046_v28 = vld [vmem:[#allocation3 + $0x18] sm:$0xff] }
0x1d07   :  { %1867 = vst.msk [vmem:[#allocation3 + $0x58] sm:$0xff] %vm786_vm12, %v1862_v13  ;;  %v7526_v13 = vld [vmem:[#allocation30_spill] sm:$0xff] }
0x1d0a   :  { %v2232_v43 = vpop.permute.xlu1 %2231  ;;  %v7048_v0 = vld [vmem:[#allocation3 + $0x38] sm:$0xff] }
0x1d0b   :  { %2237 = vst.msk [vmem:[#allocation3 + $0x78] sm:$0xff] %vm786_vm12, %v2232_v43  ;;  %v4059_v45 = vcombine.high %v7046_v28, %v7048_v0  ;;  %v7527_v43 = vld [vmem:[#allocation21_spill] sm:$0xff] }
0x1d0e   :  { %v2602_v3 = vpop.permute.xlu1 %2601  ;;  %v7054_v26 = vld [vmem:[#allocation3 + $0x58] sm:$0xff] }
0x1d0f   :  { %2607 = vst.msk [vmem:[#allocation3 + $0x98] sm:$0xff] %vm786_vm12, %v2602_v3  ;;  %v7528_v3 = vld [vmem:[#allocation25_spill] sm:$0xff] }
0x1d12   :  { %v2972_v32 = vpop.permute.xlu1 %2971  ;;  %v7056_v59 = vld [vmem:[#allocation3 + $0x78] sm:$0xff] }
0x1d13   :  { %2977 = vst.msk [vmem:[#allocation3 + $0xb8] sm:$0xff] %vm786_vm12, %v2972_v32  ;;  %v4091_v63 = vcombine.high %v7054_v26, %v7056_v59  ;;  %v7529_v32 = vld [vmem:[#allocation29_spill] sm:$0xff] }
0x1d16   :  { %v3342_v37 = vpop.permute.xlu1 %3341 }
0x1d17   :  { %3347 = vst.msk [vmem:[#allocation3 + $0xd8] sm:$0xff] %vm786_vm12, %v3342_v37 }
0x1d88   :  { %v3630_v30 = vpop.f32.mrf.mxu1 }
0x1d89   :  { %v3641_v36 = vadd.f32 %v3630_v30, %v690_v44 }
0x1d8a   :  { %v3632_v54 = vpop.f32.mrf.mxu1 }
0x1d8b   :  { %v3645_v49 = vsub.f32 0.0, %v3641_v36  ;;  %v3642_v8 = vadd.f32 %v3632_v54, %v692_v31  ;;  %v4319_v31 = vld [vmem:[%s7479_s8 + $0x28] sm:$0xff] }
0x1d8d   :  { %v3647_v10 = vmul.f32 1.442695, %v3645_v49  ;;  %v3659_v37 = vsub.f32 0.0, %v3642_v8 }
0x1d8e   :  { %v3636_v27 = vpop.f32.mrf.mxu1 }
0x1d8f   :  { %5368 = vpow2.f32 %v3647_v10  ;;  %v3643_v52 = vadd.f32 %v3636_v27, %v696_v50  ;;  %v3661_v2 = vmul.f32 1.442695, %v3659_v37  ;;  %v4321_v27 = vld [vmem:[%s7479_s8 + $0x38] sm:$0xff] }
0x1d90   :  { %v3638_v39 = vpop.f32.mrf.mxu1  ;;  %4910 = vmatprep.subr.mxu0 %v4321_v27  ;;  %4974 = vmatprep.subr.mxu1 %v4321_v27 }
0x1d91   :  { %v3646_v21 = vsub.f32 0.0, %v3643_v52  ;;  %v3644_v9 = vadd.f32 %v3638_v39, %v698_v25  ;;  %4911 = vmatpush3.msra.mxu0 %v4321_v27  ;;  %4982 = vmatpush3.msra.mxu1 %v4321_v27  ;;  %v4317_v25 = vld [vmem:[%s7479_s8 + $0x18] sm:$0xff] }
0x1d93   :  { %v3649_v46 = vmul.f32 1.442695, %v3646_v21  ;;  %v3660_v44 = vsub.f32 0.0, %v3644_v9  ;;  %v4320_v21 = vld [vmem:[%s7479_s8 + $0x30] sm:$0xff] }
0x1d94   :  { %4912 = vmatprep.subr.mxu0 %v4320_v21  ;;  %4975 = vmatprep.subr.mxu1 %v4320_v21 }
0x1d95   :  { %5370 = vpow2.f32 %v3649_v46  ;;  %v5537_v46 = vmov 1983009808   ;;  %4913 = vmatpush3.msra.mxu0 %v4320_v21  ;;  %4983 = vmatpush3.msra.mxu1 %v4320_v21 }
0x1d96   :  { %5372 = vtanh.f32 %v3642_v8  ;;  %v3773_v41 = vunpack.c.l.s4 %v5537_v46  ;;  %4914 = vmatprep.subr.mxu0 %v4319_v31  ;;  %4976 = vmatprep.subr.mxu1 %v4319_v31 }
0x1d97   :  { %4915 = vmatpush3.msra.mxu0 %v4319_v31  ;;  %4984 = vmatpush3.msra.mxu1 %v4319_v31 }
0x1d98   :  { %v3774_v39 = vunpack.c.0.s8 %v3773_v41 }
0x1d9c   :  { %v5369_v38 = vpop.eup %5368 }
0x1d9d   :  { %v3651_v61 = vadd.f32 1.0, %v5369_v38  ;;  %v4318_v38 = vld [vmem:[%s7479_s8 + $0x20] sm:$0xff] }
0x1d9e   :  { %4916 = vmatprep.subr.mxu0 %v4318_v38  ;;  %4977 = vmatprep.subr.mxu1 %v4318_v38 }
0x1d9f   :  { %5374 = vrcp.f32 %v3651_v61  ;;  %4917 = vmatpush3.msra.mxu0 %v4318_v38  ;;  %4985 = vmatpush3.msra.mxu1 %v4318_v38 }
0x1da0   :  { %5376 = vtanh.f32 %v3644_v9  ;;  %4918 = vmatprep.subr.mxu0 %v4317_v25  ;;  %4978 = vmatprep.subr.mxu1 %v4317_v25 }
0x1da1   :  { %4919 = vmatpush3.msra.mxu0 %v4317_v25  ;;  %4986 = vmatpush3.msra.mxu1 %v4317_v25 }
0x1da2   :  { %v5371_v15 = vpop.eup %5370 }
0x1da3   :  { %v3652_v19 = vadd.f32 1.0, %v5371_v15  ;;  %v5373_v18 = vpop.eup %5372 }
0x1da5   :  { %5378 = vrcp.f32 %v3652_v19 }
0x1da6   :  { %5380 = vpow2.f32 %v3661_v2 }
0x1dac   :  { %v5375_v51 = vpop.eup %5374 }
0x1dad   :  { %v3673_v14 = vmul.f32 %v5375_v51, %v5373_v18  ;;  %v3671_v20 = vmul.f32 %v5375_v51, %v6966_v11  ;;  %v5377_v24 = vpop.eup %5376  ;;  %v4316_v18 = vld [vmem:[%s7479_s8 + $0x10] sm:$0xff]  ;;  %v3770_v51 = vcombine.low %v7026_v34, %v7028_v62 }
0x1dae   :  { %4920 = vmatprep.subr.mxu0 %v4316_v18  ;;  %4979 = vmatprep.subr.mxu1 %v4316_v18 }
0x1daf   :  { %3677 = vrot.lane.b32.xlu0 %v3673_v14, %s5536_s27  ;;  %v7530_v14 = vld [vmem:[#allocation18_spill] sm:$0xff]  ;;  %4921 = vmatpush3.msra.mxu0 %v4316_v18 }
0x1db0   :  { %4987 = vmatpush3.msra.mxu1 %v4316_v18 }
0x1db2   :  { %v5379_v1 = vpop.eup %5378 }
0x1db3   :  { %v3674_v6 = vmul.f32 %v5379_v1, %v5377_v24  ;;  %v3672_v22 = vmul.f32 %v5379_v1, %v6970_v17  ;;  %v5381_v30 = vpop.eup %5380 }
0x1db5   :  { %3679 = vrot.lane.b32.xlu0 %v3674_v6, %s5536_s27 }
0x1db9   :  { %1119 = vrot.lane.b32.xlu0 %v7523_v33, %s5536_s27 }
0x1dbd   :  { %1489 = vrot.lane.b32.xlu0 %v7524_v47, %s5536_s27 }
0x1dc1   :  { %1859 = vrot.lane.b32.xlu0 %v7525_v40, %s5536_s27  ;;  %v4314_v40 = vld [vmem:[%s7479_s8] sm:$0xff] }
0x1dc5   :  { %2229 = vrot.lane.b32.xlu0 %v7526_v13, %s5536_s27 }
0x1dc9   :  { %2599 = vrot.lane.b32.xlu0 %v6710_v5, %s5536_s27  ;;  %v3663_v5 = vmul.f32 1.442695, %v3660_v44 }
0x1dcb   :  { %5382 = vpow2.f32 %v3663_v5 }
0x1dcd   :  { %2969 = vrot.lane.b32.xlu0 %v6811_v12, %s5536_s27  ;;  %v3665_v12 = vadd.f32 1.0, %v5381_v30 }
0x1dcf   :  { %5384 = vrcp.f32 %v3665_v12 }
0x1dd1   :  { %3339 = vrot.lane.b32.xlu0 %v6923_v42, %s5536_s27 }
0x1dd5   :  { %1306 = vrot.lane.b32.xlu0 %v7527_v43, %s5536_s27  ;;  %v7531_v43 = vld [vmem:[#allocation33_spill] sm:$0xff] }
0x1dd8   :  { %v5383_v49 = vpop.eup %5382 }
0x1dd9   :  { %1676 = vrot.lane.b32.xlu0 %v7528_v3, %s5536_s27  ;;  %v3666_v48 = vadd.f32 1.0, %v5383_v49 }
0x1ddc   :  { %v5385_v8 = vpop.eup %5384 }
0x1ddd   :  { %2046 = vrot.lane.b32.xlu0 %v7529_v32, %s5536_s27  ;;  %v5538_v32 = vmov 1934713408  }
0x1dde   :  { %v3837_v37 = vunpack.c.l.s4 %v5538_v32 }
0x1e21   :  { %v3678_v36 = vpop.permute.xlu0 %3677 }
0x1e22   :  { %v3683_v42 = vadd.f32 %v3678_v36, %v3671_v20  ;;  %v7138_v20 = vsub.s32 %v3774_v39, %v7530_v14 }
0x1e24   :  { %5386 = vtanh.f32 %v3683_v42  ;;  %v7098_v54 = vsel %vm3699_vm6, %v3683_v42, %v6966_v11  ;;  %v3778_v3 = vrot.slane %v3770_v51, %v7138_v20  ;;  %v3785_v2 = vrot.slane %v3771_v58, %v7138_v20 }
0x1e25   :  { %5388 = vrcp.f32 %v3666_v48  ;;  %v3817_v46 = vrot.slane %v3803_v53, %v7138_v20 }
0x1e27   :  { %v3680_v50 = vpop.permute.xlu0 %3679 }
0x1e28   :  { %v3684_v10 = vadd.f32 %v3680_v50, %v3672_v22 }
0x1e2a   :  { %5390 = vtanh.f32 %v3684_v10  ;;  %v7107_v52 = vsel %vm3700_vm7, %v3684_v10, %v6970_v17 }
0x1e2b   :  { %v1120_v11 = vpop.permute.xlu0 %1119 }
0x1e2c   :  { %1126 = vst.msk [vmem:[#allocation3 + $0x10] sm:$0xff] %vm786_vm12, %v1120_v11 }
0x1e2f   :  { %v1490_v17 = vpop.permute.xlu0 %1489 }
0x1e30   :  { %1496 = vst.msk [vmem:[#allocation3 + $0x30] sm:$0xff] %vm786_vm12, %v1490_v17 }
0x1e31   :  { %v5387_v61 = vpop.eup %5386 }
0x1e32   :  { %v3687_v60 = vmul.f32 %v5387_v61, %v5385_v8  ;;  %v5389_v24 = vpop.eup %5388 }
0x1e33   :  { %v1860_v9 = vpop.permute.xlu0 %1859  ;;  %v3740_v6 = vld [vmem:[#allocation3 + $0x10] sm:$0xff] }
0x1e34   :  { %1866 = vst.msk [vmem:[#allocation3 + $0x50] sm:$0xff] %vm786_vm12, %v1860_v9  ;;  %v3705_v15 = vsel %vm3699_vm6, %v3687_v60, 0.0  ;;  %v7129_v19 = vsel %vm3699_vm6, %v3687_v60, %v6974_v16  ;;  %v4315_v16 = vld [vmem:[%s7479_s8 + $0x8] sm:$0xff]  ;;  %s5539_s8 = smov [#allocation11]  }
0x1e35   :  { %3709 = vrot.lane.b32.xlu0 %v3705_v15, %s5536_s27  ;;  %4922 = vmatprep.subr.mxu0 %v4315_v16 }
0x1e36   :  { %4923 = vmatpush3.msra.mxu0 %v4315_v16  ;;  %4980 = vmatprep.subr.mxu1 %v4315_v16 }
0x1e37   :  { %v5391_v56 = vpop.eup %5390  ;;  %v2230_v1 = vpop.permute.xlu0 %2229  ;;  %v3744_v22 = vld [vmem:[#allocation3 + $0x30] sm:$0xff]  ;;  %4924 = vmatprep.subr.mxu0 %v4314_v40  ;;  %4988 = vmatpush3.msra.mxu1 %v4315_v16 }
0x1e38   :  { %2236 = vst.msk [vmem:[#allocation3 + $0x70] sm:$0xff] %vm786_vm12, %v2230_v1  ;;  %v3688_v33 = vmul.f32 %v5391_v56, %v5389_v24  ;;  %v3786_v47 = vcombine.low %v3740_v6, %v3744_v22  ;;  %v3787_v13 = vcombine.high %v3740_v6, %v3744_v22  ;;  %4925 = vmatpush3.msra.mxu0 %v4314_v40  ;;  %v3739_v22 = vld [vmem:[#allocation3 + $0x8] sm:$0xff] }
0x1e39   :  { %2416 = vrot.lane.b32.xlu0 %v7531_v43, %s5536_s27  ;;  %4981 = vmatprep.subr.mxu1 %v4314_v40 }
0x1e3a   :  { %v3706_v44 = vsel %vm3700_vm7, %v3688_v33, 0.0  ;;  %v3702_v5 = vsel %vm3700_vm7, %v3688_v33, %v6980_v7  ;;  %v3794_v30 = vrot.slane %v3786_v47, %v7138_v20  ;;  %v3801_v12 = vrot.slane %v3787_v13, %v7138_v20  ;;  %4989 = vmatpush3.msra.mxu1 %v4314_v40 }
0x1e3b   :  { %v2600_v36 = vpop.permute.xlu0 %2599  ;;  %3711 = vrot.lane.b32.xlu1 %v3706_v44, %s5536_s27  ;;  %v3838_v7 = vunpack.c.0.s8 %v3837_v37  ;;  %v3748_v42 = vld [vmem:[#allocation3 + $0x50] sm:$0xff]  ;;  %v4090_v44 = vcombine.low %v7054_v26, %v7056_v59 }
0x1e3c   :  { %2606 = vst.msk [vmem:[#allocation3 + $0x90] sm:$0xff] %vm786_vm12, %v2600_v36  ;;  %v3835_v34 = vcombine.high %v3778_v3, %v3794_v30  ;;  %v3850_v62 = vcombine.low %v3785_v2, %v3801_v12  ;;  %v3851_v58 = vcombine.high %v3785_v2, %v3801_v12  ;;  %v3834_v27 = vcombine.low %v3778_v3, %v3794_v30 }
0x1e3d   :  { %2786 = vrot.lane.b32.xlu0 %v6776_v55, %s5536_s27  ;;  %v7172_v11 = vsub.s32 %v3838_v7, %v7530_v14  ;;  %v3810_v55 = vrot.slane %v3802_v4, %v7138_v20 }
0x1e3f   :  { %v2970_v49 = vpop.permute.xlu0 %2969  ;;  %3722 = vrot.lane.b32.xlu1 %v3702_v5, %s5536_s27  ;;  %v3752_v48 = vld [vmem:[#allocation3 + $0x70] sm:$0xff]  ;;  %v7187_v61 = vrot.slane %v3834_v27, %v7172_v11  ;;  %v7190_v23 = vrot.slane %v3835_v34, %v7172_v11  ;;  %v7215_v18 = vrot.slane %v3851_v58, %v7172_v11  ;;  %v4098_v58 = vrot.slane %v4090_v44, %v7138_v20 }
0x1e40   :  { %2976 = vst.msk [vmem:[#allocation3 + $0xb0] sm:$0xff] %vm786_vm12, %v2970_v49  ;;  %v3818_v50 = vcombine.low %v3748_v42, %v3752_v48  ;;  %v3819_v10 = vcombine.high %v3748_v42, %v3752_v48 }
0x1e41   :  { %3156 = vrot.lane.b32.xlu0 %v6878_v29, %s5536_s27 }
0x1e42   :  { %v3826_v21 = vrot.slane %v3818_v50, %v7138_v20  ;;  %v3833_v41 = vrot.slane %v3819_v10, %v7138_v20 }
0x1e43   :  { %v3340_v31 = vpop.permute.xlu0 %3339  ;;  %3732 = vrot.lane.b32.xlu1 %v7107_v52, %s5536_s27 }
0x1e44   :  { %3346 = vst.msk [vmem:[#allocation3 + $0xd0] sm:$0xff] %vm786_vm12, %v3340_v31  ;;  %v3866_v29 = vcombine.low %v3810_v55, %v3826_v21  ;;  %v3867_v17 = vcombine.high %v3810_v55, %v3826_v21  ;;  %v3882_v8 = vcombine.low %v3817_v46, %v3833_v41  ;;  %v3883_v38 = vcombine.high %v3817_v46, %v3833_v41 }
0x1e45   :  { %3526 = vrot.lane.b32.xlu0 %v6982_v57, %s5536_s27  ;;  %v7205_v57 = vrot.slane %v3850_v62, %v7172_v11 }
0x1e46   :  { %v7193_v35 = vrot.slane %v3866_v29, %v7172_v11  ;;  %v7196_v53 = vrot.slane %v3867_v17, %v7172_v11  ;;  %v7199_v52 = vrot.slane %v3882_v8, %v7172_v11  ;;  %v7202_v39 = vrot.slane %v3883_v38, %v7172_v11 }
0x1e47   :  { %v1307_v60 = vpop.permute.xlu0 %1306 }
0x1e48   :  { %1312 = vst.msk [vmem:[#allocation3 + $0x28] sm:$0xff] %vm786_vm12, %v1307_v60  ;;  %v3898_v25 = vcombine.low %v7187_v61, %v7193_v35  ;;  %v3899_v9 = vcombine.high %v7187_v61, %v7193_v35  ;;  %v3900_v15 = vcombine.low %v7190_v23, %v7196_v53  ;;  %v3901_v51 = vcombine.high %v7190_v23, %v7196_v53  ;;  %v3760_v60 = vld [vmem:[#allocation3 + $0xb0] sm:$0xff] }
0x1e49   :  { %3720 = vrot.lane.b32.xlu0 %v7129_v19, %s5536_s27  ;;  %v3902_v14 = vcombine.low %v7205_v57, %v7199_v52  ;;  %v3903_v24 = vcombine.high %v7205_v57, %v7199_v52  ;;  %v3904_v16 = vcombine.low %v7215_v18, %v7202_v39  ;;  %v3905_v56 = vcombine.high %v7215_v18, %v7202_v39 }
0x1e4a   :  { %4926 = vmatprep.mubr.msk.f32.mxu0 %vm786_vm12, %v3898_v25  ;;  %v4058_v19 = vcombine.low %v7046_v28, %v7048_v0  ;;  %v4105_v28 = vrot.slane %v4091_v63, %v7138_v20  ;;  %v3756_v25 = vld [vmem:[#allocation3 + $0x90] sm:$0xff] }
0x1e4b   :  { %v1677_v1 = vpop.permute.xlu0 %1676 }
0x1e4c   :  { %1682 = vst.msk [vmem:[#allocation3 + $0x48] sm:$0xff] %vm786_vm12, %v1677_v1  ;;  %v4066_v43 = vrot.slane %v4058_v19, %v7138_v20  ;;  %v7294_v1 = vld [vmem:[#allocation3 + $0xa0] sm:$0xff]  ;;  %v3922_v19 = vcombine.low %v3756_v25, %v3760_v60 }
0x1e4d   :  { %3730 = vrot.lane.b32.xlu0 %v7098_v54, %s5536_s27  ;;  %v4073_v54 = vrot.slane %v4059_v45, %v7138_v20  ;;  %s4699_s27 = sshll.u32 %s5539_s8, 4  ;;  %s4700_s27 = int_to_ptr.vmem [resolvable:$true] %s4699_s27 }
0x1e4e   :  { %s5460_s22 = scalar_lea.vmem %s4700_s27, 256  ;;  %p5465_p2 = scmp.lt.s32.totalorder %s4700_s27, %s4700_s27 }
0x1e4f   :  { %v2047_v6 = vpop.permute.xlu0 %2046  ;;  %v3743_v33 = vld [vmem:[#allocation3 + $0x28] sm:$0xff]  ;;  %p5461_p1 = scmp.ne.s32.totalorder %s4700_s27, %s5460_s22  ;;  %p5466_p3 = scmp.lt.s32.totalorder %s5460_s22, %s5460_s22 }
0x1e50   :  { %2052 = vst.msk [vmem:[#allocation3 + $0x68] sm:$0xff] %vm786_vm12, %v2047_v6  ;;  %v4042_v47 = vcombine.low %v3739_v22, %v3743_v33  ;;  %v4043_v40 = vcombine.high %v3739_v22, %v3743_v33  ;;  %v3754_v22 = vld [vmem:[#allocation3 + $0x80] sm:$0xff] }
0x1e51   :  { %v3766_v33 = vld [vmem:[#allocation3 + $0xe0] sm:$0xff]  ;;  %p5467_p4 = por %p5466_p3, %p5465_p2 }
0x1e52   :  { %v4050_v13 = vrot.slane %v4042_v47, %v7138_v20  ;;  %v4057_v3 = vrot.slane %v4043_v40, %v7138_v20  ;;  %v3906_v47 = vcombine.low %v3754_v22, %v7294_v1 }
0x1e53   :  { %v3747_v5 = vld [vmem:[#allocation3 + $0x48] sm:$0xff]  ;;  %p5468_p5 = pnand %p5467_p4, %p5461_p1 }
0x1e54   :  { %v4122_v32 = vcombine.low %v4057_v3, %v4073_v54  ;;  %v4106_v37 = vcombine.low %v4050_v13, %v4066_v43  ;;  %v4123_v2 = vcombine.high %v4057_v3, %v4073_v54  ;;  %v4107_v34 = vcombine.high %v4050_v13, %v4066_v43  ;;  %v3762_v13 = vld [vmem:[#allocation3 + $0xc0] sm:$0xff] }
0x1e55   :  { %v3930_v43 = vrot.slane %v3922_v19, %v7138_v20  ;;  %v3938_v3 = vcombine.low %v3762_v13, %v3766_v33  ;;  %v3923_v19 = vcombine.high %v3756_v25, %v3760_v60 }
0x1e56   :  { %v7253_v42 = vrot.slane %v4107_v34, %v7172_v11  ;;  %v7256_v48 = vrot.slane %v4122_v32, %v7172_v11  ;;  %v7271_v59 = vrot.slane %v4106_v37, %v7172_v11  ;;  %v7274_v63 = vrot.slane %v4123_v2, %v7172_v11  ;;  %v3764_v32 = vld [vmem:[#allocation3 + $0xd0] sm:$0xff] }
0x1e57   :  { %v3751_v30 = vld [vmem:[#allocation3 + $0x68] sm:$0xff]  ;;  %v3914_v2 = vrot.slane %v3906_v47, %v7138_v20 }
0x1e58   :  { %v4074_v12 = vcombine.low %v3747_v5, %v3751_v30  ;;  %v4075_v36 = vcombine.high %v3747_v5, %v3751_v30  ;;  %v3946_v30 = vrot.slane %v3938_v3, %v7138_v20  ;;  %v3757_v3 = vld [vmem:[#allocation3 + $0x98] sm:$0xff] }
0x1e59   :  { %v3971_v47 = vcombine.high %v3914_v2, %v3930_v43 }
0x1e5a   :  { %v4082_v62 = vrot.slane %v4074_v12, %v7138_v20  ;;  %v4089_v7 = vrot.slane %v4075_v36, %v7138_v20  ;;  %v3970_v36 = vcombine.low %v3914_v2, %v3930_v43 }
0x1e5b   :  { %v3985_v61 = vrot.slane %v3971_v47, %v7172_v11 }
0x1e5c   :  { %v4139_v0 = vcombine.high %v4082_v62, %v4098_v58  ;;  %v4154_v45 = vcombine.low %v4089_v7, %v4105_v28  ;;  %v4138_v4 = vcombine.low %v4082_v62, %v4098_v58  ;;  %v4155_v49 = vcombine.high %v4089_v7, %v4105_v28 }
0x1e5d   :  { %v3978_v7 = vrot.slane %v3970_v36, %v7172_v11 }
0x1e5e   :  { %v7259_v50 = vrot.slane %v4139_v0, %v7172_v11  ;;  %v7262_v10 = vrot.slane %v4154_v45, %v7172_v11  ;;  %v7265_v27 = vrot.slane %v4138_v4, %v7172_v11  ;;  %v7268_v26 = vrot.slane %v4155_v49, %v7172_v11 }
0x1e60   :  { %v4172_v55 = vcombine.low %v7253_v42, %v7259_v50  ;;  %v4173_v21 = vcombine.high %v7253_v42, %v7259_v50  ;;  %v4174_v46 = vcombine.low %v7256_v48, %v7262_v10  ;;  %v4175_v41 = vcombine.high %v7256_v48, %v7262_v10 }
0x1e61   :  { %v4170_v31 = vcombine.low %v7271_v59, %v7265_v27  ;;  %v4176_v29 = vcombine.low %v7274_v63, %v7268_v26  ;;  %v4171_v17 = vcombine.high %v7271_v59, %v7265_v27  ;;  %v4177_v8 = vcombine.high %v7274_v63, %v7268_v26 }
0x1e62   :  { %4956 = vmatprep.mubr.msk.f32.mxu1 %vm786_vm12, %v4172_v55 }
0x1ea7   :  { %v3710_v38 = vpop.permute.xlu0 %3709 }
0x1ea8   :  { %3716 = vst.msk [vmem:[#allocation3 + $0xf0] sm:$0xff] %vm786_vm12, %v3710_v38  ;;  %v3761_v38 = vld [vmem:[#allocation3 + $0xb8] sm:$0xff] }
0x1eab   :  { %v2417_v6 = vpop.permute.xlu0 %2416 }
0x1eac   :  { %2422 = vst.msk [vmem:[#allocation3 + $0x88] sm:$0xff] %vm786_vm12, %v2417_v6 }
0x1ead   :  { %v3712_v40 = vpop.permute.xlu1 %3711 }
0x1eae   :  { %3717 = vst.msk [vmem:[#allocation3 + $0xf8] sm:$0xff] %vm786_vm12, %v3712_v40  ;;  %v3939_v40 = vcombine.high %v3762_v13, %v3766_v33  ;;  %v3937_v33 = vrot.slane %v3923_v19, %v7138_v20  ;;  %v3765_v13 = vld [vmem:[#allocation3 + $0xd8] sm:$0xff]  ;;  %v4195_v19 = vcombine.high %v3757_v3, %v3761_v38 }
0x1eaf   :  { %v2787_v54 = vpop.permute.xlu0 %2786  ;;  %v3768_v37 = vld [vmem:[#allocation3 + $0xf0] sm:$0xff] }
0x1eb0   :  { %2792 = vst.msk [vmem:[#allocation3 + $0xa8] sm:$0xff] %vm786_vm12, %v2787_v54  ;;  %v3954_v44 = vcombine.low %v3764_v32, %v3768_v37  ;;  %v3955_v55 = vcombine.high %v3764_v32, %v3768_v37  ;;  %v3953_v35 = vrot.slane %v3939_v40, %v7138_v20  ;;  %v4209_v53 = vrot.slane %v4195_v19, %v7138_v20 }
0x1eb1   :  { %v3723_v5 = vpop.permute.xlu1 %3722 }
0x1eb2   :  { %3727 = vst.msk [vmem:[#allocation11 + $0x8] sm:$0xff] %vm786_vm12, %v3723_v5  ;;  %v3962_v12 = vrot.slane %v3954_v44, %v7138_v20  ;;  %v3907_v5 = vcombine.high %v3754_v22, %v7294_v1  ;;  %v3969_v43 = vrot.slane %v3955_v55, %v7138_v20 }
0x1eb3   :  { %v3157_v34 = vpop.permute.xlu0 %3156  ;;  %v3755_v6 = vld [vmem:[#allocation3 + $0x88] sm:$0xff] }
0x1eb4   :  { %3162 = vst.msk [vmem:[#allocation3 + $0xc8] sm:$0xff] %vm786_vm12, %v3157_v34  ;;  %v4002_v62 = vcombine.low %v3946_v30, %v3962_v12  ;;  %v4003_v49 = vcombine.high %v3946_v30, %v3962_v12  ;;  %v4194_v30 = vcombine.low %v3757_v3, %v3761_v38  ;;  %v3921_v32 = vrot.slane %v3907_v5, %v7138_v20 }
0x1eb5   :  { %v3733_v58 = vpop.permute.xlu1 %3732  ;;  %v3769_v36 = vld [vmem:[#allocation3 + $0xf8] sm:$0xff]  ;;  %v4019_v3 = vcombine.high %v3953_v35, %v3969_v43 }
0x1eb6   :  { %3737 = vst.msk [vmem:[#allocation13 + $0x8] sm:$0xff] %vm786_vm12, %v3733_v58  ;;  %v4010_v28 = vrot.slane %v4002_v62, %v7172_v11  ;;  %v4017_v25 = vrot.slane %v4003_v49, %v7172_v11  ;;  %v4226_v1 = vcombine.low %v3765_v13, %v3769_v36  ;;  %v7332_v12 = vrot.slane %v4194_v30, %v7138_v20 }
0x1eb7   :  { %v3527_v0 = vpop.permute.xlu0 %3526  ;;  %v3759_v45 = vld [vmem:[#allocation3 + $0xa8] sm:$0xff]  ;;  %v4018_v62 = vcombine.low %v3953_v35, %v3969_v43  ;;  %v4033_v43 = vrot.slane %v4019_v3, %v7172_v11 }
0x1eb8   :  { %3532 = vst.msk [vmem:[#allocation3 + $0xe8] sm:$0xff] %vm786_vm12, %v3527_v0  ;;  %v4034_v4 = vcombine.low %v3978_v7, %v4010_v28  ;;  %v4178_v54 = vcombine.low %v3755_v6, %v3759_v45  ;;  %v4035_v60 = vcombine.high %v3978_v7, %v4010_v28  ;;  %v4036_v34 = vcombine.low %v3985_v61, %v4017_v25 }
0x1eb9   :  { %v3986_v28 = vcombine.low %v3921_v32, %v3937_v33  ;;  %v4227_v0 = vcombine.high %v3765_v13, %v3769_v36  ;;  %v4179_v55 = vcombine.high %v3755_v6, %v3759_v45  ;;  %v4037_v47 = vcombine.high %v3985_v61, %v4017_v25 }
0x1eba   :  { %4927 = vmatmul.mubr.msk.f32.vlgmr.msra.gmra.mxu0 %vm786_vm12, %v4034_v4  ;;  %v4026_v40 = vrot.slane %v4018_v62, %v7172_v11 }
0x1ebb   :  { %v3721_v44 = vpop.permute.xlu0 %3720  ;;  %4929 = vmatprep.mubr.msk.f32.mxu0 %vm786_vm12, %v3899_v9  ;;  %v7324_v9 = vrot.slane %v4178_v54, %v7138_v20  ;;  %v3763_v37 = vld [vmem:[#allocation3 + $0xc8] sm:$0xff]  ;;  %v3994_v5 = vrot.slane %v3986_v28, %v7172_v11  ;;  %v4193_v6 = vrot.slane %v4179_v55, %v7138_v20  ;;  %v4241_v23 = vrot.slane %v4227_v0, %v7138_v20 }
0x1ebc   :  { %3726 = vst.msk [vmem:[#allocation11] sm:$0xff] %vm786_vm12, %v3721_v44 }
0x1ebd   :  { %v4243_v49 = vcombine.high %v7324_v9, %v7332_v12  ;;  %v4258_v25 = vcombine.low %v4193_v6, %v4209_v53  ;;  %v4259_v61 = vcombine.high %v4193_v6, %v4209_v53 }
0x1ebe   :  { %4930 = vmatmul.mubr.msk.f32.gmra.mxu0 %vm786_vm12, %v4035_v60  ;;  %v3987_v60 = vcombine.high %v3921_v32, %v3937_v33 }
0x1ebf   :  { %v3731_v22 = vpop.permute.xlu0 %3730  ;;  %4932 = vmatprep.mubr.msk.f32.mxu0 %vm786_vm12, %v3900_v15  ;;  %v3767_v2 = vld [vmem:[#allocation3 + $0xe8] sm:$0xff]  ;;  %v4234_v15 = vrot.slane %v4226_v1, %v7138_v20  ;;  %v4257_v36 = vrot.slane %v4243_v49, %v7172_v11  ;;  %v4266_v52 = vrot.slane %v4258_v25, %v7172_v11  ;;  %v4273_v39 = vrot.slane %v4259_v61, %v7172_v11 }
0x1ec0   :  { %3736 = vst.msk [vmem:[#allocation13] sm:$0xff] %vm786_vm12, %v3731_v22  ;;  %v4210_v58 = vcombine.low %v3763_v37, %v3767_v2  ;;  %v4211_v7 = vcombine.high %v3763_v37, %v3767_v2  ;;  %v4001_v33 = vrot.slane %v3987_v60, %v7172_v11 }
0x1ec2   :  { %4933 = vmatmul.mubr.msk.f32.gmra.mxu0 %vm786_vm12, %v4036_v34  ;;  %v4218_v4 = vrot.slane %v4210_v58, %v7138_v20  ;;  %v4225_v44 = vrot.slane %v4211_v7, %v7138_v20  ;;  %v4039_v20 = vcombine.high %v3994_v5, %v4026_v40  ;;  %v4040_v57 = vcombine.low %v4001_v33, %v4033_v43 }
0x1ec3   :  { %4935 = vmatprep.mubr.msk.f32.mxu0 %vm786_vm12, %v3901_v51  ;;  %v4038_v51 = vcombine.low %v3994_v5, %v4026_v40 }
0x1ec4   :  { %v4275_v54 = vcombine.high %v4218_v4, %v4234_v15  ;;  %v4290_v30 = vcombine.low %v4225_v44, %v4241_v23  ;;  %v4274_v42 = vcombine.low %v4218_v4, %v4234_v15  ;;  %v4291_v50 = vcombine.high %v4225_v44, %v4241_v23 }
0x1ec6   :  { %4936 = vmatmul.mubr.msk.f32.gmra.mxu0 %vm786_vm12, %v4037_v47  ;;  %v4289_v45 = vrot.slane %v4275_v54, %v7172_v11  ;;  %v4298_v13 = vrot.slane %v4290_v30, %v7172_v11  ;;  %v4282_v35 = vrot.slane %v4274_v42, %v7172_v11  ;;  %v4305_v1 = vrot.slane %v4291_v50, %v7172_v11 }
0x1ec7   :  { %4938 = vmatprep.mubr.msk.f32.mxu0 %vm786_vm12, %v3902_v14 }
0x1ec8   :  { %v4308_v38 = vcombine.low %v4257_v36, %v4289_v45  ;;  %v4309_v14 = vcombine.high %v4257_v36, %v4289_v45  ;;  %v4313_v48 = vcombine.high %v4273_v39, %v4305_v1 }
0x1eca   :  { %4939 = vmatmul.mubr.msk.f32.gmra.mxu0 %vm786_vm12, %v4038_v51  ;;  %4957 = vmatmul.mubr.msk.f32.vlgmr.msra.gmra.mxu1 %vm786_vm12, %v4308_v38 }
0x1ecb   :  { %4941 = vmatprep.mubr.msk.f32.mxu0 %vm786_vm12, %v3903_v24  ;;  %4959 = vmatprep.mubr.msk.f32.mxu1 %vm786_vm12, %v4173_v21  ;;  %v4310_v24 = vcombine.low %v4266_v52, %v4298_v13  ;;  %v4242_v21 = vcombine.low %v7324_v9, %v7332_v12 }
0x1ecd   :  { %v4250_v9 = vrot.slane %v4242_v21, %v7172_v11 }
0x1ece   :  { %4942 = vmatmul.mubr.msk.f32.gmra.mxu0 %vm786_vm12, %v4039_v20  ;;  %4960 = vmatmul.mubr.msk.f32.gmra.mxu1 %vm786_vm12, %v4309_v14 }
0x1ecf   :  { %4944 = vmatprep.mubr.msk.f32.mxu0 %vm786_vm12, %v3904_v16  ;;  %4962 = vmatprep.mubr.msk.f32.mxu1 %vm786_vm12, %v4174_v46  ;;  %v4041_v16 = vcombine.high %v4001_v33, %v4033_v43  ;;  %v4311_v46 = vcombine.high %v4266_v52, %v4298_v13  ;;  %v4306_v18 = vcombine.low %v4250_v9, %v4282_v35 }
0x1ed0   :  { %v4307_v11 = vcombine.high %v4250_v9, %v4282_v35 }
0x1ed2   :  { %4945 = vmatmul.mubr.msk.f32.gmra.mxu0 %vm786_vm12, %v4040_v57  ;;  %4963 = vmatmul.mubr.msk.f32.gmra.mxu1 %vm786_vm12, %v4310_v24 }
0x1ed3   :  { %4947 = vmatprep.mubr.msk.f32.mxu0 %vm786_vm12, %v3905_v56  ;;  %4965 = vmatprep.mubr.msk.f32.mxu1 %vm786_vm12, %v4175_v41  ;;  %v4312_v56 = vcombine.low %v4273_v39, %v4305_v1 }
0x1ed6   :  { %4948 = vmatmul.mubr.msk.f32.gmra.mxu0 %vm786_vm12, %v4041_v16  ;;  %4966 = vmatmul.mubr.msk.f32.gmra.mxu1 %vm786_vm12, %v4311_v46 }
0x1ed7   :  { %4950 = vmatprep.mubr.msk.f32.mxu0 %vm786_vm12, %v4170_v31  ;;  %4968 = vmatprep.mubr.msk.f32.mxu1 %vm786_vm12, %v4176_v29 }
0x1eda   :  { %4951 = vmatmul.mubr.msk.f32.gmra.mxu0 %vm786_vm12, %v4306_v18  ;;  %4969 = vmatmul.mubr.msk.f32.gmra.mxu1 %vm786_vm12, %v4312_v56 }
0x1edb   :  { %4953 = vmatprep.mubr.msk.f32.mxu0 %vm786_vm12, %v4171_v17  ;;  %4971 = vmatprep.mubr.msk.f32.mxu1 %vm786_vm12, %v4177_v8 }
0x1ede   :  { %4954 = vmatmul.mubr.msk.f32.gmra.mxu0 %vm786_vm12, %v4307_v11  ;;  %4972 = vmatmul.mubr.msk.f32.gmra.mxu1 %vm786_vm12, %v4313_v48 }
0x1edf   :  { %5471 = shalt.err (!%p5468_p5)
}
0x1ee0   :  { %s5540_s23 = smov 128   ;;  %s5541_s0 = smov 8  }
0x1ee1   :  { %4705 = dma.vmem_to_hbm [thread:$0]  %s4700_s27, 256, %s7482_s11, [#allocation12], %s5540_s23, %s5540_s23, %s5541_s0  }
0x1ee2   :  { %s5542_s5 = smov [#allocation13]  }
0x1ee3   :  { %s4711_s26 = sshll.u32 %s5542_s5, 4  ;;  %s4712_s26 = int_to_ptr.vmem [resolvable:$true] %s4711_s26 }
0x1ee4   :  { %s5480_s28 = scalar_lea.vmem %s4712_s26, 256  ;;  %p5485_p7 = scmp.lt.s32.totalorder %s4712_s26, %s4712_s26 }
0x1ee5   :  { %p5481_p6 = scmp.ne.s32.totalorder %s4712_s26, %s5480_s28  ;;  %p5486_p8 = scmp.lt.s32.totalorder %s5480_s28, %s5480_s28 }
0x1ee7   :  { %p5487_p9 = por %p5486_p8, %p5485_p7 }
0x1ee9   :  { %p5488_p10 = pnand %p5487_p9, %p5481_p6 }
0x1eeb   :  { %5491 = shalt.err (!%p5488_p10)
}
0x1eec   :  { %4717 = dma.vmem_to_hbm [thread:$0]  %s4712_s26, 256, %s7483_s12, [#allocation12], %s5540_s23, %s5540_s23, %s5541_s0   ;;  %v7431_v10 = vld [vmem:[#allocation9] ss:$0 sm:$0xff] }
0x1eed   :  { %s5543_s11 = smov [#allocation10]  }
0x1eee   :  { %s4687_s12 = sshll.u32 %s5543_s11, 4  ;;  %s4688_s12 = int_to_ptr.vmem [resolvable:$true] %s4687_s12 }
0x1eef   :  { %s5500_s1 = scalar_lea.vmem %s4688_s12, 4096  ;;  %p5505_p12 = scmp.lt.s32.totalorder %s4688_s12, %s4688_s12 }
0x1ef0   :  { %p5501_p11 = scmp.ne.s32.totalorder %s4688_s12, %s5500_s1  ;;  %p5506_p13 = scmp.lt.s32.totalorder %s5500_s1, %s5500_s1 }
0x1ef2   :  { %p5507_p0 = por %p5506_p13, %p5505_p12 }
0x1ef4   :  { %p5508_p1 = pnand %p5507_p0, %p5501_p11 }
0x1f7a   :  { %v4928_v27 = vpop.f32.mrf.mxu0 }
0x1f7b   :  { %v4497_v26 = vadd.f32 %v4928_v27, %v7431_v10 }
0x1f7c   :  { %v4491_v59 = vpop.f32.mrf.mxu0 }
0x1f7d   :  { %4651 = vst [vmem:[#allocation10 + $0x8] sm:$0xff] %v4497_v26  ;;  %v4492_v63 = vadd.f32 %v7431_v10, %v4491_v59 }
0x1f7e   :  { %v4931_v41 = vpop.f32.mrf.mxu0 }
0x1f7f   :  { %4650 = vst [vmem:[#allocation10] sm:$0xff] %v4492_v63  ;;  %v4507_v31 = vadd.f32 %v4931_v41, %v7431_v10 }
0x1f80   :  { %v4501_v29 = vpop.f32.mrf.mxu0 }
0x1f81   :  { %4653 = vst [vmem:[#allocation10 + $0x18] sm:$0xff] %v4507_v31  ;;  %v4502_v17 = vadd.f32 %v7431_v10, %v4501_v29 }
0x1f82   :  { %v4934_v8 = vpop.f32.mrf.mxu0 }
0x1f83   :  { %4652 = vst [vmem:[#allocation10 + $0x10] sm:$0xff] %v4502_v17  ;;  %v4517_v22 = vadd.f32 %v4934_v8, %v7431_v10 }
0x1f84   :  { %v4511_v32 = vpop.f32.mrf.mxu0 }
0x1f85   :  { %4655 = vst [vmem:[#allocation10 + $0x28] sm:$0xff] %v4517_v22  ;;  %v4512_v37 = vadd.f32 %v7431_v10, %v4511_v32 }
0x1f86   :  { %v4937_v2 = vpop.f32.mrf.mxu0 }
0x1f87   :  { %4654 = vst [vmem:[#allocation10 + $0x20] sm:$0xff] %v4512_v37  ;;  %v4527_v12 = vadd.f32 %v4937_v2, %v7431_v10 }
0x1f88   :  { %v4521_v34 = vpop.f32.mrf.mxu0 }
0x1f89   :  { %4657 = vst [vmem:[#allocation10 + $0x38] sm:$0xff] %v4527_v12  ;;  %v4522_v62 = vadd.f32 %v7431_v10, %v4521_v34 }
0x1f8a   :  { %v4940_v58 = vpop.f32.mrf.mxu0  ;;  %v4958_v7 = vpop.f32.mrf.mxu1 }
0x1f8b   :  { %4656 = vst [vmem:[#allocation10 + $0x30] sm:$0xff] %v4522_v62  ;;  %v4537_v28 = vadd.f32 %v4940_v58, %v7431_v10  ;;  %v4597_v0 = vadd.f32 %v4958_v7, %v7431_v10 }
0x1f8c   :  { %v4531_v4 = vpop.f32.mrf.mxu0  ;;  %v4591_v15 = vpop.f32.mrf.mxu1 }
0x1f8d   :  { %4659 = vst [vmem:[#allocation10 + $0x48] sm:$0xff] %v4537_v28  ;;  %4671 = vst [vmem:[#allocation10 + $0xa8] sm:$0xff] %v4597_v0  ;;  %v4532_v49 = vadd.f32 %v7431_v10, %v4531_v4  ;;  %v4592_v55 = vadd.f32 %v7431_v10, %v4591_v15 }
0x1f8e   :  { %v4943_v19 = vpop.f32.mrf.mxu0  ;;  %v4961_v47 = vpop.f32.mrf.mxu1 }
0x1f8f   :  { %4658 = vst [vmem:[#allocation10 + $0x40] sm:$0xff] %v4532_v49  ;;  %4670 = vst [vmem:[#allocation10 + $0xa0] sm:$0xff] %v4592_v55  ;;  %v4547_v40 = vadd.f32 %v4943_v19, %v7431_v10  ;;  %v4607_v54 = vadd.f32 %v4961_v47, %v7431_v10 }
0x1f90   :  { %v4541_v44 = vpop.f32.mrf.mxu0  ;;  %v4601_v5 = vpop.f32.mrf.mxu1 }
0x1f91   :  { %4661 = vst [vmem:[#allocation10 + $0x58] sm:$0xff] %v4547_v40  ;;  %4673 = vst [vmem:[#allocation10 + $0xb8] sm:$0xff] %v4607_v54  ;;  %v4542_v36 = vadd.f32 %v7431_v10, %v4541_v44  ;;  %v4602_v45 = vadd.f32 %v7431_v10, %v4601_v5 }
0x1f92   :  { %v4946_v6 = vpop.f32.mrf.mxu0  ;;  %v4964_v23 = vpop.f32.mrf.mxu1 }
0x1f93   :  { %4660 = vst [vmem:[#allocation10 + $0x50] sm:$0xff] %v4542_v36  ;;  %4672 = vst [vmem:[#allocation10 + $0xb0] sm:$0xff] %v4602_v45  ;;  %v4557_v53 = vadd.f32 %v4946_v6, %v7431_v10  ;;  %v4617_v51 = vadd.f32 %v4964_v23, %v7431_v10 }
0x1f94   :  { %v4551_v38 = vpop.f32.mrf.mxu0  ;;  %v4611_v3 = vpop.f32.mrf.mxu1 }
0x1f95   :  { %4663 = vst [vmem:[#allocation10 + $0x68] sm:$0xff] %v4557_v53  ;;  %4675 = vst [vmem:[#allocation10 + $0xc8] sm:$0xff] %v4617_v51  ;;  %v4552_v30 = vadd.f32 %v7431_v10, %v4551_v38  ;;  %v4612_v60 = vadd.f32 %v7431_v10, %v4611_v3 }
0x1f96   :  { %v4949_v25 = vpop.f32.mrf.mxu0  ;;  %v4967_v20 = vpop.f32.mrf.mxu1 }
0x1f97   :  { %4662 = vst [vmem:[#allocation10 + $0x60] sm:$0xff] %v4552_v30  ;;  %4674 = vst [vmem:[#allocation10 + $0xc0] sm:$0xff] %v4612_v60  ;;  %v4567_v14 = vadd.f32 %v4949_v25, %v7431_v10  ;;  %v4627_v43 = vadd.f32 %v4967_v20, %v7431_v10 }
0x1f98   :  { %v4561_v13 = vpop.f32.mrf.mxu0  ;;  %v4621_v33 = vpop.f32.mrf.mxu1 }
0x1f99   :  { %4665 = vst [vmem:[#allocation10 + $0x78] sm:$0xff] %v4567_v14  ;;  %4677 = vst [vmem:[#allocation10 + $0xd8] sm:$0xff] %v4627_v43  ;;  %v4562_v52 = vadd.f32 %v7431_v10, %v4561_v13  ;;  %v4622_v57 = vadd.f32 %v7431_v10, %v4621_v33 }
0x1f9a   :  { %v4952_v24 = vpop.f32.mrf.mxu0  ;;  %v4970_v42 = vpop.f32.mrf.mxu1 }
0x1f9b   :  { %4664 = vst [vmem:[#allocation10 + $0x70] sm:$0xff] %v4562_v52  ;;  %4676 = vst [vmem:[#allocation10 + $0xd0] sm:$0xff] %v4622_v57  ;;  %v4577_v50 = vadd.f32 %v4952_v24, %v7431_v10  ;;  %v4637_v21 = vadd.f32 %v4970_v42, %v7431_v10 }
0x1f9c   :  { %v4571_v61 = vpop.f32.mrf.mxu0  ;;  %v4631_v16 = vpop.f32.mrf.mxu1 }
0x1f9d   :  { %4667 = vst [vmem:[#allocation10 + $0x88] sm:$0xff] %v4577_v50  ;;  %4679 = vst [vmem:[#allocation10 + $0xe8] sm:$0xff] %v4637_v21  ;;  %v4572_v46 = vadd.f32 %v7431_v10, %v4571_v61  ;;  %v4632_v35 = vadd.f32 %v7431_v10, %v4631_v16 }
0x1f9e   :  { %v4955_v1 = vpop.f32.mrf.mxu0  ;;  %v4973_v9 = vpop.f32.mrf.mxu1 }
0x1f9f   :  { %4666 = vst [vmem:[#allocation10 + $0x80] sm:$0xff] %v4572_v46  ;;  %4678 = vst [vmem:[#allocation10 + $0xe0] sm:$0xff] %v4632_v35  ;;  %v4587_v39 = vadd.f32 %v4955_v1, %v7431_v10  ;;  %v4647_v18 = vadd.f32 %v4973_v9, %v7431_v10 }
0x1fa0   :  { %v4581_v56 = vpop.f32.mrf.mxu0  ;;  %v4641_v11 = vpop.f32.mrf.mxu1 }
0x1fa1   :  { %4669 = vst [vmem:[#allocation10 + $0x98] sm:$0xff] %v4587_v39  ;;  %4681 = vst [vmem:[#allocation10 + $0xf8] sm:$0xff] %v4647_v18  ;;  %v4582_v48 = vadd.f32 %v7431_v10, %v4581_v56  ;;  %v4642_v27 = vadd.f32 %v7431_v10, %v4641_v11 }
0x1fa3   :  { %4668 = vst [vmem:[#allocation10 + $0x90] sm:$0xff] %v4582_v48  ;;  %4680 = vst [vmem:[#allocation10 + $0xf0] sm:$0xff] %v4642_v27 }
0x1fa4   :  { %5511 = shalt.err (!%p5508_p1)
}
0x1fa5   :  { %4693 = dma.vmem_to_hbm [thread:$0]  %s4688_s12, 4096, %s7481_s10, [#allocation6], %s5540_s23, %s5540_s23, %s5541_s0  }
0x1fa6   :  { %5524 = dma.done.wait [#allocation6], 4096  }
0x1fa7   :  { %5525 = vsyncadd [#allocation6], 4294963200 }
0x1fa8   :  { %5526 = dma.done.wait [#allocation12], 512  }
0x1fa9   :  { %5527 = vsyncadd [#allocation12], 4294966784 }
0x1faa   :  { %4727 = vsyncpa [#allocation5], 1 }
0x1fab   :  { %4728 = vsyncpa [#allocation8], 1 }
0x1fac   :  { %4729 = vsyncpa [#allocation6], 1 }
0x1fad   :  { %4730 = vsyncpa [#allocation12], 1 }

</bundles_post_ra>
